<compile_context>
chip_gen: v7x
topology: tpu7x:2x2x1
jax: 0.10.0
libtpu: 0.0.40
codegen_flags: <defaults>
</compile_context>

<pallas_src>
import jax
import jax.numpy as jnp
from jax.experimental import pallas as pl
from jax.experimental.pallas import tpu as pltpu


C, H, W = 512, 7, 7
K = C * H * W            # 25088
N_OUT = 128
N_SPLIT = 2              # K reduction steps (keeps the per-step weight slab at 3.2 MB bf16)
TK = K // N_SPLIT        # 12544
EPS = 1e-12              # F.normalize default eps


def fused_head_kernel(x_ref, w_ref, b_ref, o_ref):
    """ReLU + split-K matmul + bias + L2-normalize, fused.

    Grid: (N_SPLIT,) reduction ("arbitrary"); o_ref keeps the same block index every step,
    so it is the VMEM-resident f32 accumulator.

    x_ref : (B, TK)      f32 flattened-feature half-slab
    w_ref : (TK, N_OUT)  bf16 weight half-slab (K x N layout)
    b_ref : (1, N_OUT)   f32 bias
    o_ref : (B, N_OUT)   f32 output / accumulator (resident across the reduction axis)
    """
    k = pl.program_id(0)

    @pl.when(k == 0)
    def _init():
        o_ref[...] = jnp.broadcast_to(b_ref[...], o_ref.shape)

    xr = jnp.maximum(x_ref[...], 0.0).astype(jnp.bfloat16)
    o_ref[...] += jnp.dot(xr, w_ref[...], preferred_element_type=jnp.float32)

    @pl.when(k == pl.num_programs(0) - 1)
    def _finalize():
        y = o_ref[...]
        sumsq = jnp.sum(y * y, axis=-1, keepdims=True)
        # torch F.normalize: y / max(||y||, eps) == y * rsqrt(max(sum(y*y), eps^2))
        inv = jax.lax.rsqrt(jnp.maximum(sumsq, EPS * EPS))
        o_ref[...] = y * inv


def metric_resnet_head(x_nchw, w_kn, bias):
    """x_nchw: (B, 512, 7, 7) f32 backbone features (backbone treated as identity).
    w_kn   : (K, 128) f32 (transpose of torch Linear weight (128, K)); cast to bf16 for the DMA.
    bias   : (128,)   f32.
    Returns (B, 128) L2-normalized f32 embeddings."""
    B = x_nchw.shape[0]
    x_flat = x_nchw.reshape(B, K)                 # same flatten order as nn.Flatten on NCHW

    w_bf16 = w_kn.astype(jnp.bfloat16)            # halve weight HBM bytes; f32 MXU accumulation
    b2d = bias.reshape(1, N_OUT).astype(jnp.float32)

    cost = pl.CostEstimate(
        flops=2 * B * K * N_OUT,
        transcendentals=0,
        bytes_accessed=K * N_OUT * 2 + B * K * 4 + B * N_OUT * 4 + N_OUT * 4,
    )

    out = pl.pallas_call(
        fused_head_kernel,
        out_shape=jax.ShapeDtypeStruct((B, N_OUT), jnp.float32),
        grid=(N_SPLIT,),
        in_specs=[
            pl.BlockSpec((B, TK), lambda k: (0, k)),        # features half-slab
            pl.BlockSpec((TK, N_OUT), lambda k: (k, 0)),    # bf16 weight half-slab
            pl.BlockSpec((1, N_OUT), lambda k: (0, 0)),     # bias (tiny, re-used)
        ],
        # Same output block for every reduction step -> VMEM-resident accumulator.
        out_specs=pl.BlockSpec((B, N_OUT), lambda k: (0, 0)),
        compiler_params=pltpu.CompilerParams(
            dimension_semantics=("arbitrary",),
            vmem_limit_bytes=12 * 1024 * 1024,
        ),
        cost_estimate=cost,
    )(x_flat, w_bf16, b2d)

    return out


def reference_head(x_nchw, w_kn, bias):
    """Pure-JAX reference using the same bf16-weight / f32-accumulate numerics."""
    B = x_nchw.shape[0]
    xr = jnp.maximum(x_nchw.reshape(B, K), 0.0).astype(jnp.bfloat16)
    y = jnp.dot(xr, w_kn.astype(jnp.bfloat16), preferred_element_type=jnp.float32) + bias
    norm = jnp.sqrt(jnp.sum(y * y, axis=1, keepdims=True))
    return y / jnp.maximum(norm, EPS)


if __name__ == "__main__":
    key = jax.random.PRNGKey(0)
    k_x, k_w, k_b = jax.random.split(key, 3)

    B = 2
    # Backbone output features (backbone treated as identity here).
    x = jax.random.normal(k_x, (B, C, H, W), dtype=jnp.float32)

    # Deterministic Linear(25088 -> 128) params (Kaiming-uniform-ish scale).
    bound = 1.0 / (K ** 0.5)
    w_kn = jax.random.uniform(k_w, (K, N_OUT), jnp.float32, -bound, bound)
    bias = jax.random.uniform(k_b, (N_OUT,), jnp.float32, -bound, bound)

    out = metric_resnet_head(x, w_kn, bias)
    out = jax.block_until_ready(out)

    ref = reference_head(x, w_kn, bias)
    assert out.shape == (B, N_OUT)
    # Tolerance covers f32 accumulation-order differences between the split-K kernel
    # and the single XLA dot (both use bf16 inputs, f32 accumulate).
    assert jnp.allclose(out, ref, atol=1e-3, rtol=1e-3), "mismatch vs reference"
    # Embeddings should be unit-norm.
    assert jnp.allclose(jnp.linalg.norm(out, axis=1), 1.0, atol=1e-4)

    print("KERNEL_OK")
</pallas_src>

<mosaic_0001>
module attributes {stable_mosaic.version = 11 : i64} {
  func.func @fused_head_kernel(%arg0: i32, %arg1: memref<2x12544xf32, #tpu.memory_space<vmem>>, %arg2: memref<12544x128xbf16, #tpu.memory_space<vmem>>, %arg3: memref<1x128xf32, #tpu.memory_space<vmem>>, %arg4: memref<2x128xf32, #tpu.memory_space<vmem>>) attributes {dimension_semantics = [#tpu.dimension_semantics<arbitrary>], iteration_bounds = array<i64: 2>, scalar_prefetch = 0 : i64, scratch_operands = 0 : i64, tpu.core_type = #tpu.core_type<tc>, window_params = [{transform_indices = @transform_0, window_bounds = array<i64: 2, 12544>}, {transform_indices = @transform_1, window_bounds = array<i64: 12544, 128>}, {pipeline_mode = #tpu.pipeline_mode<synchronous>, transform_indices = @transform_2, window_bounds = array<i64: 1, 128>}, {pipeline_mode = #tpu.pipeline_mode<synchronous>, transform_indices = @transform_3, window_bounds = array<i64: 2, 128>}]} {
    %c0_i32 = arith.constant 0 : i32
    %0 = arith.cmpi eq, %arg0, %c0_i32 : i32
    %1 = arith.extui %0 : i1 to i32
    %c0_i32_0 = arith.constant 0 : i32
    %2 = arith.cmpi ne, %1, %c0_i32_0 : i32
    scf.if %2 {
      %c0_10 = arith.constant 0 : index
      %c0_11 = arith.constant 0 : index
      %15 = vector.load %arg3[%c0_10, %c0_11] : memref<1x128xf32, #tpu.memory_space<vmem>>, vector<1x128xf32>
      %16 = vector.shape_cast %15 : vector<1x128xf32> to vector<1x128xf32>
      %17 = vector.broadcast %16 : vector<1x128xf32> to vector<2x128xf32>
      %c0_12 = arith.constant 0 : index
      %c0_13 = arith.constant 0 : index
      %18 = vector.load %arg4[%c0_12, %c0_13] : memref<2x128xf32, #tpu.memory_space<vmem>>, vector<2x128xf32>
      tpu.vector_store %arg4[%c0_12, %c0_13], %17 {strides = array<i32>} : memref<2x128xf32, #tpu.memory_space<vmem>>, vector<2x128xf32>,
    } else {
    }
    %c0 = arith.constant 0 : index
    %c0_1 = arith.constant 0 : index
    %3 = vector.load %arg1[%c0, %c0_1] : memref<2x12544xf32, #tpu.memory_space<vmem>>, vector<2x12544xf32>
    %cst = arith.constant 0.000000e+00 : f32
    %4 = vector.broadcast %cst : f32 to vector<2x12544xf32>
    %5 = arith.maximumf %3, %4 : vector<2x12544xf32>
    %6 = arith.truncf %5 : vector<2x12544xf32> to vector<2x12544xbf16>
    %c0_2 = arith.constant 0 : index
    %c0_3 = arith.constant 0 : index
    %7 = vector.load %arg4[%c0_2, %c0_3] : memref<2x128xf32, #tpu.memory_space<vmem>>, vector<2x128xf32>
    %c0_4 = arith.constant 0 : index
    %c0_5 = arith.constant 0 : index
    %8 = vector.load %arg2[%c0_4, %c0_5] : memref<12544x128xbf16, #tpu.memory_space<vmem>>, vector<12544x128xbf16>
    %cst_6 = arith.constant dense<0.000000e+00> : vector<2x128xf32>
    %9 = tpu.matmul %6, %8, %cst_6 {dimension_numbers = #tpu.dot_dimension_numbers<[1], [0], [0], [1], [0, 0, 1, 1], [], []>} : vector<2x12544xbf16>, vector<12544x128xbf16>, vector<2x128xf32> -> vector<2x128xf32>
    %10 = arith.addf %7, %9 : vector<2x128xf32>
    %c0_7 = arith.constant 0 : index
    %c0_8 = arith.constant 0 : index
    %11 = vector.load %arg4[%c0_7, %c0_8] : memref<2x128xf32, #tpu.memory_space<vmem>>, vector<2x128xf32>
    tpu.vector_store %arg4[%c0_7, %c0_8], %10 {strides = array<i32>} : memref<2x128xf32, #tpu.memory_space<vmem>>, vector<2x128xf32>,
    %c1_i32 = arith.constant 1 : i32
    %12 = arith.cmpi eq, %arg0, %c1_i32 : i32
    %13 = arith.extui %12 : i1 to i32
    %c0_i32_9 = arith.constant 0 : i32
    %14 = arith.cmpi ne, %13, %c0_i32_9 : i32
    scf.if %14 {
      %c0_10 = arith.constant 0 : index
      %c0_11 = arith.constant 0 : index
      %15 = vector.load %arg4[%c0_10, %c0_11] : memref<2x128xf32, #tpu.memory_space<vmem>>, vector<2x128xf32>
      %16 = arith.mulf %15, %15 : vector<2x128xf32>
      %cst_12 = arith.constant dense<0.000000e+00> : vector<2xf32>
      %17 = vector.multi_reduction <add>, %16, %cst_12 [1] : vector<2x128xf32> to vector<2xf32>
      %18 = vector.shape_cast %17 : vector<2xf32> to vector<2x1xf32>
      %cst_13 = arith.constant 1.000000e-24 : f32
      %19 = vector.broadcast %cst_13 : f32 to vector<2x1xf32>
      %20 = arith.maximumf %18, %19 : vector<2x1xf32>
      %21 = math.rsqrt %20 : vector<2x1xf32>
      %22 = vector.broadcast %21 : vector<2x1xf32> to vector<2x128xf32>
      %23 = arith.mulf %15, %22 : vector<2x128xf32>
      %c0_14 = arith.constant 0 : index
      %c0_15 = arith.constant 0 : index
      %24 = vector.load %arg4[%c0_14, %c0_15] : memref<2x128xf32, #tpu.memory_space<vmem>>, vector<2x128xf32>
      tpu.vector_store %arg4[%c0_14, %c0_15], %23 {strides = array<i32>} : memref<2x128xf32, #tpu.memory_space<vmem>>, vector<2x128xf32>,
    } else {
    }
    return
  }
  func.func @transform_0(%arg0: i32) -> (i32, i32) {
    %c0_i32 = arith.constant 0 : i32
    %c0_i32_0 = arith.constant 0 : i32
    return %c0_i32, %arg0 : i32, i32
  }
  func.func @transform_1(%arg0: i32) -> (i32, i32) {
    %c0_i32 = arith.constant 0 : i32
    %c0_i32_0 = arith.constant 0 : i32
    return %arg0, %c0_i32 : i32, i32
  }
  func.func @transform_2(%arg0: i32) -> (i32, i32) {
    %c0_i32 = arith.constant 0 : i32
    %c0_i32_0 = arith.constant 0 : i32
    %c0_i32_1 = arith.constant 0 : i32
    return %c0_i32, %c0_i32_0 : i32, i32
  }
  func.func @transform_3(%arg0: i32) -> (i32, i32) {
    %c0_i32 = arith.constant 0 : i32
    %c0_i32_0 = arith.constant 0 : i32
    %c0_i32_1 = arith.constant 0 : i32
    return %c0_i32, %c0_i32_0 : i32, i32
  }
}

</mosaic_0001>

<bundles_post_ra>
// kernel: tpu_custom_call.1
= control target key start
LH: loop header
LB: loop body
LE: loop exit
PB: predicated region body
PF: predicated region fallthrough
CT: control target
= control target key end

     0   :  { %8 = vsyncpa [#allocation3], 0  ;;  %s13316_s0 = inlined_call_operand.hbm [shape: f32[2,25088], index: 0, kind: input, shape index: {}]   ;;  %s13317_s1 = inlined_call_operand.hbm [shape: bf16[25088,128], index: 1, kind: input, shape index: {}]   ;;  %s13318_s2 = inlined_call_operand.hbm [shape: f32[1,128], index: 2, kind: input, shape index: {}]   ;;  %s13319_s3 = inlined_call_operand.hbm [shape: f32[2,128], index: 3, kind: output, shape index: {}]  }
   0x1   :  { %10 = vsyncpa [#allocation3 + $0x1], 0 }
   0x2   :  { %11 = vsyncpa [#allocation6], 0 }
   0x3   :  { %13 = vsyncpa [#allocation6 + $0x1], 0 }
   0x4   :  { %14 = vsyncpa [#allocation4], 0  ;;  %s12190_s12 = smov 0   ;;  %s12192_s13 = smov 0  }
   0x5   :  { %s12194_s14 = smov 0   ;;  %s12196_s15 = smov 0  }
   0x6 LB: > { %s12209_s16 = sadd.s32 4294967295, %s12161_s15   ;;  %s12212_s17 = sadd.s32 1, %s12161_s15   ;;  %s12161_s15 = sphi %s12196_s15, %s13337_s15   ;;  %s12157_s14 = sphi %s12194_s14, %s13336_s14   ;;  %s12153_s13 = sphi %s12192_s13, %s13335_s13   ;;  %s12149_s12 = sphi %s12190_s12, %s13334_s12  }
   0x7   : > { %s24_s18 = ssub.s32 %s12161_s15, %s12212_s17  ;;  %s27_s19 = sadd.s32 1, %s12157_s14 }
   0x8   : > { %p25_p0 = scmp.eq.s32.totalorder %s24_s18, 0  ;;  %p34_p1 = scmp.ne.s32.totalorder %s12157_s14, %s12153_s13 }
   0x9   : > { %p40_p2 = scmp.ne.s32.totalorder %s12153_s13, %s12149_s12  ;;  %p13320_p3 = scmp.eq.s32.totalorder %s12209_s16, 0 }
   0xa   : > { %s12222_s20 = scalar_select %p25_p0, %s12157_s14, %s27_s19  }
   0xb   : > { %p12226_p4 = por %p13320_p3, %p40_p2  ;;  %p9268_p5 = scmp.ge.s32.totalorder %s12161_s15, 1 }
   0xc   : > { %p119_p6 = scmp.lt.s32.totalorder %s12161_s15, 3  ;;  %s12163_s23 = smov [#allocation7]  }
   0xd   : > { %s13324_s21 = scalar_select %p12226_p4, 1, 0 }
   0xe   : > { %p12233_p8 = pnand %p9268_p5, %p119_p6  ;;  %s132_s24 = sshll.u32 %s12163_s23, 4  ;;  %s133_s24 = int_to_ptr.vmem [resolvable:$true] %s132_s24 }
   0xf   : > { %p35_p9 = scmp.eq.s32.totalorder %s12161_s15, 0  ;;  %p11174_p11 = scmp.lt.s32.totalorder %s12161_s15, 2 }
  0x10   : > { %s13325_s22 = scalar_select %p12233_p8, 1, 0 }
  0x11   : > { %p11162_p10 = pneg %p12233_p8  ;;  %p36_p12 = por %p35_p9, %p34_p1 }
  0x12   : > { %s12245_s25 = sand.u32 1, %s12157_s14   ;;  %s10066_s29 = smul.u32 3136, %s12161_s15 }
  0x13   : > { %p12249_p13 = pnand %p11162_p10, %p13320_p3  ;;  %s11146_s27 = smul.u32 196, %s12245_s25 }
  0x14   : > { %p12254_p0 = pnand %p11174_p11, %p36_p12  ;;  %s12001_s5 = scalar_lea.hbm %s13318_s2, 16 }
  0x15   : > { %p12002_p1 = scmp.ne.s32.totalorder %s13318_s2, %s12001_s5  ;;  %p12003_p2 = pneg %p12249_p13 }
  0x16   : > { %s13327_s28 = scalar_select %p12254_p0, 1, 0 }
  0x17   : > { %p12004_p5 = pnand %p12003_p2, %p12002_p1  ;;  %p12008_p9 = scmp.lt.u32.totalorder %s12001_s5, %s13318_s2 }
  0x19   : > { %p12005_p6 = pneg %p12004_p5 }
  0x1b   : > { %p12010_p10 = pnand %p12008_p9, %p12005_p6 }
  0x1d   : > { %12013 = shalt.err (!%p12010_p10)
}
  0x1e   : > { %s12014_s10 = scalar_lea.vmem %s133_s24, 16  ;;  %s12021_s11 = scalar_lea.vmem %s133_s24, 32 }
  0x1f   : > { %p12015_p11 = scmp.ne.s32.totalorder %s133_s24, %s12014_s10  ;;  %p12022_p3 = scmp.lt.s32.totalorder %s133_s24, %s133_s24 }
  0x20   : > { %p12023_p4 = scmp.lt.s32.totalorder %s12021_s11, %s12014_s10 }
  0x21   : > { %p12017_p12 = pnand %p12015_p11, %p12003_p2 }
  0x22   : > { %p12024_p8 = por %p12023_p4, %p12022_p3 }
  0x23   : > { %p12018_p7 = pneg %p12017_p12 }
  0x25   : > { %p12025_p0 = pnand %p12024_p8, %p12018_p7 }
  0x27   : > { %12028 = shalt.err (!%p12025_p0)
}
  0x28   : > { %11165 = dma.hbm_to_vmem [thread:$0]  (!%p12249_p13), %s13318_s2, 16, %s133_s24, [#allocation6]  }
  0x29   : > { %s12278_s30 = scalar_lea.hbm %s13316_s0, %s10066_s29  ;;  %s147_s4 = scalar_lea.vmem [#allocation2], %s11146_s27 }
  0x2a   : > { %s155_s5 = sshll.u32 %s147_s4, 4  ;;  %s11147_s26 = smul.u32 6272, %s12245_s25  ;;  %s12280_s5 = int_to_ptr.vmem [resolvable:$true] %s155_s5 }
  0x2b   : > { %s144_s6 = scalar_lea.sflag [#allocation3], %s12245_s25  ;;  %s12029_s7 = scalar_lea.hbm %s12278_s30, 3136 }
  0x2c   : > { %p12030_p3 = scmp.ne.s32.totalorder %s12278_s30, %s12029_s7  ;;  %p13328_p4 = scmp.ne.s32.totalorder %s13327_s28, 0 }
  0x2d   : > { %s12034_s8 = scalar_lea.hbm %s13316_s0, 6272  ;;  %p12035_p0 = scmp.lt.u32.totalorder %s12278_s30, %s13316_s0 }
  0x2e   : > { %p12031_p7 = pneg %p13328_p4  ;;  %p12036_p1 = scmp.lt.u32.totalorder %s12034_s8, %s12029_s7 }
  0x2f   : > { %p12038_p5 = scmp.lt.u32.totalorder %s12029_s7, %s12278_s30 }
  0x30   : > { %p12032_p8 = pnand %p12031_p7, %p12030_p3  ;;  %p12037_p2 = por %p12036_p1, %p12035_p0 }
  0x32   : > { %p12033_p13 = pneg %p12032_p8  ;;  %p12039_p6 = por %p12038_p5, %p12037_p2 }
  0x34   : > { %p12040_p9 = pnand %p12039_p6, %p12033_p13 }
  0x36   : > { %12043 = shalt.err (!%p12040_p9)
}
  0x37   : > { %s12044_s27 = scalar_lea.vmem %s12280_s5, 3136  ;;  %s12164_s11 = smov [#allocation2]  }
  0x38   : > { %p12045_p10 = scmp.ne.s32.totalorder %s12280_s5, %s12044_s27  ;;  %s12049_s12 = sshll.u32 %s12164_s11, 4  ;;  %s12050_s12 = int_to_ptr.vmem [resolvable:$false] %s12049_s12 }
  0x39   : > { %s12051_s18 = scalar_lea.vmem %s12050_s12, 6272  ;;  %p12052_p3 = scmp.lt.s32.totalorder %s12280_s5, %s12050_s12 }
  0x3a   : > { %p12047_p11 = pnand %p12045_p10, %p12031_p7  ;;  %p12053_p8 = scmp.lt.s32.totalorder %s12051_s18, %s12044_s27 }
  0x3c   : > { %p12048_p12 = pneg %p12047_p11  ;;  %p12054_p0 = por %p12053_p8, %p12052_p3 }
  0x3e   : > { %p12055_p1 = pnand %p12054_p0, %p12048_p12 }
  0x40   : > { %12058 = shalt.err (!%p12055_p1)
}
  0x41   : > { %11169 = dma.hbm_to_vmem [thread:$0]  (!%p13328_p4), %s12278_s30, 3136, %s12280_s5, %s144_s6  }
  0x42   : > { %s162_s19 = sand.u32 1, %s12161_s15   ;;  %s166_s23 = scalar_lea.vmem [#allocation5], %s11147_s26 }
  0x43   : > { %s173_s4 = sshll.u32 %s166_s23, 4  ;;  %s10067_s7 = smul.u32 100352, %s12161_s15  ;;  %s12312_s4 = int_to_ptr.vmem [resolvable:$true] %s173_s4 }
  0x44   : > { %s12320_s9 = scalar_lea.sflag [#allocation6], %s162_s19  ;;  %s12064_s15 = scalar_lea.hbm %s13317_s1, 200704 }
  0x45   : > { %s12318_s8 = scalar_lea.hbm %s13317_s1, %s10067_s7 }
  0x46   : > { %s12059_s10 = scalar_lea.hbm %s12318_s8, 100352  ;;  %p12065_p6 = scmp.lt.u32.totalorder %s12318_s8, %s13317_s1 }
  0x47   : > { %p12060_p13 = scmp.ne.s32.totalorder %s12318_s8, %s12059_s10  ;;  %p12066_p9 = scmp.lt.u32.totalorder %s12064_s15, %s12059_s10 }
  0x48   : > { %p12068_p11 = scmp.lt.u32.totalorder %s12059_s10, %s12318_s8 }
  0x49   : > { %p12062_p2 = pnand %p12060_p13, %p12031_p7  ;;  %p12067_p10 = por %p12066_p9, %p12065_p6 }
  0x4b   : > { %p12063_p5 = pneg %p12062_p2  ;;  %p12069_p12 = por %p12068_p11, %p12067_p10 }
  0x4d   : > { %p12070_p3 = pnand %p12069_p12, %p12063_p5 }
  0x4f   : > { %12073 = shalt.err (!%p12070_p3)
}
  0x50   : > { %s12074_s6 = scalar_lea.vmem %s12312_s4, 100352  ;;  %s12165_s27 = smov [#allocation5]  }
  0x51   : > { %p12075_p8 = scmp.ne.s32.totalorder %s12312_s4, %s12074_s6  ;;  %s12079_s11 = sshll.u32 %s12165_s27, 4  ;;  %s12080_s11 = int_to_ptr.vmem [resolvable:$false] %s12079_s11 }
  0x52   : > { %s12081_s12 = scalar_lea.vmem %s12080_s11, 200704  ;;  %p12082_p13 = scmp.lt.s32.totalorder %s12312_s4, %s12080_s11 }
  0x53   : > { %p12077_p0 = pnand %p12075_p8, %p12031_p7  ;;  %p12083_p2 = scmp.lt.s32.totalorder %s12081_s12, %s12074_s6 }
  0x55   : > { %p12078_p1 = pneg %p12077_p0  ;;  %p12084_p6 = por %p12083_p2, %p12082_p13 }
  0x57   : > { %p12085_p9 = pnand %p12084_p6, %p12078_p1 }
  0x59   : > { %12088 = shalt.err (!%p12085_p9)
}
  0x5a   : > { %s12166_s18 = smov 64   ;;  %s12167_s19 = smov 4  }
  0x5b   : > { %11172 = dma.hbm_to_vmem [thread:$0]  (!%p13328_p4), %s12318_s8, 100352, %s12312_s4, %s12320_s9, %s12166_s18, %s12166_s18, %s12167_s19  }
  0x5c   : > { %p13329_p7 = scmp.ne.s32.totalorder %s13325_s22, 0 }
  0x5d   : > { %s187_s23 = sand.u32 (!%p13329_p7), 1, %s12153_s13   ;;  %p13330_p5 = scmp.ne.s32.totalorder (!%p13329_p7), %s13324_s21, 0 }
  0x5e   : > { %185 = sbr.rel (%p13329_p7) target bundleno = 1333 (0x535), region = 32  ;;  %s188_s24 = scalar_lea.sflag (!%p13329_p7), [#allocation3], %s187_s23 }
  0x5f   : > { %s11148_s7 = smul.u32 (!%p13329_p7), 196, %s187_s23 }
  0x61   : > { %s12349_s29 = scalar_lea.vmem (!%p13329_p7), [#allocation2], %s11148_s7 }
  0x65   : > { %12132 = dma.done.wait (%p13330_p5), %s188_s24, 3136  }
  0x66   : > { %12134 = vsyncadd (%p13330_p5), %s188_s24, 4294964160  ;;  %s196_s10 = sand.u32 1, %s12209_s16   ;;  %s11149_s28 = smul.u32 6272, %s187_s23 }
  0x67   : > { %s197_s4 = scalar_lea.sflag [#allocation6], %s196_s10 }
  0x68   : > { %s12356_s8 = scalar_lea.vmem [#allocation5], %s11149_s28 }
  0x69   : > { %12136 = dma.done.wait (%p13330_p5), %s197_s4, 100352  }
  0x6a   : > { %12138 = vsyncadd (%p13330_p5), %s197_s4, 4294866944  ;;  %p13331_p4 = scmp.eq.s32.totalorder %s12209_s16, 0 }
  0x6c   : > { %12140 = dma.done.wait (%p13331_p4), [#allocation6], 16   ;;  %p13332_p10 = pmov %p13331_p4 }
  0x6d   : > { %p13333_p11 = scmp.ne.s32.totalorder %s12209_s16, 0 }
  0x6e   : > { %12142 = vsyncadd (%p13332_p10), [#allocation6], 4294967280  ;;  %v9276_v0 = vld [vmem:[#allocation7] ss:$0 sm:$0xff] (!%p13333_p11) }
  0x6f   : > { %233 = sbr.rel (%p13333_p11) target bundleno = 118 (0x76), region = 48  ;;  %241 = vst [vmem:[#allocation8] sm:$0x3] (!%p13333_p11), %v9276_v0 }
  0x76 PF: > { %v11215_v1 = vld [vmem:[%s12356_s8 + $0x40] sm:$0xff]   ;;  %v11219_v5 = vld [vmem:[%s12356_s8 + $0x48] sm:$0xff]   ;;  %v11223_v9 = vld [vmem:[%s12356_s8 + $0x50] sm:$0xff]   ;;  %v321_v31 = vlaneseq  ;;  %v12168_v37 = vmov 1983009808   ;;  %p10061_p12 = scmp.ne.s32.totalorder %s12209_s16, 1 }
  0x77   : > { %v11216_v2 = vld [vmem:[%s12356_s8 + $0xc0] sm:$0xff]   ;;  %10068 = vmatprep.subr.bf16.mxu0 %v11215_v1  ;;  %v11220_v6 = vld [vmem:[%s12356_s8 + $0xc8] sm:$0xff]   ;;  %v11224_v10 = vld [vmem:[%s12356_s8 + $0xd0] sm:$0xff]   ;;  %v319_v38 = vunpack.c.l.s4 %v12168_v37  ;;  %vm9170_vm0 = vcmask (!%p10061_p12), 1041408  }
  0x78   : > { %v11217_v3 = vld [vmem:[%s12356_s8] sm:$0xff]   ;;  %10090 = vmatprep.subr.bf16.mxu1 %v11216_v2  ;;  %v11221_v7 = vld [vmem:[%s12356_s8 + $0x8] sm:$0xff]   ;;  %v11225_v11 = vld [vmem:[%s12356_s8 + $0x10] sm:$0xff]   ;;  %v322_v39 = vshrl.u32 %v321_v31, 7 }
  0x79   : > { %v11218_v4 = vld [vmem:[%s12356_s8 + $0x80] sm:$0xff]   ;;  %10069 = vmatpush3.bf16.msra.mxu0 %v11217_v3  ;;  %v11222_v8 = vld [vmem:[%s12356_s8 + $0x88] sm:$0xff]   ;;  %v11226_v12 = vld [vmem:[%s12356_s8 + $0x90] sm:$0xff]   ;;  %v320_v40 = vunpack.c.0.s8 %v319_v38 }
  0x7a   : > { %10091 = vmatpush3.bf16.msra.mxu1 %v11218_v4  ;;  %10070 = vmatprep.subr.bf16.mxu0 %v11219_v5  ;;  %v11227_v13 = vld [vmem:[%s12356_s8 + $0x58] sm:$0xff]   ;;  %v11231_v17 = vld [vmem:[%s12356_s8 + $0x60] sm:$0xff]   ;;  %v11235_v21 = vld [vmem:[%s12356_s8 + $0x68] sm:$0xff]  }
  0x7b   : > { %10092 = vmatprep.subr.bf16.mxu1 %v11220_v6  ;;  %v11228_v14 = vld [vmem:[%s12356_s8 + $0xd8] sm:$0xff]   ;;  %v11232_v18 = vld [vmem:[%s12356_s8 + $0xe0] sm:$0xff]   ;;  %v11236_v22 = vld [vmem:[%s12356_s8 + $0xe8] sm:$0xff]   ;;  %v12403_v43 = vsub.s32 %v320_v40, %v322_v39 }
  0x7c   : > { %v11229_v15 = vld [vmem:[%s12356_s8 + $0x18] sm:$0xff]   ;;  %v11233_v19 = vld [vmem:[%s12356_s8 + $0x20] sm:$0xff]   ;;  %v11237_v23 = vld [vmem:[%s12356_s8 + $0x28] sm:$0xff]  }
  0x7d   : > { %10071 = vmatpush3.bf16.msra.mxu0 %v11221_v7  ;;  %v11230_v16 = vld [vmem:[%s12356_s8 + $0x98] sm:$0xff]   ;;  %v11234_v20 = vld [vmem:[%s12356_s8 + $0xa0] sm:$0xff]   ;;  %v11238_v24 = vld [vmem:[%s12356_s8 + $0xa8] sm:$0xff]  }
  0x7e   : > { %10093 = vmatpush3.bf16.msra.mxu1 %v11222_v8  ;;  %10072 = vmatprep.subr.bf16.mxu0 %v11223_v9  ;;  %v11239_v25 = vld [vmem:[%s12356_s8 + $0x70] sm:$0xff]   ;;  %v11243_v29 = vld [vmem:[%s12356_s8 + $0x78] sm:$0xff]   ;;  %v11247_v35 = vld [vmem:[%s12356_s8 + $0x140] sm:$0xff]  }
  0x7f   : > { %10094 = vmatprep.subr.bf16.mxu1 %v11224_v10  ;;  %v11240_v26 = vld [vmem:[%s12356_s8 + $0xf0] sm:$0xff]   ;;  %v11244_v30 = vld [vmem:[%s12356_s8 + $0xf8] sm:$0xff]   ;;  %v11249_v42 = vld [vmem:[%s12356_s8 + $0x1c0] sm:$0xff]  }
  0x80   : > { %v11241_v27 = vld [vmem:[%s12356_s8 + $0x30] sm:$0xff]   ;;  %v11245_v32 = vld [vmem:[%s12356_s8 + $0x38] sm:$0xff]   ;;  %v11248_v48 = vld [vmem:[%s12356_s8 + $0x100] sm:$0xff]  }
  0x81   : > { %10073 = vmatpush3.bf16.msra.mxu0 %v11225_v11  ;;  %v11242_v28 = vld [vmem:[%s12356_s8 + $0xb0] sm:$0xff]   ;;  %v11246_v33 = vld [vmem:[%s12356_s8 + $0xb8] sm:$0xff]   ;;  %v11250_v51 = vld [vmem:[%s12356_s8 + $0x180] sm:$0xff]  }
  0x82   : > { %10095 = vmatpush3.bf16.msra.mxu1 %v11226_v12  ;;  %10074 = vmatprep.subr.bf16.mxu0 %v11227_v13  ;;  %v242_v34 = vld [vmem:[%s12349_s29] sm:$0xff]  ;;  %v11251_v54 = vld [vmem:[%s12356_s8 + $0x148] sm:$0xff]   ;;  %v11255_v58 = vld [vmem:[%s12356_s8 + $0x150] sm:$0xff]  }
  0x83   : > { %10096 = vmatprep.subr.bf16.mxu1 %v11228_v14  ;;  %v267_v36 = vmax.f32 %v242_v34, 0.0  ;;  %v11253_v55 = vld [vmem:[%s12356_s8 + $0x1c8] sm:$0xff]   ;;  %v11257_v59 = vld [vmem:[%s12356_s8 + $0x1d0] sm:$0xff]   ;;  %v11259_v62 = vld [vmem:[%s12356_s8 + $0x158] sm:$0xff]  }
  0x84   : > { %v11252_v56 = vld [vmem:[%s12356_s8 + $0x108] sm:$0xff]   ;;  %v11256_v60 = vld [vmem:[%s12356_s8 + $0x110] sm:$0xff]   ;;  %v11261_v63 = vld [vmem:[%s12356_s8 + $0x1d8] sm:$0xff]  }
  0x85   : > { %10075 = vmatpush3.bf16.msra.mxu0 %v11229_v15  ;;  %v317_v41 = vcombine.high %v267_v36, %v267_v36  ;;  %v324_v44 = vrot.slane %v267_v36, %v12403_v43  ;;  %v11254_v57 = vld [vmem:[%s12356_s8 + $0x188] sm:$0xff]   ;;  %v11258_v61 = vld [vmem:[%s12356_s8 + $0x190] sm:$0xff]   ;;  %v11260_v0 = vld [vmem:[%s12356_s8 + $0x118] sm:$0xff]  }
  0x86   : > { %10097 = vmatpush3.bf16.msra.mxu1 %v11230_v16  ;;  %10076 = vmatprep.subr.bf16.mxu0 %v11231_v17  ;;  %v11262_v1 = vld [vmem:[%s12356_s8 + $0x198] sm:$0xff]   ;;  %v11263_v2 = vld [vmem:[%s12356_s8 + $0x160] sm:$0xff]   ;;  %v11267_v6 = vld [vmem:[%s12356_s8 + $0x168] sm:$0xff]  }
  0x87   : > { %10098 = vmatprep.subr.bf16.mxu1 %v11232_v18  ;;  %v331_v45 = vrot.slane %v317_v41, %v12403_v43  ;;  %v332_v46 = vcombine.high %v324_v44, %v324_v44  ;;  %v831_v49 = vpack.c.bf16 %v324_v44, %v324_v44  ;;  %v11265_v3 = vld [vmem:[%s12356_s8 + $0x1e0] sm:$0xff]   ;;  %v11269_v7 = vld [vmem:[%s12356_s8 + $0x1e8] sm:$0xff]   ;;  %v11271_v10 = vld [vmem:[%s12356_s8 + $0x170] sm:$0xff]  }
  0x88   : > { %v11264_v4 = vld [vmem:[%s12356_s8 + $0x120] sm:$0xff]   ;;  %v11268_v8 = vld [vmem:[%s12356_s8 + $0x128] sm:$0xff]   ;;  %v11273_v12 = vld [vmem:[%s12356_s8 + $0x1f0] sm:$0xff]  }
  0x89   : > { %10077 = vmatpush3.bf16.msra.mxu0 %v11233_v19  ;;  %v333_v47 = vcombine.high %v331_v45, %v331_v45  ;;  %v833_v50 = vpack.c.bf16 %v331_v45, %v331_v45  ;;  %v832_v52 = vpack.c.bf16 %v332_v46, %v332_v46  ;;  %v11266_v5 = vld [vmem:[%s12356_s8 + $0x1a0] sm:$0xff]   ;;  %v11270_v9 = vld [vmem:[%s12356_s8 + $0x1a8] sm:$0xff]   ;;  %v11272_v14 = vld [vmem:[%s12356_s8 + $0x130] sm:$0xff]  }
  0x8a   : > { %10099 = vmatpush3.bf16.msra.mxu1 %v11234_v20  ;;  %10078 = vmatprep.subr.bf16.mxu0 %v11235_v21  ;;  %v243_v11 = vld [vmem:[%s12349_s29 + $0x8] sm:$0xff]  ;;  %v11274_v15 = vld [vmem:[%s12356_s8 + $0x1b0] sm:$0xff]   ;;  %v11275_v18 = vld [vmem:[%s12356_s8 + $0x178] sm:$0xff]  }
  0x8b   : > { %10100 = vmatprep.subr.bf16.mxu1 %v11236_v22  ;;  %v834_v53 = vpack.c.bf16 %v333_v47, %v333_v47  ;;  %7234 = vmatprep.mubr.bf16.mxu0 %v832_v52  ;;  %v268_v13 = vmax.f32 %v243_v11, 0.0  ;;  %v11277_v19 = vld [vmem:[%s12356_s8 + $0x1f8] sm:$0xff]   ;;  %v11285_v34 = vld [vmem:[%s12356_s8 + $0x2c8] sm:$0xff]   ;;  %v11287_v37 = vld [vmem:[%s12356_s8 + $0x250] sm:$0xff]  }
  0x8c   : > { %v11276_v22 = vld [vmem:[%s12356_s8 + $0x138] sm:$0xff]   ;;  %v11286_v36 = vld [vmem:[%s12356_s8 + $0x288] sm:$0xff]   ;;  %v11289_v38 = vld [vmem:[%s12356_s8 + $0x2d0] sm:$0xff]  }
  0x8d   : > { %10079 = vmatpush3.bf16.msra.mxu0 %v11237_v23  ;;  %7274 = vmatprep.mubr.bf16.mxu1 %v834_v53  ;;  %v341_v16 = vrot.slane %v268_v13, %v12403_v43  ;;  %v334_v17 = vcombine.high %v268_v13, %v268_v13  ;;  %v11288_v39 = vld [vmem:[%s12356_s8 + $0x210] sm:$0xff]   ;;  %v11291_v41 = vld [vmem:[%s12356_s8 + $0x258] sm:$0xff]   ;;  %v11295_v46 = vld [vmem:[%s12356_s8 + $0x260] sm:$0xff]  }
  0x8e   : > { %10101 = vmatpush3.bf16.msra.mxu1 %v11238_v24  ;;  %10080 = vmatprep.subr.bf16.mxu0 %v11239_v25  ;;  %v11278_v24 = vld [vmem:[%s12356_s8 + $0x1b8] sm:$0xff]   ;;  %v11290_v40 = vld [vmem:[%s12356_s8 + $0x290] sm:$0xff]   ;;  %v11297_v47 = vld [vmem:[%s12356_s8 + $0x2e0] sm:$0xff]  }
  0x8f   : > { %10102 = vmatprep.subr.bf16.mxu1 %v11240_v26  ;;  %v349_v20 = vcombine.high %v341_v16, %v341_v16  ;;  %v348_v21 = vrot.slane %v334_v17, %v12403_v43  ;;  %v11279_v26 = vld [vmem:[%s12356_s8 + $0x240] sm:$0xff]   ;;  %v11292_v44 = vld [vmem:[%s12356_s8 + $0x218] sm:$0xff]   ;;  %v11300_v52 = vld [vmem:[%s12356_s8 + $0x228] sm:$0xff]  }
  0x90   : > { %v11294_v45 = vld [vmem:[%s12356_s8 + $0x298] sm:$0xff]   ;;  %v11302_v53 = vld [vmem:[%s12356_s8 + $0x2a8] sm:$0xff]   ;;  %v11319_v17 = vld [vmem:[%s12356_s8 + $0x350] sm:$0xff]  }
  0x91   : > { %10081 = vmatpush3.bf16.msra.mxu0 %v11241_v27  ;;  %v836_v23 = vpack.c.bf16 %v349_v20, %v349_v20  ;;  %v350_v25 = vcombine.high %v348_v21, %v348_v21  ;;  %v837_v31 = vpack.c.bf16 %v348_v21, %v348_v21  ;;  %v11315_v13 = vld [vmem:[%s12356_s8 + $0x348] sm:$0xff]   ;;  %v11322_v20 = vld [vmem:[%s12356_s8 + $0x390] sm:$0xff]   ;;  %v11323_v21 = vld [vmem:[%s12356_s8 + $0x358] sm:$0xff]  }
  0x92   : > { %10103 = vmatpush3.bf16.msra.mxu1 %v11242_v28  ;;  %10082 = vmatprep.subr.bf16.mxu0 %v11243_v29  ;;  %v11281_v28 = vld [vmem:[%s12356_s8 + $0x2c0] sm:$0xff]  }
  0x93   : > { %10104 = vmatprep.subr.bf16.mxu1 %v11244_v30  ;;  %v838_v27 = vpack.c.bf16 %v350_v25, %v350_v25  ;;  %v11280_v29 = vld [vmem:[%s12356_s8 + $0x200] sm:$0xff]   ;;  %v835_v30 = vpack.c.bf16 %v341_v16, %v341_v16  ;;  %v11318_v16 = vld [vmem:[%s12356_s8 + $0x388] sm:$0xff]  }
  0x94   : > { %v11327_v25 = vld [vmem:[%s12356_s8 + $0x360] sm:$0xff]  }
  0x95   : > { %10083 = vmatpush3.bf16.msra.mxu0 %v11245_v32  ;;  %v11282_v32 = vld [vmem:[%s12356_s8 + $0x280] sm:$0xff]  }
  0x96   : > { %10105 = vmatpush3.bf16.msra.mxu1 %v11246_v33  ;;  %10112 = vmatprep.subr.bf16.mxu0 %v11247_v35  ;;  %v11283_v33 = vld [vmem:[%s12356_s8 + $0x248] sm:$0xff]  }
  0x97   : > { %10134 = vmatprep.subr.bf16.mxu1 %v11249_v42  ;;  %v11284_v35 = vld [vmem:[%s12356_s8 + $0x208] sm:$0xff]   ;;  %v11293_v42 = vld [vmem:[%s12356_s8 + $0x2d8] sm:$0xff]  }
  0x98   : > { %7235 = vmatmul.mubr.bf16.vlgmr.msra.gmra.mrb[0].mxu0 %v831_v49  ;;  %v11298_v49 = vld [vmem:[%s12356_s8 + $0x2a0] sm:$0xff]  }
  0x99   : > { %7275 = vmatmul.mubr.bf16.vlgmr.msra.gmra.mrb[0].mxu1 %v833_v50  ;;  %10113 = vmatpush3.bf16.msra.mxu0 %v11248_v48  ;;  %v11296_v48 = vld [vmem:[%s12356_s8 + $0x220] sm:$0xff]   ;;  %v11299_v50 = vld [vmem:[%s12356_s8 + $0x268] sm:$0xff]  }
  0x9a   : > { %10135 = vmatpush3.bf16.msra.mxu1 %v11250_v51  ;;  %10114 = vmatprep.subr.bf16.mxu0 %v11251_v54  ;;  %v11301_v51 = vld [vmem:[%s12356_s8 + $0x2e8] sm:$0xff]   ;;  %v11303_v54 = vld [vmem:[%s12356_s8 + $0x270] sm:$0xff]  }
  0x9b   : > { %10136 = vmatprep.subr.bf16.mxu1 %v11253_v55  ;;  %7314 = vmatprep.mubr.bf16.mxu0 %v836_v23  ;;  %v244_v55 = vld [vmem:[%s12349_s29 + $0x10] sm:$0xff]  ;;  %v11324_v23 = vld [vmem:[%s12356_s8 + $0x318] sm:$0xff]  }
  0x9c   : > { %7354 = vmatprep.mubr.bf16.mxu1 %v838_v27  ;;  %v11328_v27 = vld [vmem:[%s12356_s8 + $0x320] sm:$0xff]  }
  0x9d   : > { %10115 = vmatpush3.bf16.msra.mxu0 %v11252_v56  ;;  %v11305_v56 = vld [vmem:[%s12356_s8 + $0x2f0] sm:$0xff]  }
  0x9e   : > { %10137 = vmatpush3.bf16.msra.mxu1 %v11254_v57  ;;  %10116 = vmatprep.subr.bf16.mxu0 %v11255_v58  ;;  %v269_v57 = vmax.f32 %v244_v55, 0.0  ;;  %v11304_v58 = vld [vmem:[%s12356_s8 + $0x230] sm:$0xff]  }
  0x9f   : > { %10138 = vmatprep.subr.bf16.mxu1 %v11257_v59  ;;  %v11306_v59 = vld [vmem:[%s12356_s8 + $0x2b0] sm:$0xff]  }
  0xa1   : > { %10117 = vmatpush3.bf16.msra.mxu0 %v11256_v60  ;;  %v358_v60 = vrot.slane %v269_v57, %v12403_v43 }
  0xa2   : > { %10139 = vmatpush3.bf16.msra.mxu1 %v11258_v61  ;;  %10118 = vmatprep.subr.bf16.mxu0 %v11259_v62  ;;  %v351_v61 = vcombine.high %v269_v57, %v269_v57  ;;  %v11307_v62 = vld [vmem:[%s12356_s8 + $0x278] sm:$0xff]   ;;  %v11347_v57 = vld [vmem:[%s12356_s8 + $0x448] sm:$0xff]  }
  0xa3   : > { %10140 = vmatprep.subr.bf16.mxu1 %v11261_v63  ;;  %v11309_v63 = vld [vmem:[%s12356_s8 + $0x2f8] sm:$0xff]  }
  0xa5   : > { %10119 = vmatpush3.bf16.msra.mxu0 %v11260_v0  ;;  %v366_v0 = vcombine.high %v358_v60, %v358_v60 }
  0xa6   : > { %10141 = vmatpush3.bf16.msra.mxu1 %v11262_v1  ;;  %10120 = vmatprep.subr.bf16.mxu0 %v11263_v2  ;;  %v365_v1 = vrot.slane %v351_v61, %v12403_v43  ;;  %v11308_v2 = vld [vmem:[%s12356_s8 + $0x238] sm:$0xff]   ;;  %v11351_v61 = vld [vmem:[%s12356_s8 + $0x450] sm:$0xff]  }
  0xa7   : > { %10142 = vmatprep.subr.bf16.mxu1 %v11265_v3  ;;  %v840_v3 = vpack.c.bf16 %v366_v0, %v366_v0  ;;  %v11354_v0 = vld [vmem:[%s12356_s8 + $0x490] sm:$0xff]  }
  0xa8   : > { %v841_v11 = vpack.c.bf16 %v365_v1, %v365_v1 }
  0xa9   : > { %10121 = vmatpush3.bf16.msra.mxu0 %v11264_v4  ;;  %v11310_v4 = vld [vmem:[%s12356_s8 + $0x2b8] sm:$0xff]  }
  0xaa   : > { %10143 = vmatpush3.bf16.msra.mxu1 %v11266_v5  ;;  %10122 = vmatprep.subr.bf16.mxu0 %v11267_v6  ;;  %v367_v5 = vcombine.high %v365_v1, %v365_v1  ;;  %v11311_v6 = vld [vmem:[%s12356_s8 + $0x340] sm:$0xff]   ;;  %v11355_v1 = vld [vmem:[%s12356_s8 + $0x458] sm:$0xff]  }
  0xab   : > { %10144 = vmatprep.subr.bf16.mxu1 %v11269_v7 }
  0xac   : > { %v842_v7 = vpack.c.bf16 %v367_v5, %v367_v5  ;;  %v11359_v5 = vld [vmem:[%s12356_s8 + $0x460] sm:$0xff]  }
  0xad   : > { %10123 = vmatpush3.bf16.msra.mxu0 %v11268_v8  ;;  %v11313_v8 = vld [vmem:[%s12356_s8 + $0x3c0] sm:$0xff]  }
  0xae   : > { %10145 = vmatpush3.bf16.msra.mxu1 %v11270_v9  ;;  %10124 = vmatprep.subr.bf16.mxu0 %v11271_v10  ;;  %v11312_v9 = vld [vmem:[%s12356_s8 + $0x300] sm:$0xff]   ;;  %v839_v10 = vpack.c.bf16 %v358_v60, %v358_v60  ;;  %v11350_v60 = vld [vmem:[%s12356_s8 + $0x488] sm:$0xff]  }
  0xaf   : > { %10146 = vmatprep.subr.bf16.mxu1 %v11273_v12  ;;  %v11314_v12 = vld [vmem:[%s12356_s8 + $0x380] sm:$0xff]  }
  0xb1   : > { %10125 = vmatpush3.bf16.msra.mxu0 %v11272_v14  ;;  %v11317_v14 = vld [vmem:[%s12356_s8 + $0x3c8] sm:$0xff]  }
  0xb2   : > { %10147 = vmatpush3.bf16.msra.mxu1 %v11274_v15  ;;  %10126 = vmatprep.subr.bf16.mxu0 %v11275_v18  ;;  %v11316_v15 = vld [vmem:[%s12356_s8 + $0x308] sm:$0xff]   ;;  %v11321_v18 = vld [vmem:[%s12356_s8 + $0x3d0] sm:$0xff]  }
  0xb3   : > { %10148 = vmatprep.subr.bf16.mxu1 %v11277_v19  ;;  %v11320_v19 = vld [vmem:[%s12356_s8 + $0x310] sm:$0xff]  }
  0xb5   : > { %10127 = vmatpush3.bf16.msra.mxu0 %v11276_v22  ;;  %v11325_v22 = vld [vmem:[%s12356_s8 + $0x3d8] sm:$0xff]  }
  0xb6   : > { %10149 = vmatpush3.bf16.msra.mxu1 %v11278_v24  ;;  %10156 = vmatprep.subr.bf16.mxu0 %v11279_v26  ;;  %v11326_v24 = vld [vmem:[%s12356_s8 + $0x398] sm:$0xff]   ;;  %v11329_v26 = vld [vmem:[%s12356_s8 + $0x3e0] sm:$0xff]  }
  0xb7   : > { %10178 = vmatprep.subr.bf16.mxu1 %v11281_v28  ;;  %v11330_v28 = vld [vmem:[%s12356_s8 + $0x3a0] sm:$0xff]  }
  0xb8   : > { %7315 = vmatmul.mubr.bf16.vlgmr.msra.gmra.mrb[4].mxu0 %v835_v30  ;;  %v11333_v30 = vld [vmem:[%s12356_s8 + $0x3e8] sm:$0xff]  }
  0xb9   : > { %7355 = vmatmul.mubr.bf16.vlgmr.msra.gmra.mrb[4].mxu1 %v837_v31  ;;  %10157 = vmatpush3.bf16.msra.mxu0 %v11280_v29  ;;  %v11331_v29 = vld [vmem:[%s12356_s8 + $0x368] sm:$0xff]  }
  0xba   : > { %10179 = vmatpush3.bf16.msra.mxu1 %v11282_v32  ;;  %10158 = vmatprep.subr.bf16.mxu0 %v11283_v33  ;;  %v11332_v31 = vld [vmem:[%s12356_s8 + $0x328] sm:$0xff]   ;;  %v11335_v33 = vld [vmem:[%s12356_s8 + $0x370] sm:$0xff]  }
  0xbb   : > { %10180 = vmatprep.subr.bf16.mxu1 %v11285_v34  ;;  %7394 = vmatprep.mubr.bf16.mxu0 %v840_v3  ;;  %v11334_v32 = vld [vmem:[%s12356_s8 + $0x3a8] sm:$0xff]   ;;  %v11337_v34 = vld [vmem:[%s12356_s8 + $0x3f0] sm:$0xff]   ;;  %v11356_v3 = vld [vmem:[%s12356_s8 + $0x418] sm:$0xff]  }
  0xbc   : > { %7434 = vmatprep.mubr.bf16.mxu1 %v842_v7  ;;  %v11360_v7 = vld [vmem:[%s12356_s8 + $0x420] sm:$0xff]  }
  0xbd   : > { %10159 = vmatpush3.bf16.msra.mxu0 %v11284_v35  ;;  %v245_v35 = vld [vmem:[%s12349_s29 + $0x18] sm:$0xff] }
  0xbe   : > { %10181 = vmatpush3.bf16.msra.mxu1 %v11286_v36  ;;  %10160 = vmatprep.subr.bf16.mxu0 %v11287_v37  ;;  %v11336_v36 = vld [vmem:[%s12356_s8 + $0x330] sm:$0xff]   ;;  %v270_v37 = vmax.f32 %v245_v35, 0.0  ;;  %v11378_v35 = vld [vmem:[%s12356_s8 + $0x580] sm:$0xff]  }
  0xbf   : > { %10182 = vmatprep.subr.bf16.mxu1 %v11289_v38  ;;  %v11338_v38 = vld [vmem:[%s12356_s8 + $0x3b0] sm:$0xff]  }
  0xc1   : > { %10161 = vmatpush3.bf16.msra.mxu0 %v11288_v39  ;;  %v11339_v39 = vld [vmem:[%s12356_s8 + $0x378] sm:$0xff]  }
  0xc2   : > { %10183 = vmatpush3.bf16.msra.mxu1 %v11290_v40  ;;  %10162 = vmatprep.subr.bf16.mxu0 %v11291_v41  ;;  %v375_v40 = vrot.slane %v270_v37, %v12403_v43  ;;  %v368_v41 = vcombine.high %v270_v37, %v270_v37  ;;  %v11381_v37 = vld [vmem:[%s12356_s8 + $0x5c8] sm:$0xff]  }
  0xc3   : > { %10184 = vmatprep.subr.bf16.mxu1 %v11293_v42  ;;  %v11341_v42 = vld [vmem:[%s12356_s8 + $0x3f8] sm:$0xff]  }
  0xc5   : > { %10163 = vmatpush3.bf16.msra.mxu0 %v11292_v44  ;;  %v383_v44 = vcombine.high %v375_v40, %v375_v40 }
  0xc6   : > { %10185 = vmatpush3.bf16.msra.mxu1 %v11294_v45  ;;  %10164 = vmatprep.subr.bf16.mxu0 %v11295_v46  ;;  %v382_v45 = vrot.slane %v368_v41, %v12403_v43  ;;  %v11340_v46 = vld [vmem:[%s12356_s8 + $0x338] sm:$0xff]   ;;  %v11385_v41 = vld [vmem:[%s12356_s8 + $0x5d0] sm:$0xff]  }
  0xc7   : > { %10186 = vmatprep.subr.bf16.mxu1 %v11297_v47  ;;  %v844_v47 = vpack.c.bf16 %v383_v44, %v383_v44  ;;  %v11386_v44 = vld [vmem:[%s12356_s8 + $0x590] sm:$0xff]  }
  0xc8   : > { %v845_v55 = vpack.c.bf16 %v382_v45, %v382_v45 }
  0xc9   : > { %10165 = vmatpush3.bf16.msra.mxu0 %v11296_v48  ;;  %v11342_v48 = vld [vmem:[%s12356_s8 + $0x3b8] sm:$0xff]  }
  0xca   : > { %10187 = vmatpush3.bf16.msra.mxu1 %v11298_v49  ;;  %10166 = vmatprep.subr.bf16.mxu0 %v11299_v50  ;;  %v384_v49 = vcombine.high %v382_v45, %v382_v45  ;;  %v11343_v50 = vld [vmem:[%s12356_s8 + $0x440] sm:$0xff]   ;;  %v11387_v45 = vld [vmem:[%s12356_s8 + $0x558] sm:$0xff]  }
  0xcb   : > { %10188 = vmatprep.subr.bf16.mxu1 %v11301_v51 }
  0xcc   : > { %v846_v51 = vpack.c.bf16 %v384_v49, %v384_v49  ;;  %v11391_v49 = vld [vmem:[%s12356_s8 + $0x560] sm:$0xff]  }
  0xcd   : > { %10167 = vmatpush3.bf16.msra.mxu0 %v11300_v52  ;;  %v11344_v52 = vld [vmem:[%s12356_s8 + $0x400] sm:$0xff]  }
  0xce   : > { %10189 = vmatpush3.bf16.msra.mxu1 %v11302_v53  ;;  %10168 = vmatprep.subr.bf16.mxu0 %v11303_v54  ;;  %v11345_v53 = vld [vmem:[%s12356_s8 + $0x4c0] sm:$0xff]   ;;  %v843_v54 = vpack.c.bf16 %v375_v40, %v375_v40  ;;  %v11383_v40 = vld [vmem:[%s12356_s8 + $0x550] sm:$0xff]  }
  0xcf   : > { %10190 = vmatprep.subr.bf16.mxu1 %v11305_v56  ;;  %v11346_v56 = vld [vmem:[%s12356_s8 + $0x480] sm:$0xff]  }
  0xd1   : > { %10169 = vmatpush3.bf16.msra.mxu0 %v11304_v58  ;;  %v11349_v58 = vld [vmem:[%s12356_s8 + $0x4c8] sm:$0xff]  }
  0xd2   : > { %10191 = vmatpush3.bf16.msra.mxu1 %v11306_v59  ;;  %10170 = vmatprep.subr.bf16.mxu0 %v11307_v62  ;;  %v11348_v59 = vld [vmem:[%s12356_s8 + $0x408] sm:$0xff]   ;;  %v11353_v62 = vld [vmem:[%s12356_s8 + $0x4d0] sm:$0xff]  }
  0xd3   : > { %10192 = vmatprep.subr.bf16.mxu1 %v11309_v63  ;;  %v11352_v63 = vld [vmem:[%s12356_s8 + $0x410] sm:$0xff]  }
  0xd5   : > { %10171 = vmatpush3.bf16.msra.mxu0 %v11308_v2  ;;  %v11357_v2 = vld [vmem:[%s12356_s8 + $0x4d8] sm:$0xff]  }
  0xd6   : > { %10193 = vmatpush3.bf16.msra.mxu1 %v11310_v4  ;;  %10200 = vmatprep.subr.bf16.mxu0 %v11311_v6  ;;  %v11358_v4 = vld [vmem:[%s12356_s8 + $0x498] sm:$0xff]   ;;  %v11361_v6 = vld [vmem:[%s12356_s8 + $0x4e0] sm:$0xff]  }
  0xd7   : > { %10222 = vmatprep.subr.bf16.mxu1 %v11313_v8  ;;  %v11362_v8 = vld [vmem:[%s12356_s8 + $0x4a0] sm:$0xff]  }
  0xd8   : > { %7395 = vmatmul.mubr.bf16.vlgmr.msra.gmra.mrb[8].mxu0 %v839_v10  ;;  %v11365_v10 = vld [vmem:[%s12356_s8 + $0x4e8] sm:$0xff]  }
  0xd9   : > { %7435 = vmatmul.mubr.bf16.vlgmr.msra.gmra.mrb[8].mxu1 %v841_v11  ;;  %10201 = vmatpush3.bf16.msra.mxu0 %v11312_v9  ;;  %v11363_v9 = vld [vmem:[%s12356_s8 + $0x468] sm:$0xff]  }
  0xda   : > { %10223 = vmatpush3.bf16.msra.mxu1 %v11314_v12  ;;  %10202 = vmatprep.subr.bf16.mxu0 %v11315_v13  ;;  %v11364_v11 = vld [vmem:[%s12356_s8 + $0x428] sm:$0xff]   ;;  %v11367_v13 = vld [vmem:[%s12356_s8 + $0x470] sm:$0xff]  }
  0xdb   : > { %10224 = vmatprep.subr.bf16.mxu1 %v11317_v14  ;;  %7474 = vmatprep.mubr.bf16.mxu0 %v844_v47  ;;  %v11366_v12 = vld [vmem:[%s12356_s8 + $0x4a8] sm:$0xff]   ;;  %v11369_v14 = vld [vmem:[%s12356_s8 + $0x4f0] sm:$0xff]   ;;  %v11388_v47 = vld [vmem:[%s12356_s8 + $0x518] sm:$0xff]  }
  0xdc   : > { %7514 = vmatprep.mubr.bf16.mxu1 %v846_v51  ;;  %v11392_v51 = vld [vmem:[%s12356_s8 + $0x520] sm:$0xff]  }
  0xdd   : > { %10203 = vmatpush3.bf16.msra.mxu0 %v11316_v15  ;;  %v246_v15 = vld [vmem:[%s12349_s29 + $0x20] sm:$0xff] }
  0xde   : > { %10225 = vmatpush3.bf16.msra.mxu1 %v11318_v16  ;;  %10204 = vmatprep.subr.bf16.mxu0 %v11319_v17  ;;  %v11368_v16 = vld [vmem:[%s12356_s8 + $0x430] sm:$0xff]   ;;  %v271_v17 = vmax.f32 %v246_v15, 0.0  ;;  %v11410_v15 = vld [vmem:[%s12356_s8 + $0x680] sm:$0xff]  }
  0xdf   : > { %10226 = vmatprep.subr.bf16.mxu1 %v11321_v18  ;;  %v11370_v18 = vld [vmem:[%s12356_s8 + $0x4b0] sm:$0xff]  }
  0xe1   : > { %10205 = vmatpush3.bf16.msra.mxu0 %v11320_v19  ;;  %v11371_v19 = vld [vmem:[%s12356_s8 + $0x478] sm:$0xff]  }
  0xe2   : > { %10227 = vmatpush3.bf16.msra.mxu1 %v11322_v20  ;;  %10206 = vmatprep.subr.bf16.mxu0 %v11323_v21  ;;  %v392_v20 = vrot.slane %v271_v17, %v12403_v43  ;;  %v385_v21 = vcombine.high %v271_v17, %v271_v17  ;;  %v11413_v17 = vld [vmem:[%s12356_s8 + $0x6c8] sm:$0xff]  }
  0xe3   : > { %10228 = vmatprep.subr.bf16.mxu1 %v11325_v22  ;;  %v11373_v22 = vld [vmem:[%s12356_s8 + $0x4f8] sm:$0xff]  }
  0xe5   : > { %10207 = vmatpush3.bf16.msra.mxu0 %v11324_v23  ;;  %v400_v23 = vcombine.high %v392_v20, %v392_v20 }
  0xe6   : > { %10229 = vmatpush3.bf16.msra.mxu1 %v11326_v24  ;;  %10208 = vmatprep.subr.bf16.mxu0 %v11327_v25  ;;  %v399_v24 = vrot.slane %v385_v21, %v12403_v43  ;;  %v11372_v25 = vld [vmem:[%s12356_s8 + $0x438] sm:$0xff]   ;;  %v11417_v21 = vld [vmem:[%s12356_s8 + $0x6d0] sm:$0xff]  }
  0xe7   : > { %10230 = vmatprep.subr.bf16.mxu1 %v11329_v26  ;;  %v848_v26 = vpack.c.bf16 %v400_v23, %v400_v23  ;;  %v11418_v23 = vld [vmem:[%s12356_s8 + $0x690] sm:$0xff]  }
  0xe9   : > { %10209 = vmatpush3.bf16.msra.mxu0 %v11328_v27  ;;  %v11374_v27 = vld [vmem:[%s12356_s8 + $0x4b8] sm:$0xff]  }
  0xea   : > { %10231 = vmatpush3.bf16.msra.mxu1 %v11330_v28  ;;  %10210 = vmatprep.subr.bf16.mxu0 %v11331_v29  ;;  %v401_v28 = vcombine.high %v399_v24, %v399_v24  ;;  %v11375_v29 = vld [vmem:[%s12356_s8 + $0x540] sm:$0xff]  }
  0xeb   : > { %10232 = vmatprep.subr.bf16.mxu1 %v11333_v30 }
  0xec   : > { %v850_v30 = vpack.c.bf16 %v401_v28, %v401_v28  ;;  %v11423_v28 = vld [vmem:[%s12356_s8 + $0x660] sm:$0xff]  }
  0xed   : > { %10211 = vmatpush3.bf16.msra.mxu0 %v11332_v31  ;;  %v11376_v31 = vld [vmem:[%s12356_s8 + $0x500] sm:$0xff]  }
  0xee   : > { %10233 = vmatpush3.bf16.msra.mxu1 %v11334_v32  ;;  %10212 = vmatprep.subr.bf16.mxu0 %v11335_v33  ;;  %v11377_v32 = vld [vmem:[%s12356_s8 + $0x5c0] sm:$0xff]   ;;  %v847_v33 = vpack.c.bf16 %v392_v20, %v392_v20  ;;  %v11415_v20 = vld [vmem:[%s12356_s8 + $0x650] sm:$0xff]  }
  0xef   : > { %10234 = vmatprep.subr.bf16.mxu1 %v11337_v34  ;;  %v849_v34 = vpack.c.bf16 %v399_v24, %v399_v24  ;;  %v11419_v24 = vld [vmem:[%s12356_s8 + $0x658] sm:$0xff]  }
  0xf1   : > { %10213 = vmatpush3.bf16.msra.mxu0 %v11336_v36  ;;  %v11379_v36 = vld [vmem:[%s12356_s8 + $0x548] sm:$0xff]  }
  0xf2   : > { %10235 = vmatpush3.bf16.msra.mxu1 %v11338_v38  ;;  %10214 = vmatprep.subr.bf16.mxu0 %v11339_v39  ;;  %v11380_v38 = vld [vmem:[%s12356_s8 + $0x508] sm:$0xff]  }
  0xf3   : > { %10236 = vmatprep.subr.bf16.mxu1 %v11341_v42  ;;  %v11382_v39 = vld [vmem:[%s12356_s8 + $0x588] sm:$0xff]   ;;  %v11384_v42 = vld [vmem:[%s12356_s8 + $0x510] sm:$0xff]  }
  0xf5   : > { %10215 = vmatpush3.bf16.msra.mxu0 %v11340_v46  ;;  %v11389_v46 = vld [vmem:[%s12356_s8 + $0x5d8] sm:$0xff]  }
  0xf6   : > { %10237 = vmatpush3.bf16.msra.mxu1 %v11342_v48  ;;  %10244 = vmatprep.subr.bf16.mxu0 %v11343_v50  ;;  %v11390_v48 = vld [vmem:[%s12356_s8 + $0x598] sm:$0xff]   ;;  %v11393_v50 = vld [vmem:[%s12356_s8 + $0x5e0] sm:$0xff]  }
  0xf7   : > { %10266 = vmatprep.subr.bf16.mxu1 %v11345_v53  ;;  %v11395_v53 = vld [vmem:[%s12356_s8 + $0x568] sm:$0xff]  }
  0xf8   : > { %7475 = vmatmul.mubr.bf16.vlgmr.msra.gmra.mrb[12].mxu0 %v843_v54  ;;  %v11397_v54 = vld [vmem:[%s12356_s8 + $0x5e8] sm:$0xff]  }
  0xf9   : > { %7515 = vmatmul.mubr.bf16.vlgmr.msra.gmra.mrb[12].mxu1 %v845_v55  ;;  %10245 = vmatpush3.bf16.msra.mxu0 %v11344_v52  ;;  %v11394_v52 = vld [vmem:[%s12356_s8 + $0x5a0] sm:$0xff]   ;;  %v11396_v55 = vld [vmem:[%s12356_s8 + $0x528] sm:$0xff]  }
  0xfa   : > { %10267 = vmatpush3.bf16.msra.mxu1 %v11346_v56  ;;  %10246 = vmatprep.subr.bf16.mxu0 %v11347_v57  ;;  %v11398_v56 = vld [vmem:[%s12356_s8 + $0x5a8] sm:$0xff]   ;;  %v11399_v57 = vld [vmem:[%s12356_s8 + $0x570] sm:$0xff]  }
  0xfb   : > { %10268 = vmatprep.subr.bf16.mxu1 %v11349_v58  ;;  %7554 = vmatprep.mubr.bf16.mxu0 %v848_v26  ;;  %v11401_v58 = vld [vmem:[%s12356_s8 + $0x5f0] sm:$0xff]   ;;  %v11420_v26 = vld [vmem:[%s12356_s8 + $0x618] sm:$0xff]  }
  0xfc   : > { %7594 = vmatprep.mubr.bf16.mxu1 %v850_v30  ;;  %v11424_v30 = vld [vmem:[%s12356_s8 + $0x620] sm:$0xff]  }
  0xfd   : > { %10247 = vmatpush3.bf16.msra.mxu0 %v11348_v59  ;;  %v247_v59 = vld [vmem:[%s12349_s29 + $0x28] sm:$0xff] }
  0xfe   : > { %10269 = vmatpush3.bf16.msra.mxu1 %v11350_v60  ;;  %10248 = vmatprep.subr.bf16.mxu0 %v11351_v61  ;;  %v11400_v60 = vld [vmem:[%s12356_s8 + $0x530] sm:$0xff]   ;;  %v272_v61 = vmax.f32 %v247_v59, 0.0  ;;  %v11442_v59 = vld [vmem:[%s12356_s8 + $0x780] sm:$0xff]  }
  0xff   : > { %10270 = vmatprep.subr.bf16.mxu1 %v11353_v62  ;;  %v11402_v62 = vld [vmem:[%s12356_s8 + $0x5b0] sm:$0xff]  }
 0x101   : > { %10249 = vmatpush3.bf16.msra.mxu0 %v11352_v63  ;;  %v11403_v63 = vld [vmem:[%s12356_s8 + $0x578] sm:$0xff]  }
 0x102   : > { %10271 = vmatpush3.bf16.msra.mxu1 %v11354_v0  ;;  %10250 = vmatprep.subr.bf16.mxu0 %v11355_v1  ;;  %v409_v0 = vrot.slane %v272_v61, %v12403_v43  ;;  %v402_v1 = vcombine.high %v272_v61, %v272_v61  ;;  %v11445_v61 = vld [vmem:[%s12356_s8 + $0x7c8] sm:$0xff]  }
 0x103   : > { %10272 = vmatprep.subr.bf16.mxu1 %v11357_v2  ;;  %v11405_v2 = vld [vmem:[%s12356_s8 + $0x5f8] sm:$0xff]  }
 0x105   : > { %10251 = vmatpush3.bf16.msra.mxu0 %v11356_v3  ;;  %v417_v3 = vcombine.high %v409_v0, %v409_v0 }
 0x106   : > { %10273 = vmatpush3.bf16.msra.mxu1 %v11358_v4  ;;  %10252 = vmatprep.subr.bf16.mxu0 %v11359_v5  ;;  %v416_v4 = vrot.slane %v402_v1, %v12403_v43  ;;  %v11404_v5 = vld [vmem:[%s12356_s8 + $0x538] sm:$0xff]   ;;  %v11449_v1 = vld [vmem:[%s12356_s8 + $0x7d0] sm:$0xff]  }
 0x107   : > { %10274 = vmatprep.subr.bf16.mxu1 %v11361_v6  ;;  %v852_v6 = vpack.c.bf16 %v417_v3, %v417_v3  ;;  %v11450_v3 = vld [vmem:[%s12356_s8 + $0x790] sm:$0xff]  }
 0x109   : > { %10253 = vmatpush3.bf16.msra.mxu0 %v11360_v7  ;;  %v11406_v7 = vld [vmem:[%s12356_s8 + $0x5b8] sm:$0xff]  }
 0x10a   : > { %10275 = vmatpush3.bf16.msra.mxu1 %v11362_v8  ;;  %10254 = vmatprep.subr.bf16.mxu0 %v11363_v9  ;;  %v418_v8 = vcombine.high %v416_v4, %v416_v4  ;;  %v11407_v9 = vld [vmem:[%s12356_s8 + $0x640] sm:$0xff]  }
 0x10b   : > { %10276 = vmatprep.subr.bf16.mxu1 %v11365_v10 }
 0x10c   : > { %v854_v10 = vpack.c.bf16 %v418_v8, %v418_v8  ;;  %v11455_v8 = vld [vmem:[%s12356_s8 + $0x760] sm:$0xff]  }
 0x10d   : > { %10255 = vmatpush3.bf16.msra.mxu0 %v11364_v11  ;;  %v11408_v11 = vld [vmem:[%s12356_s8 + $0x600] sm:$0xff]  }
 0x10e   : > { %10277 = vmatpush3.bf16.msra.mxu1 %v11366_v12  ;;  %10256 = vmatprep.subr.bf16.mxu0 %v11367_v13  ;;  %v11409_v12 = vld [vmem:[%s12356_s8 + $0x6c0] sm:$0xff]   ;;  %v851_v13 = vpack.c.bf16 %v409_v0, %v409_v0  ;;  %v11447_v0 = vld [vmem:[%s12356_s8 + $0x750] sm:$0xff]  }
 0x10f   : > { %10278 = vmatprep.subr.bf16.mxu1 %v11369_v14  ;;  %v853_v14 = vpack.c.bf16 %v416_v4, %v416_v4  ;;  %v11451_v4 = vld [vmem:[%s12356_s8 + $0x758] sm:$0xff]  }
 0x111   : > { %10257 = vmatpush3.bf16.msra.mxu0 %v11368_v16  ;;  %v11411_v16 = vld [vmem:[%s12356_s8 + $0x648] sm:$0xff]  }
 0x112   : > { %10279 = vmatpush3.bf16.msra.mxu1 %v11370_v18  ;;  %10258 = vmatprep.subr.bf16.mxu0 %v11371_v19  ;;  %v11412_v18 = vld [vmem:[%s12356_s8 + $0x608] sm:$0xff]  }
 0x113   : > { %10280 = vmatprep.subr.bf16.mxu1 %v11373_v22  ;;  %v11414_v19 = vld [vmem:[%s12356_s8 + $0x688] sm:$0xff]   ;;  %v11416_v22 = vld [vmem:[%s12356_s8 + $0x610] sm:$0xff]  }
 0x115   : > { %10259 = vmatpush3.bf16.msra.mxu0 %v11372_v25  ;;  %v11421_v25 = vld [vmem:[%s12356_s8 + $0x6d8] sm:$0xff]  }
 0x116   : > { %10281 = vmatpush3.bf16.msra.mxu1 %v11374_v27  ;;  %10288 = vmatprep.subr.bf16.mxu0 %v11375_v29  ;;  %v11422_v27 = vld [vmem:[%s12356_s8 + $0x698] sm:$0xff]   ;;  %v11425_v29 = vld [vmem:[%s12356_s8 + $0x6e0] sm:$0xff]  }
 0x117   : > { %10310 = vmatprep.subr.bf16.mxu1 %v11377_v32  ;;  %v11427_v32 = vld [vmem:[%s12356_s8 + $0x668] sm:$0xff]  }
 0x118   : > { %7555 = vmatmul.mubr.bf16.vlgmr.msra.gmra.mrb[16].mxu0 %v847_v33  ;;  %v11429_v33 = vld [vmem:[%s12356_s8 + $0x6e8] sm:$0xff]  }
 0x119   : > { %7595 = vmatmul.mubr.bf16.vlgmr.msra.gmra.mrb[16].mxu1 %v849_v34  ;;  %10289 = vmatpush3.bf16.msra.mxu0 %v11376_v31  ;;  %v11426_v31 = vld [vmem:[%s12356_s8 + $0x6a0] sm:$0xff]   ;;  %v11428_v34 = vld [vmem:[%s12356_s8 + $0x628] sm:$0xff]  }
 0x11a   : > { %10311 = vmatpush3.bf16.msra.mxu1 %v11378_v35  ;;  %10290 = vmatprep.subr.bf16.mxu0 %v11379_v36  ;;  %v11430_v35 = vld [vmem:[%s12356_s8 + $0x6a8] sm:$0xff]   ;;  %v11431_v36 = vld [vmem:[%s12356_s8 + $0x670] sm:$0xff]  }
 0x11b   : > { %10312 = vmatprep.subr.bf16.mxu1 %v11381_v37  ;;  %7634 = vmatprep.mubr.bf16.mxu0 %v852_v6  ;;  %v11433_v37 = vld [vmem:[%s12356_s8 + $0x6f0] sm:$0xff]   ;;  %v11452_v6 = vld [vmem:[%s12356_s8 + $0x718] sm:$0xff]  }
 0x11c   : > { %7674 = vmatprep.mubr.bf16.mxu1 %v854_v10  ;;  %v11456_v10 = vld [vmem:[%s12356_s8 + $0x720] sm:$0xff]  }
 0x11d   : > { %10291 = vmatpush3.bf16.msra.mxu0 %v11380_v38  ;;  %v11432_v38 = vld [vmem:[%s12356_s8 + $0x630] sm:$0xff]  }
 0x11e   : > { %10313 = vmatpush3.bf16.msra.mxu1 %v11382_v39  ;;  %10292 = vmatprep.subr.bf16.mxu0 %v11383_v40  ;;  %v248_v39 = vld [vmem:[%s12349_s29 + $0x30] sm:$0xff] }
 0x11f   : > { %10314 = vmatprep.subr.bf16.mxu1 %v11385_v41  ;;  %v11434_v40 = vld [vmem:[%s12356_s8 + $0x6b0] sm:$0xff]   ;;  %v273_v41 = vmax.f32 %v248_v39, 0.0 }
 0x121   : > { %10293 = vmatpush3.bf16.msra.mxu0 %v11384_v42  ;;  %v11435_v42 = vld [vmem:[%s12356_s8 + $0x678] sm:$0xff]  }
 0x122   : > { %10315 = vmatpush3.bf16.msra.mxu1 %v11386_v44  ;;  %10294 = vmatprep.subr.bf16.mxu0 %v11387_v45  ;;  %v11437_v44 = vld [vmem:[%s12356_s8 + $0x6f8] sm:$0xff]   ;;  %v426_v45 = vrot.slane %v273_v41, %v12403_v43 }
 0x123   : > { %10316 = vmatprep.subr.bf16.mxu1 %v11389_v46  ;;  %v419_v46 = vcombine.high %v273_v41, %v273_v41 }
 0x125   : > { %10295 = vmatpush3.bf16.msra.mxu0 %v11388_v47  ;;  %v11436_v47 = vld [vmem:[%s12356_s8 + $0x638] sm:$0xff]  }
 0x126   : > { %10317 = vmatpush3.bf16.msra.mxu1 %v11390_v48  ;;  %10296 = vmatprep.subr.bf16.mxu0 %v11391_v49  ;;  %v434_v48 = vcombine.high %v426_v45, %v426_v45  ;;  %v433_v49 = vrot.slane %v419_v46, %v12403_v43  ;;  %v11473_v46 = vld [vmem:[%s12356_s8 + $0x8c0] sm:$0xff]  }
 0x127   : > { %10318 = vmatprep.subr.bf16.mxu1 %v11393_v50  ;;  %v11438_v50 = vld [vmem:[%s12356_s8 + $0x6b8] sm:$0xff]  }
 0x129   : > { %10297 = vmatpush3.bf16.msra.mxu0 %v11392_v51  ;;  %v856_v51 = vpack.c.bf16 %v434_v48, %v434_v48 }
 0x12a   : > { %10319 = vmatpush3.bf16.msra.mxu1 %v11394_v52  ;;  %10298 = vmatprep.subr.bf16.mxu0 %v11395_v53  ;;  %v11439_v52 = vld [vmem:[%s12356_s8 + $0x740] sm:$0xff]   ;;  %v435_v53 = vcombine.high %v433_v49, %v433_v49 }
 0x12b   : > { %10320 = vmatprep.subr.bf16.mxu1 %v11397_v54  ;;  %v11440_v54 = vld [vmem:[%s12356_s8 + $0x700] sm:$0xff]  }
 0x12d   : > { %10299 = vmatpush3.bf16.msra.mxu0 %v11396_v55  ;;  %v11441_v55 = vld [vmem:[%s12356_s8 + $0x7c0] sm:$0xff]  }
 0x12e   : > { %10321 = vmatpush3.bf16.msra.mxu1 %v11398_v56  ;;  %10300 = vmatprep.subr.bf16.mxu0 %v11399_v57  ;;  %v855_v56 = vpack.c.bf16 %v426_v45, %v426_v45  ;;  %v858_v57 = vpack.c.bf16 %v435_v53, %v435_v53  ;;  %v11472_v45 = vld [vmem:[%s12356_s8 + $0x800] sm:$0xff]   ;;  %v11476_v53 = vld [vmem:[%s12356_s8 + $0x808] sm:$0xff]  }
 0x12f   : > { %10322 = vmatprep.subr.bf16.mxu1 %v11401_v58  ;;  %v857_v58 = vpack.c.bf16 %v433_v49, %v433_v49 }
 0x131   : > { %10301 = vmatpush3.bf16.msra.mxu0 %v11400_v60  ;;  %v11443_v60 = vld [vmem:[%s12356_s8 + $0x748] sm:$0xff]  }
 0x132   : > { %10323 = vmatpush3.bf16.msra.mxu1 %v11402_v62  ;;  %10302 = vmatprep.subr.bf16.mxu0 %v11403_v63  ;;  %v11444_v62 = vld [vmem:[%s12356_s8 + $0x708] sm:$0xff]  }
 0x133   : > { %10324 = vmatprep.subr.bf16.mxu1 %v11405_v2  ;;  %v11446_v63 = vld [vmem:[%s12356_s8 + $0x788] sm:$0xff]   ;;  %v11448_v2 = vld [vmem:[%s12356_s8 + $0x710] sm:$0xff]  }
 0x135   : > { %10303 = vmatpush3.bf16.msra.mxu0 %v11404_v5  ;;  %v11453_v5 = vld [vmem:[%s12356_s8 + $0x7d8] sm:$0xff]  }
 0x136   : > { %10325 = vmatpush3.bf16.msra.mxu1 %v11406_v7  ;;  %10332 = vmatprep.subr.bf16.mxu0 %v11407_v9  ;;  %v11454_v7 = vld [vmem:[%s12356_s8 + $0x798] sm:$0xff]   ;;  %v11457_v9 = vld [vmem:[%s12356_s8 + $0x7e0] sm:$0xff]  }
 0x137   : > { %10354 = vmatprep.subr.bf16.mxu1 %v11409_v12  ;;  %v11459_v12 = vld [vmem:[%s12356_s8 + $0x768] sm:$0xff]  }
 0x138   : > { %7635 = vmatmul.mubr.bf16.vlgmr.msra.gmra.mrb[20].mxu0 %v851_v13  ;;  %v11461_v13 = vld [vmem:[%s12356_s8 + $0x7e8] sm:$0xff]  }
 0x139   : > { %7675 = vmatmul.mubr.bf16.vlgmr.msra.gmra.mrb[20].mxu1 %v853_v14  ;;  %10333 = vmatpush3.bf16.msra.mxu0 %v11408_v11  ;;  %v11458_v11 = vld [vmem:[%s12356_s8 + $0x7a0] sm:$0xff]   ;;  %v11460_v14 = vld [vmem:[%s12356_s8 + $0x728] sm:$0xff]  }
 0x13a   : > { %10355 = vmatpush3.bf16.msra.mxu1 %v11410_v15  ;;  %10334 = vmatprep.subr.bf16.mxu0 %v11411_v16  ;;  %v11462_v15 = vld [vmem:[%s12356_s8 + $0x7a8] sm:$0xff]   ;;  %v11463_v16 = vld [vmem:[%s12356_s8 + $0x770] sm:$0xff]  }
 0x13b   : > { %10356 = vmatprep.subr.bf16.mxu1 %v11413_v17  ;;  %7714 = vmatprep.mubr.bf16.mxu0 %v856_v51  ;;  %v11465_v17 = vld [vmem:[%s12356_s8 + $0x7f0] sm:$0xff]   ;;  %v11475_v51 = vld [vmem:[%s12356_s8 + $0x848] sm:$0xff]  }
 0x13c   : > { %7754 = vmatprep.mubr.bf16.mxu1 %v858_v57  ;;  %v11480_v57 = vld [vmem:[%s12356_s8 + $0x810] sm:$0xff]  }
 0x13d   : > { %10335 = vmatpush3.bf16.msra.mxu0 %v11412_v18 }
 0x13e   : > { %10357 = vmatpush3.bf16.msra.mxu1 %v11414_v19  ;;  %10336 = vmatprep.subr.bf16.mxu0 %v11415_v20  ;;  %v11464_v20 = vld [vmem:[%s12356_s8 + $0x730] sm:$0xff]  }
 0x13f   : > { %10358 = vmatprep.subr.bf16.mxu1 %v11417_v21  ;;  %v249_v21 = vld [vmem:[%s12349_s29 + $0x38] sm:$0xff] }
 0x141   : > { %10337 = vmatpush3.bf16.msra.mxu0 %v11416_v22 }
 0x142   : > { %10359 = vmatpush3.bf16.msra.mxu1 %v11418_v23  ;;  %10338 = vmatprep.subr.bf16.mxu0 %v11419_v24  ;;  %v11466_v24 = vld [vmem:[%s12356_s8 + $0x7b0] sm:$0xff]  }
 0x143   : > { %10360 = vmatprep.subr.bf16.mxu1 %v11421_v25  ;;  %v274_v25 = vmax.f32 %v249_v21, 0.0 }
 0x145   : > { %10339 = vmatpush3.bf16.msra.mxu0 %v11420_v26 }
 0x146   : > { %10361 = vmatpush3.bf16.msra.mxu1 %v11422_v27  ;;  %10340 = vmatprep.subr.bf16.mxu0 %v11423_v28 }
 0x147   : > { %10362 = vmatprep.subr.bf16.mxu1 %v11425_v29  ;;  %v11467_v29 = vld [vmem:[%s12356_s8 + $0x778] sm:$0xff]  }
 0x149   : > { %10341 = vmatpush3.bf16.msra.mxu0 %v11424_v30 }
 0x14a   : > { %10363 = vmatpush3.bf16.msra.mxu1 %v11426_v31  ;;  %10342 = vmatprep.subr.bf16.mxu0 %v11427_v32  ;;  %v11469_v31 = vld [vmem:[%s12356_s8 + $0x7f8] sm:$0xff]   ;;  %v443_v32 = vrot.slane %v274_v25, %v12403_v43 }
 0x14b   : > { %10364 = vmatprep.subr.bf16.mxu1 %v11429_v33  ;;  %v436_v33 = vcombine.high %v274_v25, %v274_v25 }
 0x14d   : > { %10343 = vmatpush3.bf16.msra.mxu0 %v11428_v34 }
 0x14e   : > { %10365 = vmatpush3.bf16.msra.mxu1 %v11430_v35  ;;  %10344 = vmatprep.subr.bf16.mxu0 %v11431_v36  ;;  %v11468_v36 = vld [vmem:[%s12356_s8 + $0x738] sm:$0xff]  }
 0x14f   : > { %10366 = vmatprep.subr.bf16.mxu1 %v11433_v37  ;;  %v451_v37 = vcombine.high %v443_v32, %v443_v32 }
 0x151   : > { %10345 = vmatpush3.bf16.msra.mxu0 %v11432_v38  ;;  %v450_v38 = vrot.slane %v436_v33, %v12403_v43  ;;  %v860_v41 = vpack.c.bf16 %v451_v37, %v451_v37 }
 0x152   : > { %10367 = vmatpush3.bf16.msra.mxu1 %v11434_v40  ;;  %10346 = vmatprep.subr.bf16.mxu0 %v11435_v42  ;;  %v11470_v40 = vld [vmem:[%s12356_s8 + $0x7b8] sm:$0xff]   ;;  %v11471_v42 = vld [vmem:[%s12356_s8 + $0x840] sm:$0xff]  }
 0x153   : > { %10368 = vmatprep.subr.bf16.mxu1 %v11437_v44  ;;  %v452_v44 = vcombine.high %v450_v38, %v450_v38  ;;  %v861_v49 = vpack.c.bf16 %v450_v38, %v450_v38  ;;  %v11504_v38 = vld [vmem:[%s12356_s8 + $0x900] sm:$0xff]  }
 0x155   : > { %10347 = vmatpush3.bf16.msra.mxu0 %v11436_v47  ;;  %v859_v47 = vpack.c.bf16 %v443_v32, %v443_v32  ;;  %v862_v48 = vpack.c.bf16 %v452_v44, %v452_v44  ;;  %v11503_v32 = vld [vmem:[%s12356_s8 + $0x940] sm:$0xff]   ;;  %v11509_v44 = vld [vmem:[%s12356_s8 + $0x9c8] sm:$0xff]  }
 0x156   : > { %10369 = vmatpush3.bf16.msra.mxu1 %v11438_v50  ;;  %10376 = vmatprep.subr.bf16.mxu0 %v11439_v52  ;;  %v11474_v50 = vld [vmem:[%s12356_s8 + $0x880] sm:$0xff]   ;;  %v11477_v52 = vld [vmem:[%s12356_s8 + $0x8c8] sm:$0xff]  }
 0x157   : > { %10398 = vmatprep.subr.bf16.mxu1 %v11441_v55  ;;  %v11479_v55 = vld [vmem:[%s12356_s8 + $0x850] sm:$0xff]  }
 0x158   : > { %7715 = vmatmul.mubr.bf16.vlgmr.msra.gmra.mrb[24].mxu0 %v855_v56  ;;  %v11481_v56 = vld [vmem:[%s12356_s8 + $0x8d0] sm:$0xff]  }
 0x159   : > { %7755 = vmatmul.mubr.bf16.vlgmr.msra.gmra.mrb[24].mxu1 %v857_v58  ;;  %10377 = vmatpush3.bf16.msra.mxu0 %v11440_v54  ;;  %v11478_v54 = vld [vmem:[%s12356_s8 + $0x888] sm:$0xff]   ;;  %v11482_v58 = vld [vmem:[%s12356_s8 + $0x890] sm:$0xff]  }
 0x15a   : > { %10399 = vmatpush3.bf16.msra.mxu1 %v11442_v59  ;;  %10378 = vmatprep.subr.bf16.mxu0 %v11443_v60  ;;  %v11483_v59 = vld [vmem:[%s12356_s8 + $0x858] sm:$0xff]  }
 0x15b   : > { %10400 = vmatprep.subr.bf16.mxu1 %v11445_v61  ;;  %7794 = vmatprep.mubr.bf16.mxu0 %v860_v41  ;;  %v11485_v60 = vld [vmem:[%s12356_s8 + $0x8d8] sm:$0xff]  }
 0x15c   : > { %7834 = vmatprep.mubr.bf16.mxu1 %v862_v48  ;;  %v11484_v61 = vld [vmem:[%s12356_s8 + $0x818] sm:$0xff]   ;;  %v11513_v48 = vld [vmem:[%s12356_s8 + $0x9d0] sm:$0xff]  }
 0x15d   : > { %10379 = vmatpush3.bf16.msra.mxu0 %v11444_v62  ;;  %v11486_v62 = vld [vmem:[%s12356_s8 + $0x898] sm:$0xff]  }
 0x15e   : > { %10401 = vmatpush3.bf16.msra.mxu1 %v11446_v63  ;;  %10380 = vmatprep.subr.bf16.mxu0 %v11447_v0  ;;  %v11487_v63 = vld [vmem:[%s12356_s8 + $0x860] sm:$0xff]  }
 0x15f   : > { %10402 = vmatprep.subr.bf16.mxu1 %v11449_v1  ;;  %v11489_v0 = vld [vmem:[%s12356_s8 + $0x8e0] sm:$0xff]  }
 0x160   : > { %v11488_v1 = vld [vmem:[%s12356_s8 + $0x820] sm:$0xff]  }
 0x161   : > { %10381 = vmatpush3.bf16.msra.mxu0 %v11448_v2  ;;  %v11490_v2 = vld [vmem:[%s12356_s8 + $0x8a0] sm:$0xff]  }
 0x162   : > { %10403 = vmatpush3.bf16.msra.mxu1 %v11450_v3  ;;  %10382 = vmatprep.subr.bf16.mxu0 %v11451_v4  ;;  %v11491_v3 = vld [vmem:[%s12356_s8 + $0x868] sm:$0xff]  }
 0x163   : > { %10404 = vmatprep.subr.bf16.mxu1 %v11453_v5  ;;  %v11493_v4 = vld [vmem:[%s12356_s8 + $0x8e8] sm:$0xff]  }
 0x164   : > { %v11492_v5 = vld [vmem:[%s12356_s8 + $0x828] sm:$0xff]  }
 0x165   : > { %10383 = vmatpush3.bf16.msra.mxu0 %v11452_v6  ;;  %v11494_v6 = vld [vmem:[%s12356_s8 + $0x8a8] sm:$0xff]  }
 0x166   : > { %10405 = vmatpush3.bf16.msra.mxu1 %v11454_v7  ;;  %10384 = vmatprep.subr.bf16.mxu0 %v11455_v8  ;;  %v11495_v7 = vld [vmem:[%s12356_s8 + $0x870] sm:$0xff]  }
 0x167   : > { %10406 = vmatprep.subr.bf16.mxu1 %v11457_v9  ;;  %v11497_v8 = vld [vmem:[%s12356_s8 + $0x8f0] sm:$0xff]  }
 0x169   : > { %10385 = vmatpush3.bf16.msra.mxu0 %v11456_v10 }
 0x16a   : > { %10407 = vmatpush3.bf16.msra.mxu1 %v11458_v11  ;;  %10386 = vmatprep.subr.bf16.mxu0 %v11459_v12 }
 0x16b   : > { %10408 = vmatprep.subr.bf16.mxu1 %v11461_v13  ;;  %v10084_v18 = vpop.f32.mrb[0].mxu0  ;;  %v11496_v13 = vld [vmem:[%s12356_s8 + $0x830] sm:$0xff]  }
 0x16c   : > { %v10106_v19 = vpop.f32.mrb[0].mxu1  ;;  %v10085_v22 = vpop.f32.mrb[1].mxu0 }
 0x16d   : > { %v10107_v23 = vpop.f32.mrb[1].mxu1  ;;  %v10086_v26 = vadd.f32 %v10085_v22, %v10084_v18  ;;  %v10087_v28 = vpop.f32.mrb[2].mxu0  ;;  %10387 = vmatpush3.bf16.msra.mxu0 %v11460_v14  ;;  %v250_v14 = vld [vmem:[%s12349_s29 + $0x40] sm:$0xff]  ;;  %v11498_v18 = vld [vmem:[%s12356_s8 + $0x8b0] sm:$0xff]  }
 0x16e   : > { %v10108_v27 = vadd.f32 %v10107_v23, %v10106_v19  ;;  %10409 = vmatpush3.bf16.msra.mxu1 %v11462_v15  ;;  %v10088_v30 = vpop.f32.mrb[3].mxu0  ;;  %10388 = vmatprep.subr.bf16.mxu0 %v11463_v16  ;;  %v10109_v35 = vpop.f32.mrb[2].mxu1  ;;  %v11499_v19 = vld [vmem:[%s12356_s8 + $0x878] sm:$0xff]  }
 0x16f   : > { %10410 = vmatprep.subr.bf16.mxu1 %v11465_v17  ;;  %v10110_v39 = vpop.f32.mrb[3].mxu1  ;;  %v11501_v22 = vld [vmem:[%s12356_s8 + $0x8f8] sm:$0xff]   ;;  %v11505_v35 = vld [vmem:[%s12356_s8 + $0x9c0] sm:$0xff]  }
 0x170   : > { %v12647_v34 = vadd.f32 %v10108_v27, %v10086_v26  ;;  %v11500_v26 = vld [vmem:[%s12356_s8 + $0x838] sm:$0xff]  }
 0x171   : > { %10389 = vmatpush3.bf16.msra.mxu0 %v11464_v20  ;;  %v275_v20 = vmax.f32 %v250_v14, 0.0  ;;  %v11502_v30 = vld [vmem:[%s12356_s8 + $0x8b8] sm:$0xff]  }
 0x172   : > { %10411 = vmatpush3.bf16.msra.mxu1 %v11466_v24  ;;  %10390 = vmatprep.subr.bf16.mxu0 %v11467_v29 }
 0x173   : > { %10412 = vmatprep.subr.bf16.mxu1 %v11469_v31  ;;  %v460_v24 = vrot.slane %v275_v20, %v12403_v43  ;;  %v453_v25 = vcombine.high %v275_v20, %v275_v20 }
 0x175   : > { %10391 = vmatpush3.bf16.msra.mxu0 %v11468_v36  ;;  %v468_v29 = vcombine.high %v460_v24, %v460_v24  ;;  %v467_v33 = vrot.slane %v453_v25, %v12403_v43  ;;  %v863_v36 = vpack.c.bf16 %v460_v24, %v460_v24  ;;  %v11535_v24 = vld [vmem:[%s12356_s8 + $0xa40] sm:$0xff]  }
 0x176   : > { %10413 = vmatpush3.bf16.msra.mxu1 %v11470_v40  ;;  %10420 = vmatprep.subr.bf16.mxu0 %v11471_v42  ;;  %v11506_v40 = vld [vmem:[%s12356_s8 + $0x980] sm:$0xff]   ;;  %v11507_v42 = vld [vmem:[%s12356_s8 + $0x948] sm:$0xff]  }
 0x177   : > { %10442 = vmatprep.subr.bf16.mxu1 %v11473_v46  ;;  %v469_v37 = vcombine.high %v467_v33, %v467_v33  ;;  %v865_v39 = vpack.c.bf16 %v467_v33, %v467_v33  ;;  %v11510_v46 = vld [vmem:[%s12356_s8 + $0x988] sm:$0xff]  }
 0x178   : > { %7795 = vmatmul.mubr.bf16.vlgmr.msra.gmra.mrb[28].mxu0 %v859_v47  ;;  %v11511_v47 = vld [vmem:[%s12356_s8 + $0x950] sm:$0xff]  }
 0x179   : > { %7835 = vmatmul.mubr.bf16.vlgmr.msra.gmra.mrb[28].mxu1 %v861_v49  ;;  %10421 = vmatpush3.bf16.msra.mxu0 %v11472_v45  ;;  %v866_v41 = vpack.c.bf16 %v469_v37, %v469_v37  ;;  %v11508_v45 = vld [vmem:[%s12356_s8 + $0x908] sm:$0xff]   ;;  %v11512_v49 = vld [vmem:[%s12356_s8 + $0x910] sm:$0xff]  }
 0x17a   : > { %10443 = vmatpush3.bf16.msra.mxu1 %v11474_v50  ;;  %10422 = vmatprep.subr.bf16.mxu0 %v11475_v51  ;;  %v11514_v50 = vld [vmem:[%s12356_s8 + $0x990] sm:$0xff]   ;;  %v11515_v51 = vld [vmem:[%s12356_s8 + $0x958] sm:$0xff]   ;;  %v11542_v37 = vld [vmem:[%s12356_s8 + $0xa88] sm:$0xff]  }
 0x17b   : > { %10444 = vmatprep.subr.bf16.mxu1 %v11477_v52  ;;  %7914 = vmatprep.mubr.bf16.mxu1 %v866_v41  ;;  %v11517_v52 = vld [vmem:[%s12356_s8 + $0x9d8] sm:$0xff]   ;;  %v11546_v41 = vld [vmem:[%s12356_s8 + $0xa90] sm:$0xff]  }
 0x17d   : > { %10423 = vmatpush3.bf16.msra.mxu0 %v11476_v53  ;;  %v11516_v53 = vld [vmem:[%s12356_s8 + $0x918] sm:$0xff]  }
 0x17e   : > { %10445 = vmatpush3.bf16.msra.mxu1 %v11478_v54  ;;  %10424 = vmatprep.subr.bf16.mxu0 %v11479_v55  ;;  %v11518_v54 = vld [vmem:[%s12356_s8 + $0x998] sm:$0xff]   ;;  %v11519_v55 = vld [vmem:[%s12356_s8 + $0x960] sm:$0xff]  }
 0x17f   : > { %10446 = vmatprep.subr.bf16.mxu1 %v11481_v56  ;;  %v11521_v56 = vld [vmem:[%s12356_s8 + $0x9e0] sm:$0xff]  }
 0x181   : > { %10425 = vmatpush3.bf16.msra.mxu0 %v11480_v57  ;;  %v11520_v57 = vld [vmem:[%s12356_s8 + $0x920] sm:$0xff]  }
 0x182   : > { %10447 = vmatpush3.bf16.msra.mxu1 %v11482_v58  ;;  %10426 = vmatprep.subr.bf16.mxu0 %v11483_v59  ;;  %v11522_v58 = vld [vmem:[%s12356_s8 + $0x9a0] sm:$0xff]   ;;  %v11523_v59 = vld [vmem:[%s12356_s8 + $0x968] sm:$0xff]  }
 0x183   : > { %10448 = vmatprep.subr.bf16.mxu1 %v11485_v60  ;;  %v11525_v60 = vld [vmem:[%s12356_s8 + $0x9e8] sm:$0xff]  }
 0x185   : > { %10427 = vmatpush3.bf16.msra.mxu0 %v11484_v61  ;;  %v11524_v61 = vld [vmem:[%s12356_s8 + $0x928] sm:$0xff]  }
 0x186   : > { %10449 = vmatpush3.bf16.msra.mxu1 %v11486_v62  ;;  %10428 = vmatprep.subr.bf16.mxu0 %v11487_v63  ;;  %v11526_v62 = vld [vmem:[%s12356_s8 + $0x9a8] sm:$0xff]   ;;  %v11527_v63 = vld [vmem:[%s12356_s8 + $0x970] sm:$0xff]  }
 0x187   : > { %10450 = vmatprep.subr.bf16.mxu1 %v11489_v0 }
 0x189   : > { %10429 = vmatpush3.bf16.msra.mxu0 %v11488_v1 }
 0x18a   : > { %10451 = vmatpush3.bf16.msra.mxu1 %v11490_v2  ;;  %10430 = vmatprep.subr.bf16.mxu0 %v11491_v3  ;;  %v11528_v2 = vld [vmem:[%s12356_s8 + $0x930] sm:$0xff]  }
 0x18b   : > { %10452 = vmatprep.subr.bf16.mxu1 %v11493_v4  ;;  %v10128_v9 = vpop.f32.mrb[4].mxu0  ;;  %v11529_v3 = vld [vmem:[%s12356_s8 + $0x9f0] sm:$0xff]  }
 0x18c   : > { %v10150_v10 = vpop.f32.mrb[4].mxu1  ;;  %v10129_v11 = vpop.f32.mrb[5].mxu0 }
 0x18d   : > { %v10151_v12 = vpop.f32.mrb[5].mxu1  ;;  %v10130_v15 = vadd.f32 %v10129_v11, %v10128_v9  ;;  %v10131_v16 = vpop.f32.mrb[6].mxu0  ;;  %10431 = vmatpush3.bf16.msra.mxu0 %v11492_v5 }
 0x18e   : > { %v10152_v17 = vadd.f32 %v10151_v12, %v10150_v10  ;;  %10453 = vmatpush3.bf16.msra.mxu1 %v11494_v6  ;;  %v10132_v21 = vpop.f32.mrb[7].mxu0  ;;  %10432 = vmatprep.subr.bf16.mxu0 %v11495_v7  ;;  %v10153_v27 = vpop.f32.mrb[6].mxu1  ;;  %v11530_v6 = vld [vmem:[%s12356_s8 + $0x9b0] sm:$0xff]   ;;  %v251_v10 = vld [vmem:[%s12349_s29 + $0x48] sm:$0xff]  ;;  %v11531_v12 = vld [vmem:[%s12356_s8 + $0x978] sm:$0xff]  }
 0x18f   : > { %10454 = vmatprep.subr.bf16.mxu1 %v11497_v8  ;;  %v7317_v23 = vadd.f32 %v10130_v15, %v12647_v34  ;;  %v10154_v31 = vpop.f32.mrb[7].mxu1  ;;  %v864_v34 = vpack.c.bf16 %v468_v29, %v468_v29  ;;  %v276_v14 = vmax.f32 %v251_v10, 0.0  ;;  %v11532_v16 = vld [vmem:[%s12356_s8 + $0x938] sm:$0xff]  }
 0x190   : > { %v11534_v21 = vld [vmem:[%s12356_s8 + $0x9b8] sm:$0xff]  }
 0x191   : > { %v12686_v28 = vadd.f32 %v10152_v17, %v7317_v23  ;;  %10433 = vmatpush3.bf16.msra.mxu0 %v11496_v13  ;;  %7874 = vmatprep.mubr.bf16.mxu0 %v864_v34  ;;  %v11533_v13 = vld [vmem:[%s12356_s8 + $0x9f8] sm:$0xff]   ;;  %v477_v17 = vrot.slane %v276_v14, %v12403_v43  ;;  %v11539_v34 = vld [vmem:[%s12356_s8 + $0xa48] sm:$0xff]  }
 0x192   : > { %10455 = vmatpush3.bf16.msra.mxu1 %v11498_v18  ;;  %10434 = vmatprep.subr.bf16.mxu0 %v11499_v19  ;;  %v470_v18 = vcombine.high %v276_v14, %v276_v14  ;;  %v11564_v10 = vld [vmem:[%s12356_s8 + $0xa38] sm:$0xff]  }
 0x193   : > { %10456 = vmatprep.subr.bf16.mxu1 %v11501_v22  ;;  %v485_v23 = vcombine.high %v477_v17, %v477_v17  ;;  %v11566_v14 = vld [vmem:[%s12356_s8 + $0xab8] sm:$0xff]  }
 0x194   : > { %v484_v25 = vrot.slane %v470_v18, %v12403_v43  ;;  %v11569_v18 = vld [vmem:[%s12356_s8 + $0xbc0] sm:$0xff]  }
 0x195   : > { %10435 = vmatpush3.bf16.msra.mxu0 %v11500_v26  ;;  %v11537_v26 = vld [vmem:[%s12356_s8 + $0xac0] sm:$0xff]   ;;  %v868_v27 = vpack.c.bf16 %v485_v23, %v485_v23 }
 0x196   : > { %10457 = vmatpush3.bf16.msra.mxu1 %v11502_v30  ;;  %10464 = vmatprep.subr.bf16.mxu0 %v11503_v32  ;;  %v486_v29 = vcombine.high %v484_v25, %v484_v25  ;;  %v11536_v30 = vld [vmem:[%s12356_s8 + $0xa00] sm:$0xff]   ;;  %v869_v31 = vpack.c.bf16 %v484_v25, %v484_v25 }
 0x197   : > { %10486 = vmatprep.subr.bf16.mxu1 %v11505_v35  ;;  %v11538_v32 = vld [vmem:[%s12356_s8 + $0xa80] sm:$0xff]   ;;  %v11541_v35 = vld [vmem:[%s12356_s8 + $0xac8] sm:$0xff]  }
 0x198   : > { %7875 = vmatmul.mubr.bf16.vlgmr.msra.gmra.mrb[32].mxu0 %v863_v36  ;;  %v870_v33 = vpack.c.bf16 %v486_v29, %v486_v29  ;;  %v11540_v36 = vld [vmem:[%s12356_s8 + $0xa08] sm:$0xff]  }
 0x199   : > { %10465 = vmatpush3.bf16.msra.mxu0 %v11504_v38  ;;  %7915 = vmatmul.mubr.bf16.vlgmr.msra.gmra.mrb[32].mxu1 %v865_v39  ;;  %v11543_v38 = vld [vmem:[%s12356_s8 + $0xa50] sm:$0xff]   ;;  %v11574_v29 = vld [vmem:[%s12356_s8 + $0xb88] sm:$0xff]  }
 0x19a   : > { %10487 = vmatpush3.bf16.msra.mxu1 %v11506_v40  ;;  %10466 = vmatprep.subr.bf16.mxu0 %v11507_v42  ;;  %v11545_v39 = vld [vmem:[%s12356_s8 + $0xad0] sm:$0xff]   ;;  %v11547_v42 = vld [vmem:[%s12356_s8 + $0xa58] sm:$0xff]  }
 0x19b   : > { %10488 = vmatprep.subr.bf16.mxu1 %v11509_v44  ;;  %7954 = vmatprep.mubr.bf16.mxu0 %v868_v27  ;;  %v11544_v40 = vld [vmem:[%s12356_s8 + $0xa10] sm:$0xff]   ;;  %v11549_v44 = vld [vmem:[%s12356_s8 + $0xad8] sm:$0xff]   ;;  %v11573_v27 = vld [vmem:[%s12356_s8 + $0xbc8] sm:$0xff]  }
 0x19c   : > { %7994 = vmatprep.mubr.bf16.mxu1 %v870_v33  ;;  %v11578_v33 = vld [vmem:[%s12356_s8 + $0xb90] sm:$0xff]  }
 0x19d   : > { %10467 = vmatpush3.bf16.msra.mxu0 %v11508_v45  ;;  %v11548_v45 = vld [vmem:[%s12356_s8 + $0xa18] sm:$0xff]  }
 0x19e   : > { %10489 = vmatpush3.bf16.msra.mxu1 %v11510_v46  ;;  %10468 = vmatprep.subr.bf16.mxu0 %v11511_v47  ;;  %v11550_v46 = vld [vmem:[%s12356_s8 + $0xa98] sm:$0xff]   ;;  %v11551_v47 = vld [vmem:[%s12356_s8 + $0xa60] sm:$0xff]  }
 0x19f   : > { %10490 = vmatprep.subr.bf16.mxu1 %v11513_v48  ;;  %v11553_v48 = vld [vmem:[%s12356_s8 + $0xae0] sm:$0xff]  }
 0x1a1   : > { %10469 = vmatpush3.bf16.msra.mxu0 %v11512_v49  ;;  %v11552_v49 = vld [vmem:[%s12356_s8 + $0xa20] sm:$0xff]  }
 0x1a2   : > { %10491 = vmatpush3.bf16.msra.mxu1 %v11514_v50  ;;  %10470 = vmatprep.subr.bf16.mxu0 %v11515_v51  ;;  %v11554_v50 = vld [vmem:[%s12356_s8 + $0xaa0] sm:$0xff]   ;;  %v11555_v51 = vld [vmem:[%s12356_s8 + $0xa68] sm:$0xff]  }
 0x1a3   : > { %10492 = vmatprep.subr.bf16.mxu1 %v11517_v52  ;;  %v11557_v52 = vld [vmem:[%s12356_s8 + $0xae8] sm:$0xff]  }
 0x1a5   : > { %10471 = vmatpush3.bf16.msra.mxu0 %v11516_v53  ;;  %v11556_v53 = vld [vmem:[%s12356_s8 + $0xa28] sm:$0xff]  }
 0x1a6   : > { %10493 = vmatpush3.bf16.msra.mxu1 %v11518_v54  ;;  %10472 = vmatprep.subr.bf16.mxu0 %v11519_v55  ;;  %v11558_v54 = vld [vmem:[%s12356_s8 + $0xaa8] sm:$0xff]   ;;  %v11559_v55 = vld [vmem:[%s12356_s8 + $0xa70] sm:$0xff]  }
 0x1a7   : > { %10494 = vmatprep.subr.bf16.mxu1 %v11521_v56 }
 0x1a9   : > { %10473 = vmatpush3.bf16.msra.mxu0 %v11520_v57 }
 0x1aa   : > { %10495 = vmatpush3.bf16.msra.mxu1 %v11522_v58  ;;  %10474 = vmatprep.subr.bf16.mxu0 %v11523_v59  ;;  %v11560_v58 = vld [vmem:[%s12356_s8 + $0xa30] sm:$0xff]  }
 0x1ab   : > { %v10172_v0 = vpop.f32.mrb[8].mxu0  ;;  %10496 = vmatprep.subr.bf16.mxu1 %v11525_v60  ;;  %v11561_v59 = vld [vmem:[%s12356_s8 + $0xaf0] sm:$0xff]  }
 0x1ac   : > { %v10194_v1 = vpop.f32.mrb[8].mxu1  ;;  %v10173_v4 = vpop.f32.mrb[9].mxu0 }
 0x1ad   : > { %v10195_v5 = vpop.f32.mrb[9].mxu1  ;;  %v10174_v7 = vadd.f32 %v10173_v4, %v10172_v0  ;;  %v10175_v8 = vpop.f32.mrb[10].mxu0  ;;  %10475 = vmatpush3.bf16.msra.mxu0 %v11524_v61 }
 0x1ae   : > { %v10196_v9 = vadd.f32 %v10195_v5, %v10194_v1  ;;  %v10176_v11 = vpop.f32.mrb[11].mxu0  ;;  %10497 = vmatpush3.bf16.msra.mxu1 %v11526_v62  ;;  %10476 = vmatprep.subr.bf16.mxu0 %v11527_v63  ;;  %v10197_v19 = vpop.f32.mrb[10].mxu1  ;;  %v11562_v62 = vld [vmem:[%s12356_s8 + $0xab0] sm:$0xff]   ;;  %v11565_v8 = vld [vmem:[%s12356_s8 + $0xaf8] sm:$0xff]  }
 0x1af   : > { %v7397_v15 = vadd.f32 %v10174_v7, %v12686_v28  ;;  %10498 = vmatprep.subr.bf16.mxu1 %v11529_v3  ;;  %v10198_v22 = vpop.f32.mrb[11].mxu1  ;;  %v867_v28 = vpack.c.bf16 %v477_v17, %v477_v17  ;;  %v252_v3 = vld [vmem:[%s12349_s29 + $0x50] sm:$0xff] }
 0x1b0   : > { %v11568_v22 = vld [vmem:[%s12356_s8 + $0xb00] sm:$0xff]  }
 0x1b1   : > { %v12724_v20 = vadd.f32 %v10196_v9, %v7397_v15  ;;  %10477 = vmatpush3.bf16.msra.mxu0 %v11528_v2  ;;  %v11563_v2 = vld [vmem:[%s12356_s8 + $0xa78] sm:$0xff]  }
 0x1b2   : > { %10499 = vmatpush3.bf16.msra.mxu1 %v11530_v6  ;;  %10478 = vmatprep.subr.bf16.mxu0 %v11531_v12  ;;  %v277_v6 = vmax.f32 %v252_v3, 0.0 }
 0x1b3   : > { %10500 = vmatprep.subr.bf16.mxu1 %v11533_v13 }
 0x1b4   : > { %v494_v11 = vrot.slane %v277_v6, %v12403_v43  ;;  %v487_v12 = vcombine.high %v277_v6, %v277_v6 }
 0x1b5   : > { %10479 = vmatpush3.bf16.msra.mxu0 %v11532_v16  ;;  %v11567_v16 = vld [vmem:[%s12356_s8 + $0xb40] sm:$0xff]  }
 0x1b6   : > { %10501 = vmatpush3.bf16.msra.mxu1 %v11534_v21  ;;  %10508 = vmatprep.subr.bf16.mxu0 %v11535_v24  ;;  %v502_v15 = vcombine.high %v494_v11, %v494_v11  ;;  %v501_v17 = vrot.slane %v487_v12, %v12403_v43  ;;  %v11570_v24 = vld [vmem:[%s12356_s8 + $0xb80] sm:$0xff]  }
 0x1b7   : > { %10530 = vmatprep.subr.bf16.mxu1 %v11537_v26  ;;  %v11571_v26 = vld [vmem:[%s12356_s8 + $0xb48] sm:$0xff]   ;;  %v11600_v12 = vld [vmem:[%s12356_s8 + $0xc00] sm:$0xff]  }
 0x1b8   : > { %7955 = vmatmul.mubr.bf16.vlgmr.msra.gmra.mrb[36].mxu0 %v867_v28  ;;  %v872_v19 = vpack.c.bf16 %v502_v15, %v502_v15  ;;  %v503_v21 = vcombine.high %v501_v17, %v501_v17  ;;  %v873_v23 = vpack.c.bf16 %v501_v17, %v501_v17  ;;  %v11572_v28 = vld [vmem:[%s12356_s8 + $0xb08] sm:$0xff]   ;;  %v11602_v15 = vld [vmem:[%s12356_s8 + $0xc80] sm:$0xff]  }
 0x1b9   : > { %10509 = vmatpush3.bf16.msra.mxu0 %v11536_v30  ;;  %7995 = vmatmul.mubr.bf16.vlgmr.msra.gmra.mrb[36].mxu1 %v869_v31  ;;  %v11575_v30 = vld [vmem:[%s12356_s8 + $0xb50] sm:$0xff]   ;;  %v11603_v17 = vld [vmem:[%s12356_s8 + $0xc48] sm:$0xff]  }
 0x1ba   : > { %10531 = vmatpush3.bf16.msra.mxu1 %v11538_v32  ;;  %10510 = vmatprep.subr.bf16.mxu0 %v11539_v34  ;;  %v874_v25 = vpack.c.bf16 %v503_v21, %v503_v21  ;;  %v11577_v31 = vld [vmem:[%s12356_s8 + $0xbd0] sm:$0xff]   ;;  %v11579_v34 = vld [vmem:[%s12356_s8 + $0xb58] sm:$0xff]   ;;  %v11606_v21 = vld [vmem:[%s12356_s8 + $0xc88] sm:$0xff]  }
 0x1bb   : > { %10532 = vmatprep.subr.bf16.mxu1 %v11541_v35  ;;  %8034 = vmatprep.mubr.bf16.mxu0 %v872_v19  ;;  %v11576_v32 = vld [vmem:[%s12356_s8 + $0xb10] sm:$0xff]   ;;  %v11581_v35 = vld [vmem:[%s12356_s8 + $0xbd8] sm:$0xff]   ;;  %v11604_v19 = vld [vmem:[%s12356_s8 + $0xc08] sm:$0xff]  }
 0x1bc   : > { %8074 = vmatprep.mubr.bf16.mxu1 %v874_v25  ;;  %v11610_v25 = vld [vmem:[%s12356_s8 + $0xc90] sm:$0xff]  }
 0x1bd   : > { %10511 = vmatpush3.bf16.msra.mxu0 %v11540_v36  ;;  %v11580_v36 = vld [vmem:[%s12356_s8 + $0xb18] sm:$0xff]  }
 0x1be   : > { %10533 = vmatpush3.bf16.msra.mxu1 %v11542_v37  ;;  %10512 = vmatprep.subr.bf16.mxu0 %v11543_v38  ;;  %v11582_v37 = vld [vmem:[%s12356_s8 + $0xb98] sm:$0xff]   ;;  %v11583_v38 = vld [vmem:[%s12356_s8 + $0xb60] sm:$0xff]  }
 0x1bf   : > { %10534 = vmatprep.subr.bf16.mxu1 %v11545_v39  ;;  %v11585_v39 = vld [vmem:[%s12356_s8 + $0xbe0] sm:$0xff]  }
 0x1c1   : > { %10513 = vmatpush3.bf16.msra.mxu0 %v11544_v40  ;;  %v11584_v40 = vld [vmem:[%s12356_s8 + $0xb20] sm:$0xff]  }
 0x1c2   : > { %10535 = vmatpush3.bf16.msra.mxu1 %v11546_v41  ;;  %10514 = vmatprep.subr.bf16.mxu0 %v11547_v42  ;;  %v11586_v41 = vld [vmem:[%s12356_s8 + $0xba0] sm:$0xff]   ;;  %v11587_v42 = vld [vmem:[%s12356_s8 + $0xb68] sm:$0xff]  }
 0x1c3   : > { %10536 = vmatprep.subr.bf16.mxu1 %v11549_v44  ;;  %v11589_v44 = vld [vmem:[%s12356_s8 + $0xbe8] sm:$0xff]  }
 0x1c5   : > { %10515 = vmatpush3.bf16.msra.mxu0 %v11548_v45  ;;  %v11588_v45 = vld [vmem:[%s12356_s8 + $0xb28] sm:$0xff]  }
 0x1c6   : > { %10537 = vmatpush3.bf16.msra.mxu1 %v11550_v46  ;;  %10516 = vmatprep.subr.bf16.mxu0 %v11551_v47  ;;  %v11590_v46 = vld [vmem:[%s12356_s8 + $0xba8] sm:$0xff]   ;;  %v11591_v47 = vld [vmem:[%s12356_s8 + $0xb70] sm:$0xff]  }
 0x1c7   : > { %10538 = vmatprep.subr.bf16.mxu1 %v11553_v48 }
 0x1c9   : > { %10517 = vmatpush3.bf16.msra.mxu0 %v11552_v49 }
 0x1ca   : > { %10539 = vmatpush3.bf16.msra.mxu1 %v11554_v50  ;;  %10518 = vmatprep.subr.bf16.mxu0 %v11555_v51  ;;  %v11592_v50 = vld [vmem:[%s12356_s8 + $0xb30] sm:$0xff]  }
 0x1cb   : > { %v10216_v56 = vpop.f32.mrb[12].mxu0  ;;  %10540 = vmatprep.subr.bf16.mxu1 %v11557_v52  ;;  %v11593_v51 = vld [vmem:[%s12356_s8 + $0xbf0] sm:$0xff]  }
 0x1cc   : > { %v10238_v57 = vpop.f32.mrb[12].mxu1  ;;  %v10217_v60 = vpop.f32.mrb[13].mxu0 }
 0x1cd   : > { %v10239_v61 = vpop.f32.mrb[13].mxu1  ;;  %v10218_v63 = vadd.f32 %v10217_v60, %v10216_v56  ;;  %v10219_v0 = vpop.f32.mrb[14].mxu0  ;;  %10519 = vmatpush3.bf16.msra.mxu0 %v11556_v53  ;;  %v253_v60 = vld [vmem:[%s12349_s29 + $0x58] sm:$0xff] }
 0x1ce   : > { %v10240_v1 = vadd.f32 %v10239_v61, %v10238_v57  ;;  %v10241_v4 = vpop.f32.mrb[14].mxu1  ;;  %v10220_v5 = vpop.f32.mrb[15].mxu0  ;;  %10541 = vmatpush3.bf16.msra.mxu1 %v11558_v54  ;;  %10520 = vmatprep.subr.bf16.mxu0 %v11559_v55  ;;  %v11594_v57 = vld [vmem:[%s12356_s8 + $0xbb0] sm:$0xff]   ;;  %v278_v0 = vmax.f32 %v253_v60, 0.0 }
 0x1cf   : > { %v7477_v7 = vadd.f32 %v10218_v63, %v12724_v20  ;;  %10542 = vmatprep.subr.bf16.mxu1 %v11561_v59  ;;  %v10242_v9 = vpop.f32.mrb[15].mxu1  ;;  %v871_v20 = vpack.c.bf16 %v494_v11, %v494_v11  ;;  %v11595_v59 = vld [vmem:[%s12356_s8 + $0xb78] sm:$0xff]  }
 0x1d0   : > { %v11597_v63 = vld [vmem:[%s12356_s8 + $0xbf8] sm:$0xff]   ;;  %v511_v4 = vrot.slane %v278_v0, %v12403_v43  ;;  %v504_v6 = vcombine.high %v278_v0, %v278_v0 }
 0x1d1   : > { %v12762_v13 = vadd.f32 %v10240_v1, %v7477_v7  ;;  %10521 = vmatpush3.bf16.msra.mxu0 %v11560_v58  ;;  %v11596_v1 = vld [vmem:[%s12356_s8 + $0xb38] sm:$0xff]   ;;  %v11599_v7 = vld [vmem:[%s12356_s8 + $0xc40] sm:$0xff]  }
 0x1d2   : > { %10543 = vmatpush3.bf16.msra.mxu1 %v11562_v62  ;;  %10522 = vmatprep.subr.bf16.mxu0 %v11563_v2  ;;  %v11598_v5 = vld [vmem:[%s12356_s8 + $0xbb8] sm:$0xff]   ;;  %v518_v9 = vrot.slane %v504_v6, %v12403_v43  ;;  %v875_v11 = vpack.c.bf16 %v511_v4, %v511_v4  ;;  %v11632_v6 = vld [vmem:[%s12356_s8 + $0xd00] sm:$0xff]  }
 0x1d3   : > { %10544 = vmatprep.subr.bf16.mxu1 %v11565_v8  ;;  %v519_v8 = vcombine.high %v511_v4, %v511_v4 }
 0x1d5   : > { %10523 = vmatpush3.bf16.msra.mxu0 %v11564_v10  ;;  %v11601_v10 = vld [vmem:[%s12356_s8 + $0xcc0] sm:$0xff]  }
 0x1d6   : > { %10545 = vmatpush3.bf16.msra.mxu1 %v11566_v14  ;;  %10552 = vmatprep.subr.bf16.mxu0 %v11567_v16  ;;  %v520_v14 = vcombine.high %v518_v9, %v518_v9  ;;  %v877_v16 = vpack.c.bf16 %v518_v9, %v518_v9 }
 0x1d7   : > { %10574 = vmatprep.subr.bf16.mxu1 %v11569_v18 }
 0x1d8   : > { %8035 = vmatmul.mubr.bf16.vlgmr.msra.gmra.mrb[40].mxu0 %v871_v20  ;;  %v878_v18 = vpack.c.bf16 %v520_v14, %v520_v14  ;;  %v11605_v20 = vld [vmem:[%s12356_s8 + $0xcc8] sm:$0xff]  }
 0x1d9   : > { %10553 = vmatpush3.bf16.msra.mxu0 %v11568_v22  ;;  %8075 = vmatmul.mubr.bf16.vlgmr.msra.gmra.mrb[40].mxu1 %v873_v23  ;;  %v11607_v22 = vld [vmem:[%s12356_s8 + $0xc50] sm:$0xff]   ;;  %v11638_v14 = vld [vmem:[%s12356_s8 + $0xd88] sm:$0xff]  }
 0x1da   : > { %10575 = vmatpush3.bf16.msra.mxu1 %v11570_v24  ;;  %10554 = vmatprep.subr.bf16.mxu0 %v11571_v26  ;;  %v11608_v23 = vld [vmem:[%s12356_s8 + $0xc10] sm:$0xff]   ;;  %v11611_v26 = vld [vmem:[%s12356_s8 + $0xc58] sm:$0xff]  }
 0x1db   : > { %10576 = vmatprep.subr.bf16.mxu1 %v11573_v27  ;;  %8154 = vmatprep.mubr.bf16.mxu1 %v878_v18  ;;  %v11609_v24 = vld [vmem:[%s12356_s8 + $0xcd0] sm:$0xff]   ;;  %v11612_v27 = vld [vmem:[%s12356_s8 + $0xc18] sm:$0xff]  }
 0x1dc   : > { %v11642_v18 = vld [vmem:[%s12356_s8 + $0xd90] sm:$0xff]  }
 0x1dd   : > { %10555 = vmatpush3.bf16.msra.mxu0 %v11572_v28  ;;  %v11613_v28 = vld [vmem:[%s12356_s8 + $0xcd8] sm:$0xff]  }
 0x1de   : > { %10577 = vmatpush3.bf16.msra.mxu1 %v11574_v29  ;;  %10556 = vmatprep.subr.bf16.mxu0 %v11575_v30  ;;  %v11614_v29 = vld [vmem:[%s12356_s8 + $0xc98] sm:$0xff]   ;;  %v11615_v30 = vld [vmem:[%s12356_s8 + $0xc60] sm:$0xff]  }
 0x1df   : > { %10578 = vmatprep.subr.bf16.mxu1 %v11577_v31  ;;  %v11616_v31 = vld [vmem:[%s12356_s8 + $0xc20] sm:$0xff]  }
 0x1e1   : > { %10557 = vmatpush3.bf16.msra.mxu0 %v11576_v32  ;;  %v11617_v32 = vld [vmem:[%s12356_s8 + $0xce0] sm:$0xff]  }
 0x1e2   : > { %10579 = vmatpush3.bf16.msra.mxu1 %v11578_v33  ;;  %10558 = vmatprep.subr.bf16.mxu0 %v11579_v34  ;;  %v11618_v33 = vld [vmem:[%s12356_s8 + $0xca0] sm:$0xff]   ;;  %v11619_v34 = vld [vmem:[%s12356_s8 + $0xc68] sm:$0xff]  }
 0x1e3   : > { %10580 = vmatprep.subr.bf16.mxu1 %v11581_v35  ;;  %v11620_v35 = vld [vmem:[%s12356_s8 + $0xc28] sm:$0xff]  }
 0x1e5   : > { %10559 = vmatpush3.bf16.msra.mxu0 %v11580_v36  ;;  %v11621_v36 = vld [vmem:[%s12356_s8 + $0xce8] sm:$0xff]  }
 0x1e6   : > { %10581 = vmatpush3.bf16.msra.mxu1 %v11582_v37  ;;  %10560 = vmatprep.subr.bf16.mxu0 %v11583_v38  ;;  %v11622_v37 = vld [vmem:[%s12356_s8 + $0xca8] sm:$0xff]   ;;  %v11623_v38 = vld [vmem:[%s12356_s8 + $0xc70] sm:$0xff]  }
 0x1e7   : > { %10582 = vmatprep.subr.bf16.mxu1 %v11585_v39 }
 0x1e9   : > { %10561 = vmatpush3.bf16.msra.mxu0 %v11584_v40 }
 0x1ea   : > { %10583 = vmatpush3.bf16.msra.mxu1 %v11586_v41  ;;  %10562 = vmatprep.subr.bf16.mxu0 %v11587_v42 }
 0x1eb   : > { %v10260_v48 = vpop.f32.mrb[16].mxu0  ;;  %10584 = vmatprep.subr.bf16.mxu1 %v11589_v44  ;;  %v11624_v44 = vld [vmem:[%s12356_s8 + $0xc30] sm:$0xff]  }
 0x1ec   : > { %v10282_v49 = vpop.f32.mrb[16].mxu1  ;;  %v10261_v52 = vpop.f32.mrb[17].mxu0 }
 0x1ed   : > { %v10283_v53 = vpop.f32.mrb[17].mxu1  ;;  %v10262_v54 = vadd.f32 %v10261_v52, %v10260_v48  ;;  %v10263_v55 = vpop.f32.mrb[18].mxu0  ;;  %10563 = vmatpush3.bf16.msra.mxu0 %v11588_v45  ;;  %v11625_v45 = vld [vmem:[%s12356_s8 + $0xcf0] sm:$0xff]  }
 0x1ee   : > { %v10284_v56 = vadd.f32 %v10283_v53, %v10282_v49  ;;  %v10264_v58 = vpop.f32.mrb[19].mxu0  ;;  %10585 = vmatpush3.bf16.msra.mxu1 %v11590_v46  ;;  %10564 = vmatprep.subr.bf16.mxu0 %v11591_v47  ;;  %v10285_v61 = vpop.f32.mrb[18].mxu1  ;;  %v11626_v49 = vld [vmem:[%s12356_s8 + $0xcb0] sm:$0xff]   ;;  %v254_v53 = vld [vmem:[%s12349_s29 + $0x60] sm:$0xff] }
 0x1ef   : > { %v7557_v62 = vadd.f32 %v10262_v54, %v12762_v13  ;;  %10586 = vmatprep.subr.bf16.mxu1 %v11593_v51  ;;  %v10286_v2 = vpop.f32.mrb[19].mxu1  ;;  %v876_v13 = vpack.c.bf16 %v519_v8, %v519_v8  ;;  %v11627_v51 = vld [vmem:[%s12356_s8 + $0xc78] sm:$0xff]   ;;  %v11631_v61 = vld [vmem:[%s12356_s8 + $0xd40] sm:$0xff]   ;;  %v11635_v8 = vld [vmem:[%s12356_s8 + $0xd48] sm:$0xff]  }
 0x1f0   : > { %v11629_v55 = vld [vmem:[%s12356_s8 + $0xcf8] sm:$0xff]   ;;  %v11633_v2 = vld [vmem:[%s12356_s8 + $0xdc0] sm:$0xff]  }
 0x1f1   : > { %v12799_v3 = vadd.f32 %v10284_v56, %v7557_v62  ;;  %10565 = vmatpush3.bf16.msra.mxu0 %v11592_v50  ;;  %8114 = vmatprep.mubr.bf16.mxu0 %v876_v13  ;;  %v279_v56 = vmax.f32 %v254_v53, 0.0  ;;  %v11628_v58 = vld [vmem:[%s12356_s8 + $0xc38] sm:$0xff]   ;;  %v11639_v13 = vld [vmem:[%s12356_s8 + $0xd50] sm:$0xff]   ;;  %v11663_v53 = vld [vmem:[%s12356_s8 + $0xe40] sm:$0xff]  }
 0x1f2   : > { %10587 = vmatpush3.bf16.msra.mxu1 %v11594_v57  ;;  %10566 = vmatprep.subr.bf16.mxu0 %v11595_v59 }
 0x1f3   : > { %10588 = vmatprep.subr.bf16.mxu1 %v11597_v63  ;;  %v528_v60 = vrot.slane %v279_v56, %v12403_v43  ;;  %v521_v62 = vcombine.high %v279_v56, %v279_v56  ;;  %v11630_v63 = vld [vmem:[%s12356_s8 + $0xcb8] sm:$0xff]  }
 0x1f5   : > { %10567 = vmatpush3.bf16.msra.mxu0 %v11596_v1  ;;  %v536_v0 = vcombine.high %v528_v60, %v528_v60  ;;  %v535_v1 = vrot.slane %v521_v62, %v12403_v43 }
 0x1f6   : > { %10589 = vmatpush3.bf16.msra.mxu1 %v11598_v5  ;;  %10596 = vmatprep.subr.bf16.mxu0 %v11599_v7 }
 0x1f7   : > { %10618 = vmatprep.subr.bf16.mxu1 %v11601_v10  ;;  %v880_v4 = vpack.c.bf16 %v536_v0, %v536_v0  ;;  %v537_v5 = vcombine.high %v535_v1, %v535_v1  ;;  %v881_v7 = vpack.c.bf16 %v535_v1, %v535_v1  ;;  %v11634_v10 = vld [vmem:[%s12356_s8 + $0xd80] sm:$0xff]   ;;  %v11667_v1 = vld [vmem:[%s12356_s8 + $0xe48] sm:$0xff]  }
 0x1f8   : > { %8115 = vmatmul.mubr.bf16.vlgmr.msra.gmra.mrb[44].mxu0 %v875_v11  ;;  %v11637_v11 = vld [vmem:[%s12356_s8 + $0xdc8] sm:$0xff]  }
 0x1f9   : > { %10597 = vmatpush3.bf16.msra.mxu0 %v11600_v12  ;;  %8155 = vmatmul.mubr.bf16.vlgmr.msra.gmra.mrb[44].mxu1 %v877_v16  ;;  %v882_v9 = vpack.c.bf16 %v537_v5, %v537_v5  ;;  %v11636_v12 = vld [vmem:[%s12356_s8 + $0xd08] sm:$0xff]   ;;  %v11640_v16 = vld [vmem:[%s12356_s8 + $0xd10] sm:$0xff]  }
 0x1fa   : > { %10598 = vmatprep.subr.bf16.mxu0 %v11603_v17  ;;  %10619 = vmatpush3.bf16.msra.mxu1 %v11602_v15  ;;  %v11641_v15 = vld [vmem:[%s12356_s8 + $0xdd0] sm:$0xff]   ;;  %v11643_v17 = vld [vmem:[%s12356_s8 + $0xd58] sm:$0xff]   ;;  %v11670_v5 = vld [vmem:[%s12356_s8 + $0xe88] sm:$0xff]  }
 0x1fb   : > { %10620 = vmatprep.subr.bf16.mxu1 %v11605_v20  ;;  %8194 = vmatprep.mubr.bf16.mxu0 %v880_v4  ;;  %v11644_v20 = vld [vmem:[%s12356_s8 + $0xd18] sm:$0xff]   ;;  %v11669_v4 = vld [vmem:[%s12356_s8 + $0xec8] sm:$0xff]  }
 0x1fc   : > { %8234 = vmatprep.mubr.bf16.mxu1 %v882_v9  ;;  %v11674_v9 = vld [vmem:[%s12356_s8 + $0xe90] sm:$0xff]  }
 0x1fd   : > { %10599 = vmatpush3.bf16.msra.mxu0 %v11604_v19  ;;  %v11645_v19 = vld [vmem:[%s12356_s8 + $0xdd8] sm:$0xff]  }
 0x1fe   : > { %10600 = vmatprep.subr.bf16.mxu0 %v11607_v22  ;;  %10621 = vmatpush3.bf16.msra.mxu1 %v11606_v21  ;;  %v11647_v21 = vld [vmem:[%s12356_s8 + $0xd60] sm:$0xff]   ;;  %v11646_v22 = vld [vmem:[%s12356_s8 + $0xd98] sm:$0xff]  }
 0x1ff   : > { %10622 = vmatprep.subr.bf16.mxu1 %v11609_v24  ;;  %v11648_v24 = vld [vmem:[%s12356_s8 + $0xd20] sm:$0xff]  }
 0x201   : > { %10601 = vmatpush3.bf16.msra.mxu0 %v11608_v23  ;;  %v11649_v23 = vld [vmem:[%s12356_s8 + $0xde0] sm:$0xff]  }
 0x202   : > { %10602 = vmatprep.subr.bf16.mxu0 %v11611_v26  ;;  %10623 = vmatpush3.bf16.msra.mxu1 %v11610_v25  ;;  %v11651_v25 = vld [vmem:[%s12356_s8 + $0xd68] sm:$0xff]   ;;  %v11650_v26 = vld [vmem:[%s12356_s8 + $0xda0] sm:$0xff]  }
 0x203   : > { %10624 = vmatprep.subr.bf16.mxu1 %v11613_v28  ;;  %v11652_v28 = vld [vmem:[%s12356_s8 + $0xd28] sm:$0xff]  }
 0x205   : > { %10603 = vmatpush3.bf16.msra.mxu0 %v11612_v27  ;;  %v11653_v27 = vld [vmem:[%s12356_s8 + $0xde8] sm:$0xff]  }
 0x206   : > { %10604 = vmatprep.subr.bf16.mxu0 %v11615_v30  ;;  %10625 = vmatpush3.bf16.msra.mxu1 %v11614_v29 }
 0x207   : > { %10626 = vmatprep.subr.bf16.mxu1 %v11617_v32  ;;  %v11655_v32 = vld [vmem:[%s12356_s8 + $0xd70] sm:$0xff]  }
 0x209   : > { %10605 = vmatpush3.bf16.msra.mxu0 %v11616_v31  ;;  %v11654_v31 = vld [vmem:[%s12356_s8 + $0xda8] sm:$0xff]  }
 0x20a   : > { %10606 = vmatprep.subr.bf16.mxu0 %v11619_v34  ;;  %10627 = vmatpush3.bf16.msra.mxu1 %v11618_v33 }
 0x20b   : > { %v10304_v39 = vpop.f32.mrb[20].mxu0  ;;  %10628 = vmatprep.subr.bf16.mxu1 %v11621_v36 }
 0x20c   : > { %v10326_v40 = vpop.f32.mrb[20].mxu1  ;;  %v10305_v41 = vpop.f32.mrb[21].mxu0 }
 0x20d   : > { %v10327_v42 = vpop.f32.mrb[21].mxu1  ;;  %v10306_v46 = vadd.f32 %v10305_v41, %v10304_v39  ;;  %v10307_v47 = vpop.f32.mrb[22].mxu0  ;;  %10607 = vmatpush3.bf16.msra.mxu0 %v11620_v35  ;;  %v11656_v35 = vld [vmem:[%s12356_s8 + $0xd30] sm:$0xff]  }
 0x20e   : > { %v10328_v48 = vadd.f32 %v10327_v42, %v10326_v40  ;;  %v10308_v50 = vpop.f32.mrb[23].mxu0  ;;  %10608 = vmatprep.subr.bf16.mxu0 %v11623_v38  ;;  %10629 = vmatpush3.bf16.msra.mxu1 %v11622_v37  ;;  %v10329_v54 = vpop.f32.mrb[22].mxu1  ;;  %v11657_v39 = vld [vmem:[%s12356_s8 + $0xdf0] sm:$0xff]  }
 0x20f   : > { %v7637_v52 = vadd.f32 %v10306_v46, %v12799_v3  ;;  %10630 = vmatprep.subr.bf16.mxu1 %v11625_v45  ;;  %v10330_v59 = vpop.f32.mrb[23].mxu1  ;;  %v879_v3 = vpack.c.bf16 %v528_v60, %v528_v60  ;;  %v11658_v41 = vld [vmem:[%s12356_s8 + $0xdb0] sm:$0xff]   ;;  %v255_v46 = vld [vmem:[%s12349_s29 + $0x68] sm:$0xff] }
 0x210   : > { %v280_v50 = vmax.f32 %v255_v46, 0.0  ;;  %v11664_v60 = vld [vmem:[%s12356_s8 + $0xe00] sm:$0xff]  }
 0x211   : > { %v12836_v57 = vadd.f32 %v10328_v48, %v7637_v52  ;;  %10609 = vmatpush3.bf16.msra.mxu0 %v11624_v44  ;;  %v11659_v44 = vld [vmem:[%s12356_s8 + $0xd78] sm:$0xff]  }
 0x212   : > { %10610 = vmatprep.subr.bf16.mxu0 %v11627_v51  ;;  %10631 = vmatpush3.bf16.msra.mxu1 %v11626_v49  ;;  %v11661_v49 = vld [vmem:[%s12356_s8 + $0xdf8] sm:$0xff]   ;;  %v545_v52 = vrot.slane %v280_v50, %v12403_v43  ;;  %v538_v54 = vcombine.high %v280_v50, %v280_v50  ;;  %v11696_v50 = vld [vmem:[%s12356_s8 + $0xf00] sm:$0xff]  }
 0x213   : > { %10632 = vmatprep.subr.bf16.mxu1 %v11629_v55  ;;  %v11660_v51 = vld [vmem:[%s12356_s8 + $0xd38] sm:$0xff]  }
 0x214   : > { %v11662_v55 = vld [vmem:[%s12356_s8 + $0xdb8] sm:$0xff]   ;;  %v553_v56 = vcombine.high %v545_v52, %v545_v52  ;;  %v883_v59 = vpack.c.bf16 %v545_v52, %v545_v52  ;;  %v11697_v52 = vld [vmem:[%s12356_s8 + $0xfc0] sm:$0xff]  }
 0x215   : > { %10611 = vmatpush3.bf16.msra.mxu0 %v11628_v58  ;;  %v11665_v58 = vld [vmem:[%s12356_s8 + $0xec0] sm:$0xff]  }
 0x216   : > { %10640 = vmatprep.subr.bf16.mxu0 %v11631_v61  ;;  %10633 = vmatpush3.bf16.msra.mxu1 %v11630_v63  ;;  %v884_v61 = vpack.c.bf16 %v553_v56, %v553_v56  ;;  %v11666_v63 = vld [vmem:[%s12356_s8 + $0xe80] sm:$0xff]  }
 0x217   : > { %10662 = vmatprep.subr.bf16.mxu1 %v11633_v2 }
 0x218   : > { %8195 = vmatmul.mubr.bf16.vlgmr.msra.gmra.mrb[48].mxu0 %v879_v3  ;;  %v11668_v3 = vld [vmem:[%s12356_s8 + $0xe08] sm:$0xff]  }
 0x219   : > { %10641 = vmatpush3.bf16.msra.mxu0 %v11632_v6  ;;  %8235 = vmatmul.mubr.bf16.vlgmr.msra.gmra.mrb[48].mxu1 %v881_v7  ;;  %v11671_v6 = vld [vmem:[%s12356_s8 + $0xe50] sm:$0xff]  }
 0x21a   : > { %10642 = vmatprep.subr.bf16.mxu0 %v11635_v8  ;;  %10663 = vmatpush3.bf16.msra.mxu1 %v11634_v10  ;;  %v11672_v7 = vld [vmem:[%s12356_s8 + $0xe10] sm:$0xff]   ;;  %v11675_v10 = vld [vmem:[%s12356_s8 + $0xe58] sm:$0xff]  }
 0x21b   : > { %10664 = vmatprep.subr.bf16.mxu1 %v11637_v11  ;;  %8274 = vmatprep.mubr.bf16.mxu0 %v884_v61  ;;  %v11673_v8 = vld [vmem:[%s12356_s8 + $0xed0] sm:$0xff]   ;;  %v11676_v11 = vld [vmem:[%s12356_s8 + $0xe18] sm:$0xff]   ;;  %v11702_v61 = vld [vmem:[%s12356_s8 + $0xf88] sm:$0xff]  }
 0x21d   : > { %10643 = vmatpush3.bf16.msra.mxu0 %v11636_v12  ;;  %v11677_v12 = vld [vmem:[%s12356_s8 + $0xed8] sm:$0xff]  }
 0x21e   : > { %10644 = vmatprep.subr.bf16.mxu0 %v11639_v13  ;;  %10665 = vmatpush3.bf16.msra.mxu1 %v11638_v14  ;;  %v11678_v13 = vld [vmem:[%s12356_s8 + $0xe98] sm:$0xff]   ;;  %v11679_v14 = vld [vmem:[%s12356_s8 + $0xe60] sm:$0xff]  }
 0x21f   : > { %10666 = vmatprep.subr.bf16.mxu1 %v11641_v15  ;;  %v11680_v15 = vld [vmem:[%s12356_s8 + $0xe20] sm:$0xff]  }
 0x221   : > { %10645 = vmatpush3.bf16.msra.mxu0 %v11640_v16  ;;  %v11681_v16 = vld [vmem:[%s12356_s8 + $0xee0] sm:$0xff]  }
 0x222   : > { %10646 = vmatprep.subr.bf16.mxu0 %v11643_v17  ;;  %10667 = vmatpush3.bf16.msra.mxu1 %v11642_v18  ;;  %v11682_v17 = vld [vmem:[%s12356_s8 + $0xea0] sm:$0xff]   ;;  %v11683_v18 = vld [vmem:[%s12356_s8 + $0xe68] sm:$0xff]  }
 0x223   : > { %10668 = vmatprep.subr.bf16.mxu1 %v11645_v19  ;;  %v11684_v19 = vld [vmem:[%s12356_s8 + $0xe28] sm:$0xff]  }
 0x225   : > { %10647 = vmatpush3.bf16.msra.mxu0 %v11644_v20  ;;  %v11685_v20 = vld [vmem:[%s12356_s8 + $0xee8] sm:$0xff]  }
 0x226   : > { %10648 = vmatprep.subr.bf16.mxu0 %v11647_v21  ;;  %10669 = vmatpush3.bf16.msra.mxu1 %v11646_v22 }
 0x227   : > { %10670 = vmatprep.subr.bf16.mxu1 %v11649_v23  ;;  %v11686_v23 = vld [vmem:[%s12356_s8 + $0xea8] sm:$0xff]  }
 0x229   : > { %10649 = vmatpush3.bf16.msra.mxu0 %v11648_v24  ;;  %v11687_v24 = vld [vmem:[%s12356_s8 + $0xe70] sm:$0xff]  }
 0x22a   : > { %10650 = vmatprep.subr.bf16.mxu0 %v11651_v25  ;;  %10671 = vmatpush3.bf16.msra.mxu1 %v11650_v26 }
 0x22b   : > { %v10348_v29 = vpop.f32.mrb[24].mxu0  ;;  %10672 = vmatprep.subr.bf16.mxu1 %v11653_v27 }
 0x22c   : > { %v10370_v30 = vpop.f32.mrb[24].mxu1  ;;  %v10349_v33 = vpop.f32.mrb[25].mxu0 }
 0x22d   : > { %v10371_v34 = vpop.f32.mrb[25].mxu1  ;;  %v10350_v36 = vadd.f32 %v10349_v33, %v10348_v29  ;;  %v10351_v37 = vpop.f32.mrb[26].mxu0  ;;  %10651 = vmatpush3.bf16.msra.mxu0 %v11652_v28 }
 0x22e   : > { %v10372_v38 = vadd.f32 %v10371_v34, %v10370_v30  ;;  %v10352_v40 = vpop.f32.mrb[27].mxu0  ;;  %10652 = vmatprep.subr.bf16.mxu0 %v11655_v32  ;;  %v10373_v45 = vpop.f32.mrb[26].mxu1  ;;  %10673 = vmatpush3.bf16.msra.mxu1 %v11654_v31  ;;  %v11688_v30 = vld [vmem:[%s12356_s8 + $0xe30] sm:$0xff]  }
 0x22f   : > { %v7717_v42 = vadd.f32 %v10350_v36, %v12836_v57  ;;  %v10374_v47 = vpop.f32.mrb[27].mxu1  ;;  %10674 = vmatprep.subr.bf16.mxu1 %v11657_v39  ;;  %v552_v57 = vrot.slane %v538_v54, %v12403_v43  ;;  %v11689_v32 = vld [vmem:[%s12356_s8 + $0xef0] sm:$0xff]   ;;  %v11691_v36 = vld [vmem:[%s12356_s8 + $0xe78] sm:$0xff]  }
 0x230   : > { %v11690_v34 = vld [vmem:[%s12356_s8 + $0xeb0] sm:$0xff]   ;;  %v11692_v40 = vld [vmem:[%s12356_s8 + $0xe38] sm:$0xff]   ;;  %v11695_v47 = vld [vmem:[%s12356_s8 + $0xf40] sm:$0xff]  }
 0x231   : > { %v12873_v48 = vadd.f32 %v10372_v38, %v7717_v42  ;;  %10653 = vmatpush3.bf16.msra.mxu0 %v11656_v35  ;;  %v554_v62 = vcombine.high %v552_v57, %v552_v57  ;;  %v885_v0 = vpack.c.bf16 %v552_v57, %v552_v57  ;;  %v256_v37 = vld [vmem:[%s12349_s29 + $0x70] sm:$0xff]  ;;  %v11693_v42 = vld [vmem:[%s12356_s8 + $0xef8] sm:$0xff]  }
 0x232   : > { %10654 = vmatprep.subr.bf16.mxu0 %v11659_v44  ;;  %10675 = vmatpush3.bf16.msra.mxu1 %v11658_v41  ;;  %v281_v41 = vmax.f32 %v256_v37, 0.0  ;;  %v11694_v45 = vld [vmem:[%s12356_s8 + $0xeb8] sm:$0xff]   ;;  %v11699_v57 = vld [vmem:[%s12356_s8 + $0xf48] sm:$0xff]  }
 0x233   : > { %10676 = vmatprep.subr.bf16.mxu1 %v11661_v49  ;;  %v886_v2 = vpack.c.bf16 %v554_v62, %v554_v62  ;;  %v11703_v62 = vld [vmem:[%s12356_s8 + $0xf50] sm:$0xff]  }
 0x234   : > { %v562_v44 = vrot.slane %v281_v41, %v12403_v43  ;;  %v555_v46 = vcombine.high %v281_v41, %v281_v41  ;;  %v11729_v41 = vld [vmem:[%s12356_s8 + $0x10c0] sm:$0xff]  }
 0x235   : > { %10655 = vmatpush3.bf16.msra.mxu0 %v11660_v51  ;;  %8314 = vmatprep.mubr.bf16.mxu1 %v886_v2  ;;  %v11707_v2 = vld [vmem:[%s12356_s8 + $0xf58] sm:$0xff]  }
 0x236   : > { %10684 = vmatprep.subr.bf16.mxu0 %v11663_v53  ;;  %10677 = vmatpush3.bf16.msra.mxu1 %v11662_v55  ;;  %v569_v49 = vrot.slane %v555_v46, %v12403_v43  ;;  %v887_v51 = vpack.c.bf16 %v562_v44, %v562_v44  ;;  %v11698_v55 = vld [vmem:[%s12356_s8 + $0xf80] sm:$0xff]  }
 0x237   : > { %10706 = vmatprep.subr.bf16.mxu1 %v11665_v58 }
 0x238   : > { %8275 = vmatmul.mubr.bf16.vlgmr.msra.gmra.mrb[52].mxu0 %v883_v59  ;;  %v571_v54 = vcombine.high %v569_v49, %v569_v49  ;;  %v889_v56 = vpack.c.bf16 %v569_v49, %v569_v49  ;;  %v11700_v59 = vld [vmem:[%s12356_s8 + $0xf08] sm:$0xff]  }
 0x239   : > { %10685 = vmatpush3.bf16.msra.mxu0 %v11664_v60  ;;  %8315 = vmatmul.mubr.bf16.vlgmr.msra.gmra.mrb[52].mxu1 %v885_v0  ;;  %v11701_v60 = vld [vmem:[%s12356_s8 + $0xfc8] sm:$0xff]   ;;  %v11705_v0 = vld [vmem:[%s12356_s8 + $0xfd0] sm:$0xff]  }
 0x23a   : > { %10686 = vmatprep.subr.bf16.mxu0 %v11667_v1  ;;  %10707 = vmatpush3.bf16.msra.mxu1 %v11666_v63  ;;  %v890_v58 = vpack.c.bf16 %v571_v54, %v571_v54  ;;  %v11704_v63 = vld [vmem:[%s12356_s8 + $0xf10] sm:$0xff]   ;;  %v11731_v49 = vld [vmem:[%s12356_s8 + $0x1048] sm:$0xff]  }
 0x23b   : > { %10708 = vmatprep.subr.bf16.mxu1 %v11669_v4  ;;  %v11706_v1 = vld [vmem:[%s12356_s8 + $0xf90] sm:$0xff]   ;;  %v11709_v4 = vld [vmem:[%s12356_s8 + $0xfd8] sm:$0xff]  }
 0x23c   : > { %8394 = vmatprep.mubr.bf16.mxu1 %v890_v58  ;;  %v11735_v54 = vld [vmem:[%s12356_s8 + $0x1050] sm:$0xff]   ;;  %v11739_v58 = vld [vmem:[%s12356_s8 + $0x1058] sm:$0xff]  }
 0x23d   : > { %10687 = vmatpush3.bf16.msra.mxu0 %v11668_v3  ;;  %v11708_v3 = vld [vmem:[%s12356_s8 + $0xf18] sm:$0xff]  }
 0x23e   : > { %10688 = vmatprep.subr.bf16.mxu0 %v11671_v6  ;;  %10709 = vmatpush3.bf16.msra.mxu1 %v11670_v5  ;;  %v11710_v5 = vld [vmem:[%s12356_s8 + $0xf98] sm:$0xff]   ;;  %v11711_v6 = vld [vmem:[%s12356_s8 + $0xf60] sm:$0xff]  }
 0x23f   : > { %10710 = vmatprep.subr.bf16.mxu1 %v11673_v8  ;;  %v11713_v8 = vld [vmem:[%s12356_s8 + $0xfe0] sm:$0xff]  }
 0x241   : > { %10689 = vmatpush3.bf16.msra.mxu0 %v11672_v7  ;;  %v11712_v7 = vld [vmem:[%s12356_s8 + $0xf20] sm:$0xff]  }
 0x242   : > { %10690 = vmatprep.subr.bf16.mxu0 %v11675_v10  ;;  %10711 = vmatpush3.bf16.msra.mxu1 %v11674_v9  ;;  %v11714_v9 = vld [vmem:[%s12356_s8 + $0xfa0] sm:$0xff]   ;;  %v11715_v10 = vld [vmem:[%s12356_s8 + $0xf68] sm:$0xff]  }
 0x243   : > { %10712 = vmatprep.subr.bf16.mxu1 %v11677_v12  ;;  %v11717_v12 = vld [vmem:[%s12356_s8 + $0xfe8] sm:$0xff]  }
 0x245   : > { %10691 = vmatpush3.bf16.msra.mxu0 %v11676_v11  ;;  %v11716_v11 = vld [vmem:[%s12356_s8 + $0xf28] sm:$0xff]  }
 0x246   : > { %10692 = vmatprep.subr.bf16.mxu0 %v11679_v14  ;;  %10713 = vmatpush3.bf16.msra.mxu1 %v11678_v13  ;;  %v11719_v14 = vld [vmem:[%s12356_s8 + $0xf70] sm:$0xff]  }
 0x247   : > { %10714 = vmatprep.subr.bf16.mxu1 %v11681_v16 }
 0x249   : > { %10693 = vmatpush3.bf16.msra.mxu0 %v11680_v15 }
 0x24a   : > { %10694 = vmatprep.subr.bf16.mxu0 %v11683_v18  ;;  %10715 = vmatpush3.bf16.msra.mxu1 %v11682_v17 }
 0x24b   : > { %v10392_v21 = vpop.f32.mrb[28].mxu0  ;;  %10716 = vmatprep.subr.bf16.mxu1 %v11685_v20  ;;  %v11718_v20 = vld [vmem:[%s12356_s8 + $0xfa8] sm:$0xff]  }
 0x24c   : > { %v10414_v22 = vpop.f32.mrb[28].mxu1  ;;  %v10393_v25 = vpop.f32.mrb[29].mxu0 }
 0x24d   : > { %v10415_v26 = vpop.f32.mrb[29].mxu1  ;;  %v10394_v27 = vadd.f32 %v10393_v25, %v10392_v21  ;;  %v10395_v28 = vpop.f32.mrb[30].mxu0  ;;  %10695 = vmatpush3.bf16.msra.mxu0 %v11684_v19  ;;  %v11720_v21 = vld [vmem:[%s12356_s8 + $0xf30] sm:$0xff]  }
 0x24e   : > { %v10416_v29 = vadd.f32 %v10415_v26, %v10414_v22  ;;  %v10396_v31 = vpop.f32.mrb[31].mxu0  ;;  %v10417_v35 = vpop.f32.mrb[30].mxu1  ;;  %10696 = vmatprep.subr.bf16.mxu0 %v11687_v24  ;;  %10717 = vmatpush3.bf16.msra.mxu1 %v11686_v23  ;;  %v11721_v24 = vld [vmem:[%s12356_s8 + $0xff0] sm:$0xff]   ;;  %v11723_v26 = vld [vmem:[%s12356_s8 + $0xf78] sm:$0xff]  }
 0x24f   : > { %v7797_v33 = vadd.f32 %v10394_v27, %v12873_v48  ;;  %v10418_v38 = vpop.f32.mrb[31].mxu1  ;;  %10718 = vmatprep.subr.bf16.mxu1 %v11689_v32  ;;  %v570_v48 = vcombine.high %v562_v44, %v562_v44  ;;  %v11725_v32 = vld [vmem:[%s12356_s8 + $0xff8] sm:$0xff]   ;;  %v11728_v44 = vld [vmem:[%s12356_s8 + $0x1000] sm:$0xff]  }
 0x250   : > { %v11726_v38 = vld [vmem:[%s12356_s8 + $0xfb8] sm:$0xff]  }
 0x251   : > { %v12911_v39 = vadd.f32 %v10416_v29, %v7797_v33  ;;  %10697 = vmatpush3.bf16.msra.mxu0 %v11688_v30  ;;  %v888_v53 = vpack.c.bf16 %v570_v48, %v570_v48  ;;  %v11722_v29 = vld [vmem:[%s12356_s8 + $0xfb0] sm:$0xff]  }
 0x252   : > { %10698 = vmatprep.subr.bf16.mxu0 %v11691_v36  ;;  %10719 = vmatpush3.bf16.msra.mxu1 %v11690_v34  ;;  %v257_v30 = vld [vmem:[%s12349_s29 + $0x78] sm:$0xff]  ;;  %v11727_v36 = vld [vmem:[%s12356_s8 + $0x1040] sm:$0xff]  }
 0x253   : > { %10720 = vmatprep.subr.bf16.mxu1 %v11693_v42  ;;  %8354 = vmatprep.mubr.bf16.mxu0 %v888_v53  ;;  %v282_v33 = vmax.f32 %v257_v30, 0.0  ;;  %v11724_v34 = vld [vmem:[%s12356_s8 + $0xf38] sm:$0xff]   ;;  %v11734_v53 = vld [vmem:[%s12356_s8 + $0x1088] sm:$0xff]  }
 0x254   : > { %v11758_v30 = vld [vmem:[%s12356_s8 + $0x10b8] sm:$0xff]  }
 0x255   : > { %10699 = vmatpush3.bf16.msra.mxu0 %v11692_v40  ;;  %v579_v35 = vrot.slane %v282_v33, %v12403_v43  ;;  %v572_v37 = vcombine.high %v282_v33, %v282_v33  ;;  %v11761_v33 = vld [vmem:[%s12356_s8 + $0x11c0] sm:$0xff]  }
 0x256   : > { %10728 = vmatprep.subr.bf16.mxu0 %v11695_v47  ;;  %10721 = vmatpush3.bf16.msra.mxu1 %v11694_v45  ;;  %v11730_v47 = vld [vmem:[%s12356_s8 + $0x1080] sm:$0xff]  }
 0x257   : > { %10750 = vmatprep.subr.bf16.mxu1 %v11697_v52  ;;  %v586_v40 = vrot.slane %v572_v37, %v12403_v43  ;;  %v891_v42 = vpack.c.bf16 %v579_v35, %v579_v35  ;;  %v11733_v52 = vld [vmem:[%s12356_s8 + $0x10c8] sm:$0xff]   ;;  %v11760_v37 = vld [vmem:[%s12356_s8 + $0x1100] sm:$0xff]  }
 0x258   : > { %8355 = vmatmul.mubr.bf16.vlgmr.msra.gmra.mrb[56].mxu0 %v887_v51  ;;  %v11732_v51 = vld [vmem:[%s12356_s8 + $0x1008] sm:$0xff]  }
 0x259   : > { %10729 = vmatpush3.bf16.msra.mxu0 %v11696_v50  ;;  %8395 = vmatmul.mubr.bf16.vlgmr.msra.gmra.mrb[56].mxu1 %v889_v56  ;;  %v588_v46 = vcombine.high %v586_v40, %v586_v40  ;;  %v893_v48 = vpack.c.bf16 %v586_v40, %v586_v40  ;;  %v11737_v56 = vld [vmem:[%s12356_s8 + $0x10d0] sm:$0xff]  }
 0x25a   : > { %10730 = vmatprep.subr.bf16.mxu0 %v11699_v57  ;;  %10751 = vmatpush3.bf16.msra.mxu1 %v11698_v55  ;;  %v11736_v55 = vld [vmem:[%s12356_s8 + $0x1010] sm:$0xff]  }
 0x25b   : > { %10752 = vmatprep.subr.bf16.mxu1 %v11701_v60  ;;  %v894_v50 = vpack.c.bf16 %v588_v46, %v588_v46  ;;  %v11738_v57 = vld [vmem:[%s12356_s8 + $0x1090] sm:$0xff]   ;;  %v11741_v60 = vld [vmem:[%s12356_s8 + $0x10d8] sm:$0xff]   ;;  %v11766_v46 = vld [vmem:[%s12356_s8 + $0x1188] sm:$0xff]  }
 0x25d   : > { %10731 = vmatpush3.bf16.msra.mxu0 %v11700_v59  ;;  %8474 = vmatprep.mubr.bf16.mxu1 %v894_v50  ;;  %v11740_v59 = vld [vmem:[%s12356_s8 + $0x1018] sm:$0xff]   ;;  %v11770_v50 = vld [vmem:[%s12356_s8 + $0x1190] sm:$0xff]  }
 0x25e   : > { %10732 = vmatprep.subr.bf16.mxu0 %v11703_v62  ;;  %10753 = vmatpush3.bf16.msra.mxu1 %v11702_v61  ;;  %v11742_v61 = vld [vmem:[%s12356_s8 + $0x1098] sm:$0xff]   ;;  %v11743_v62 = vld [vmem:[%s12356_s8 + $0x1060] sm:$0xff]  }
 0x25f   : > { %10754 = vmatprep.subr.bf16.mxu1 %v11705_v0  ;;  %v11745_v0 = vld [vmem:[%s12356_s8 + $0x10e0] sm:$0xff]  }
 0x261   : > { %10733 = vmatpush3.bf16.msra.mxu0 %v11704_v63  ;;  %v11744_v63 = vld [vmem:[%s12356_s8 + $0x1020] sm:$0xff]  }
 0x262   : > { %10734 = vmatprep.subr.bf16.mxu0 %v11707_v2  ;;  %10755 = vmatpush3.bf16.msra.mxu1 %v11706_v1  ;;  %v11746_v1 = vld [vmem:[%s12356_s8 + $0x10a0] sm:$0xff]   ;;  %v11747_v2 = vld [vmem:[%s12356_s8 + $0x1068] sm:$0xff]  }
 0x263   : > { %10756 = vmatprep.subr.bf16.mxu1 %v11709_v4 }
 0x265   : > { %10735 = vmatpush3.bf16.msra.mxu0 %v11708_v3  ;;  %v11748_v3 = vld [vmem:[%s12356_s8 + $0x1028] sm:$0xff]  }
 0x266   : > { %10736 = vmatprep.subr.bf16.mxu0 %v11711_v6  ;;  %10757 = vmatpush3.bf16.msra.mxu1 %v11710_v5  ;;  %v11749_v5 = vld [vmem:[%s12356_s8 + $0x10e8] sm:$0xff]  }
 0x267   : > { %10758 = vmatprep.subr.bf16.mxu1 %v11713_v8  ;;  %v11750_v8 = vld [vmem:[%s12356_s8 + $0x10a8] sm:$0xff]  }
 0x269   : > { %10737 = vmatpush3.bf16.msra.mxu0 %v11712_v7 }
 0x26a   : > { %10738 = vmatprep.subr.bf16.mxu0 %v11715_v10  ;;  %10759 = vmatpush3.bf16.msra.mxu1 %v11714_v9  ;;  %v11751_v9 = vld [vmem:[%s12356_s8 + $0x1070] sm:$0xff]  }
 0x26b   : > { %v10436_v13 = vpop.f32.mrb[32].mxu0  ;;  %10760 = vmatprep.subr.bf16.mxu1 %v11717_v12 }
 0x26c   : > { %v10437_v15 = vpop.f32.mrb[33].mxu0  ;;  %v10458_v16 = vpop.f32.mrb[32].mxu1 }
 0x26d   : > { %v10438_v17 = vadd.f32 %v10437_v15, %v10436_v13  ;;  %v10439_v18 = vpop.f32.mrb[34].mxu0  ;;  %v10459_v19 = vpop.f32.mrb[33].mxu1  ;;  %10739 = vmatpush3.bf16.msra.mxu0 %v11716_v11  ;;  %v11752_v15 = vld [vmem:[%s12356_s8 + $0x1030] sm:$0xff]  }
 0x26e   : > { %v10440_v22 = vpop.f32.mrb[35].mxu0  ;;  %v10460_v23 = vadd.f32 %v10459_v19, %v10458_v16  ;;  %10740 = vmatprep.subr.bf16.mxu0 %v11719_v14  ;;  %v10461_v27 = vpop.f32.mrb[34].mxu1  ;;  %10761 = vmatpush3.bf16.msra.mxu1 %v11718_v20  ;;  %v11754_v19 = vld [vmem:[%s12356_s8 + $0x10b0] sm:$0xff]  }
 0x26f   : > { %v7877_v25 = vadd.f32 %v10438_v17, %v12911_v39  ;;  %v10462_v31 = vpop.f32.mrb[35].mxu1  ;;  %10762 = vmatprep.subr.bf16.mxu1 %v11721_v24  ;;  %v587_v39 = vcombine.high %v579_v35, %v579_v35  ;;  %v11753_v17 = vld [vmem:[%s12356_s8 + $0x10f0] sm:$0xff]   ;;  %v11755_v22 = vld [vmem:[%s12356_s8 + $0x1078] sm:$0xff]  }
 0x270   : > { %v11757_v24 = vld [vmem:[%s12356_s8 + $0x10f8] sm:$0xff]  }
 0x271   : > { %v12947_v28 = vadd.f32 %v10460_v23, %v7877_v25  ;;  %10741 = vmatpush3.bf16.msra.mxu0 %v11720_v21  ;;  %v892_v45 = vpack.c.bf16 %v587_v39, %v587_v39  ;;  %v258_v23 = vld [vmem:[%s12349_s29 + $0x80] sm:$0xff]  ;;  %v11763_v39 = vld [vmem:[%s12356_s8 + $0x1148] sm:$0xff]  }
 0x272   : > { %10742 = vmatprep.subr.bf16.mxu0 %v11723_v26  ;;  %10763 = vmatpush3.bf16.msra.mxu1 %v11722_v29  ;;  %v283_v25 = vmax.f32 %v258_v23, 0.0  ;;  %v11756_v26 = vld [vmem:[%s12356_s8 + $0x1038] sm:$0xff]  }
 0x273   : > { %10764 = vmatprep.subr.bf16.mxu1 %v11725_v32  ;;  %8434 = vmatprep.mubr.bf16.mxu0 %v892_v45  ;;  %v11767_v45 = vld [vmem:[%s12356_s8 + $0x1150] sm:$0xff]  }
 0x274   : > { %v596_v27 = vrot.slane %v283_v25, %v12403_v43  ;;  %v589_v29 = vcombine.high %v283_v25, %v283_v25  ;;  %v11792_v25 = vld [vmem:[%s12356_s8 + $0x1200] sm:$0xff]  }
 0x275   : > { %10743 = vmatpush3.bf16.msra.mxu0 %v11724_v34 }
 0x276   : > { %10772 = vmatprep.subr.bf16.mxu0 %v11727_v36  ;;  %10765 = vmatpush3.bf16.msra.mxu1 %v11726_v38  ;;  %v604_v31 = vcombine.high %v596_v27, %v596_v27  ;;  %v603_v32 = vrot.slane %v589_v29, %v12403_v43  ;;  %v895_v34 = vpack.c.bf16 %v596_v27, %v596_v27  ;;  %v11793_v27 = vld [vmem:[%s12356_s8 + $0x12c0] sm:$0xff]  }
 0x277   : > { %10794 = vmatprep.subr.bf16.mxu1 %v11729_v41  ;;  %v11762_v41 = vld [vmem:[%s12356_s8 + $0x1180] sm:$0xff]  }
 0x278   : > { %8435 = vmatmul.mubr.bf16.vlgmr.msra.gmra.mrb[60].mxu0 %v891_v42  ;;  %v896_v35 = vpack.c.bf16 %v604_v31, %v604_v31  ;;  %v605_v36 = vcombine.high %v603_v32, %v603_v32  ;;  %v897_v38 = vpack.c.bf16 %v603_v32, %v603_v32  ;;  %v11765_v42 = vld [vmem:[%s12356_s8 + $0x11c8] sm:$0xff]  }
 0x279   : > { %10773 = vmatpush3.bf16.msra.mxu0 %v11728_v44  ;;  %8475 = vmatmul.mubr.bf16.vlgmr.msra.gmra.mrb[60].mxu1 %v893_v48  ;;  %v11764_v44 = vld [vmem:[%s12356_s8 + $0x1108] sm:$0xff]   ;;  %v11768_v48 = vld [vmem:[%s12356_s8 + $0x1110] sm:$0xff]  }
 0x27a   : > { %10774 = vmatprep.subr.bf16.mxu0 %v11731_v49  ;;  %10795 = vmatpush3.bf16.msra.mxu1 %v11730_v47  ;;  %v898_v40 = vpack.c.bf16 %v605_v36, %v605_v36  ;;  %v11769_v47 = vld [vmem:[%s12356_s8 + $0x11d0] sm:$0xff]   ;;  %v11771_v49 = vld [vmem:[%s12356_s8 + $0x1158] sm:$0xff]   ;;  %v11795_v32 = vld [vmem:[%s12356_s8 + $0x1248] sm:$0xff]  }
 0x27b   : > { %10796 = vmatprep.subr.bf16.mxu1 %v11733_v52  ;;  %8514 = vmatprep.mubr.bf16.mxu0 %v896_v35  ;;  %v11772_v52 = vld [vmem:[%s12356_s8 + $0x1118] sm:$0xff]   ;;  %v11797_v35 = vld [vmem:[%s12356_s8 + $0x12c8] sm:$0xff]  }
 0x27c   : > { %8554 = vmatprep.mubr.bf16.mxu1 %v898_v40  ;;  %v11798_v36 = vld [vmem:[%s12356_s8 + $0x1288] sm:$0xff]   ;;  %v11802_v40 = vld [vmem:[%s12356_s8 + $0x1290] sm:$0xff]  }
 0x27d   : > { %10775 = vmatpush3.bf16.msra.mxu0 %v11732_v51  ;;  %v11773_v51 = vld [vmem:[%s12356_s8 + $0x11d8] sm:$0xff]  }
 0x27e   : > { %10776 = vmatprep.subr.bf16.mxu0 %v11735_v54  ;;  %10797 = vmatpush3.bf16.msra.mxu1 %v11734_v53  ;;  %v11775_v53 = vld [vmem:[%s12356_s8 + $0x1160] sm:$0xff]   ;;  %v11774_v54 = vld [vmem:[%s12356_s8 + $0x1198] sm:$0xff]  }
 0x27f   : > { %10798 = vmatprep.subr.bf16.mxu1 %v11737_v56  ;;  %v11776_v56 = vld [vmem:[%s12356_s8 + $0x1120] sm:$0xff]  }
 0x281   : > { %10777 = vmatpush3.bf16.msra.mxu0 %v11736_v55  ;;  %v11777_v55 = vld [vmem:[%s12356_s8 + $0x11e0] sm:$0xff]  }
 0x282   : > { %10778 = vmatprep.subr.bf16.mxu0 %v11739_v58  ;;  %10799 = vmatpush3.bf16.msra.mxu1 %v11738_v57  ;;  %v11779_v57 = vld [vmem:[%s12356_s8 + $0x1168] sm:$0xff]  }
 0x283   : > { %10800 = vmatprep.subr.bf16.mxu1 %v11741_v60 }
 0x285   : > { %10779 = vmatpush3.bf16.msra.mxu0 %v11740_v59  ;;  %v11778_v59 = vld [vmem:[%s12356_s8 + $0x11a0] sm:$0xff]  }
 0x286   : > { %10780 = vmatprep.subr.bf16.mxu0 %v11743_v62  ;;  %10801 = vmatpush3.bf16.msra.mxu1 %v11742_v61  ;;  %v11780_v62 = vld [vmem:[%s12356_s8 + $0x1128] sm:$0xff]  }
 0x287   : > { %10802 = vmatprep.subr.bf16.mxu1 %v11745_v0 }
 0x289   : > { %10781 = vmatpush3.bf16.msra.mxu0 %v11744_v63  ;;  %v11781_v63 = vld [vmem:[%s12356_s8 + $0x11e8] sm:$0xff]  }
 0x28a   : > { %10782 = vmatprep.subr.bf16.mxu0 %v11747_v2  ;;  %10803 = vmatpush3.bf16.msra.mxu1 %v11746_v1 }
 0x28b   : > { %v10480_v4 = vpop.f32.mrb[36].mxu0  ;;  %10804 = vmatprep.subr.bf16.mxu1 %v11749_v5 }
 0x28c   : > { %v10481_v6 = vpop.f32.mrb[37].mxu0  ;;  %v10502_v7 = vpop.f32.mrb[36].mxu1 }
 0x28d   : > { %v10482_v10 = vadd.f32 %v10481_v6, %v10480_v4  ;;  %v10483_v11 = vpop.f32.mrb[38].mxu0  ;;  %v10503_v12 = vpop.f32.mrb[37].mxu1  ;;  %10783 = vmatpush3.bf16.msra.mxu0 %v11748_v3  ;;  %v11782_v3 = vld [vmem:[%s12356_s8 + $0x11a8] sm:$0xff]   ;;  %v11783_v6 = vld [vmem:[%s12356_s8 + $0x1170] sm:$0xff]  }
 0x28e   : > { %v10484_v13 = vpop.f32.mrb[39].mxu0  ;;  %v10504_v14 = vadd.f32 %v10503_v12, %v10502_v7  ;;  %v10505_v18 = vpop.f32.mrb[38].mxu1  ;;  %10784 = vmatprep.subr.bf16.mxu0 %v11751_v9  ;;  %10805 = vmatpush3.bf16.msra.mxu1 %v11750_v8  ;;  %v11784_v8 = vld [vmem:[%s12356_s8 + $0x1130] sm:$0xff]  }
 0x28f   : > { %v7957_v16 = vadd.f32 %v10482_v10, %v12947_v28  ;;  %v10506_v20 = vpop.f32.mrb[39].mxu1  ;;  %10806 = vmatprep.subr.bf16.mxu1 %v11753_v17  ;;  %v11759_v28 = vld [vmem:[%s12356_s8 + $0x1140] sm:$0xff]   ;;  %v11785_v10 = vld [vmem:[%s12356_s8 + $0x11f0] sm:$0xff]   ;;  %v11789_v18 = vld [vmem:[%s12356_s8 + $0x11f8] sm:$0xff]  }
 0x290   : > { %v11786_v13 = vld [vmem:[%s12356_s8 + $0x11b0] sm:$0xff]   ;;  %v11790_v20 = vld [vmem:[%s12356_s8 + $0x11b8] sm:$0xff]  }
 0x291   : > { %v12985_v21 = vadd.f32 %v10504_v14, %v7957_v16  ;;  %10785 = vmatpush3.bf16.msra.mxu0 %v11752_v15  ;;  %v11787_v14 = vld [vmem:[%s12356_s8 + $0x1178] sm:$0xff]   ;;  %v259_v15 = vld [vmem:[%s12349_s29 + $0x88] sm:$0xff] }
 0x292   : > { %10786 = vmatprep.subr.bf16.mxu0 %v11755_v22  ;;  %10807 = vmatpush3.bf16.msra.mxu1 %v11754_v19  ;;  %v11788_v16 = vld [vmem:[%s12356_s8 + $0x1138] sm:$0xff]   ;;  %v284_v17 = vmax.f32 %v259_v15, 0.0  ;;  %v11791_v22 = vld [vmem:[%s12356_s8 + $0x1240] sm:$0xff]  }
 0x293   : > { %10808 = vmatprep.subr.bf16.mxu1 %v11757_v24 }
 0x294   : > { %v613_v19 = vrot.slane %v284_v17, %v12403_v43 }
 0x295   : > { %10787 = vmatpush3.bf16.msra.mxu0 %v11756_v26 }
 0x296   : > { %10816 = vmatprep.subr.bf16.mxu0 %v11759_v28  ;;  %10809 = vmatpush3.bf16.msra.mxu1 %v11758_v30  ;;  %v621_v23 = vcombine.high %v613_v19, %v613_v19  ;;  %v899_v26 = vpack.c.bf16 %v613_v19, %v613_v19  ;;  %v11794_v30 = vld [vmem:[%s12356_s8 + $0x1280] sm:$0xff]  }
 0x297   : > { %10838 = vmatprep.subr.bf16.mxu1 %v11761_v33  ;;  %v11824_v19 = vld [vmem:[%s12356_s8 + $0x1300] sm:$0xff]  }
 0x298   : > { %8515 = vmatmul.mubr.bf16.vlgmr.msra.gmra.mrb[64].mxu0 %v895_v34  ;;  %v900_v28 = vpack.c.bf16 %v621_v23, %v621_v23  ;;  %v11796_v34 = vld [vmem:[%s12356_s8 + $0x1208] sm:$0xff]  }
 0x299   : > { %10817 = vmatpush3.bf16.msra.mxu0 %v11760_v37  ;;  %8555 = vmatmul.mubr.bf16.vlgmr.msra.gmra.mrb[64].mxu1 %v897_v38  ;;  %v11799_v37 = vld [vmem:[%s12356_s8 + $0x1250] sm:$0xff]  }
 0x29a   : > { %10818 = vmatprep.subr.bf16.mxu0 %v11763_v39  ;;  %10839 = vmatpush3.bf16.msra.mxu1 %v11762_v41  ;;  %v11800_v38 = vld [vmem:[%s12356_s8 + $0x1210] sm:$0xff]   ;;  %v11803_v41 = vld [vmem:[%s12356_s8 + $0x1258] sm:$0xff]  }
 0x29b   : > { %10840 = vmatprep.subr.bf16.mxu1 %v11765_v42  ;;  %8594 = vmatprep.mubr.bf16.mxu0 %v900_v28  ;;  %v11801_v39 = vld [vmem:[%s12356_s8 + $0x12d0] sm:$0xff]   ;;  %v11804_v42 = vld [vmem:[%s12356_s8 + $0x1218] sm:$0xff]   ;;  %v11830_v28 = vld [vmem:[%s12356_s8 + $0x1388] sm:$0xff]  }
 0x29d   : > { %10819 = vmatpush3.bf16.msra.mxu0 %v11764_v44  ;;  %v11805_v44 = vld [vmem:[%s12356_s8 + $0x12d8] sm:$0xff]  }
 0x29e   : > { %10820 = vmatprep.subr.bf16.mxu0 %v11767_v45  ;;  %10841 = vmatpush3.bf16.msra.mxu1 %v11766_v46  ;;  %v11806_v45 = vld [vmem:[%s12356_s8 + $0x1298] sm:$0xff]   ;;  %v11807_v46 = vld [vmem:[%s12356_s8 + $0x1260] sm:$0xff]  }
 0x29f   : > { %10842 = vmatprep.subr.bf16.mxu1 %v11769_v47  ;;  %v11808_v47 = vld [vmem:[%s12356_s8 + $0x1220] sm:$0xff]  }
 0x2a1   : > { %10821 = vmatpush3.bf16.msra.mxu0 %v11768_v48  ;;  %v11809_v48 = vld [vmem:[%s12356_s8 + $0x12e0] sm:$0xff]  }
 0x2a2   : > { %10822 = vmatprep.subr.bf16.mxu0 %v11771_v49  ;;  %10843 = vmatpush3.bf16.msra.mxu1 %v11770_v50  ;;  %v11810_v49 = vld [vmem:[%s12356_s8 + $0x12a0] sm:$0xff]   ;;  %v11811_v50 = vld [vmem:[%s12356_s8 + $0x1268] sm:$0xff]  }
 0x2a3   : > { %10844 = vmatprep.subr.bf16.mxu1 %v11773_v51 }
 0x2a5   : > { %10823 = vmatpush3.bf16.msra.mxu0 %v11772_v52  ;;  %v11812_v52 = vld [vmem:[%s12356_s8 + $0x1228] sm:$0xff]  }
 0x2a6   : > { %10824 = vmatprep.subr.bf16.mxu0 %v11775_v53  ;;  %10845 = vmatpush3.bf16.msra.mxu1 %v11774_v54  ;;  %v11813_v54 = vld [vmem:[%s12356_s8 + $0x12e8] sm:$0xff]  }
 0x2a7   : > { %10846 = vmatprep.subr.bf16.mxu1 %v11777_v55 }
 0x2a9   : > { %10825 = vmatpush3.bf16.msra.mxu0 %v11776_v56 }
 0x2aa   : > { %10826 = vmatprep.subr.bf16.mxu0 %v11779_v57  ;;  %10847 = vmatpush3.bf16.msra.mxu1 %v11778_v59 }
 0x2ab   : > { %v10524_v58 = vpop.f32.mrb[40].mxu0  ;;  %10848 = vmatprep.subr.bf16.mxu1 %v11781_v63 }
 0x2ac   : > { %v10525_v60 = vpop.f32.mrb[41].mxu0  ;;  %v10546_v61 = vpop.f32.mrb[40].mxu1 }
 0x2ad   : > { %v10526_v0 = vadd.f32 %v10525_v60, %v10524_v58  ;;  %v10527_v1 = vpop.f32.mrb[42].mxu0  ;;  %v10547_v2 = vpop.f32.mrb[41].mxu1  ;;  %10827 = vmatpush3.bf16.msra.mxu0 %v11780_v62  ;;  %v11814_v60 = vld [vmem:[%s12356_s8 + $0x12a8] sm:$0xff]  }
 0x2ae   : > { %v10528_v4 = vpop.f32.mrb[43].mxu0  ;;  %v10548_v5 = vadd.f32 %v10547_v2, %v10546_v61  ;;  %v10549_v9 = vpop.f32.mrb[42].mxu1  ;;  %10828 = vmatprep.subr.bf16.mxu0 %v11783_v6  ;;  %10849 = vmatpush3.bf16.msra.mxu1 %v11782_v3  ;;  %v11815_v61 = vld [vmem:[%s12356_s8 + $0x1270] sm:$0xff]  }
 0x2af   : > { %v8037_v7 = vadd.f32 %v10526_v0, %v12985_v21  ;;  %v10550_v11 = vpop.f32.mrb[43].mxu1  ;;  %10850 = vmatprep.subr.bf16.mxu1 %v11785_v10  ;;  %v606_v21 = vcombine.high %v284_v17, %v284_v17  ;;  %v11817_v0 = vld [vmem:[%s12356_s8 + $0x12f0] sm:$0xff]   ;;  %v11820_v10 = vld [vmem:[%s12356_s8 + $0x1238] sm:$0xff]   ;;  %v11825_v17 = vld [vmem:[%s12356_s8 + $0x13c0] sm:$0xff]  }
 0x2b0   : > { %v11816_v3 = vld [vmem:[%s12356_s8 + $0x1230] sm:$0xff]  }
 0x2b1   : > { %v13022_v12 = vadd.f32 %v10548_v5, %v8037_v7  ;;  %10829 = vmatpush3.bf16.msra.mxu0 %v11784_v8  ;;  %v620_v24 = vrot.slane %v606_v21, %v12403_v43  ;;  %v11819_v5 = vld [vmem:[%s12356_s8 + $0x1278] sm:$0xff]   ;;  %v11818_v6 = vld [vmem:[%s12356_s8 + $0x12b0] sm:$0xff]  }
 0x2b2   : > { %10830 = vmatprep.subr.bf16.mxu0 %v11787_v14  ;;  %10851 = vmatpush3.bf16.msra.mxu1 %v11786_v13  ;;  %v260_v7 = vld [vmem:[%s12349_s29 + $0x90] sm:$0xff]  ;;  %v11821_v8 = vld [vmem:[%s12356_s8 + $0x12f8] sm:$0xff]  }
 0x2b3   : > { %10852 = vmatprep.subr.bf16.mxu1 %v11789_v18  ;;  %v622_v29 = vcombine.high %v620_v24, %v620_v24  ;;  %v901_v31 = vpack.c.bf16 %v620_v24, %v620_v24  ;;  %v285_v9 = vmax.f32 %v260_v7, 0.0  ;;  %v11822_v14 = vld [vmem:[%s12356_s8 + $0x12b8] sm:$0xff]   ;;  %v11827_v24 = vld [vmem:[%s12356_s8 + $0x1348] sm:$0xff]  }
 0x2b5   : > { %10831 = vmatpush3.bf16.msra.mxu0 %v11788_v16  ;;  %v902_v33 = vpack.c.bf16 %v622_v29, %v622_v29  ;;  %v630_v11 = vrot.slane %v285_v9, %v12403_v43  ;;  %v623_v13 = vcombine.high %v285_v9, %v285_v9  ;;  %v11831_v29 = vld [vmem:[%s12356_s8 + $0x1350] sm:$0xff]   ;;  %v11857_v9 = vld [vmem:[%s12356_s8 + $0x14c0] sm:$0xff]  }
 0x2b6   : > { %10860 = vmatprep.subr.bf16.mxu0 %v11791_v22  ;;  %10853 = vmatpush3.bf16.msra.mxu1 %v11790_v20  ;;  %v11826_v22 = vld [vmem:[%s12356_s8 + $0x1380] sm:$0xff]  }
 0x2b7   : > { %10882 = vmatprep.subr.bf16.mxu1 %v11793_v27  ;;  %8634 = vmatprep.mubr.bf16.mxu1 %v902_v33  ;;  %v638_v15 = vcombine.high %v630_v11, %v630_v11  ;;  %v637_v16 = vrot.slane %v623_v13, %v12403_v43  ;;  %v903_v18 = vpack.c.bf16 %v630_v11, %v630_v11  ;;  %v11829_v27 = vld [vmem:[%s12356_s8 + $0x13c8] sm:$0xff]   ;;  %v11835_v33 = vld [vmem:[%s12356_s8 + $0x1358] sm:$0xff]   ;;  %v11856_v11 = vld [vmem:[%s12356_s8 + $0x1400] sm:$0xff]  }
 0x2b8   : > { %8595 = vmatmul.mubr.bf16.vlgmr.msra.gmra.mrb[68].mxu0 %v899_v26  ;;  %v11828_v26 = vld [vmem:[%s12356_s8 + $0x1308] sm:$0xff]  }
 0x2b9   : > { %10861 = vmatpush3.bf16.msra.mxu0 %v11792_v25  ;;  %8635 = vmatmul.mubr.bf16.vlgmr.msra.gmra.mrb[68].mxu1 %v901_v31  ;;  %v904_v20 = vpack.c.bf16 %v638_v15, %v638_v15  ;;  %v639_v21 = vcombine.high %v637_v16, %v637_v16  ;;  %v905_v23 = vpack.c.bf16 %v637_v16, %v637_v16  ;;  %v11833_v31 = vld [vmem:[%s12356_s8 + $0x13d0] sm:$0xff]   ;;  %v11859_v16 = vld [vmem:[%s12356_s8 + $0x1448] sm:$0xff]  }
 0x2ba   : > { %10862 = vmatprep.subr.bf16.mxu0 %v11795_v32  ;;  %10883 = vmatpush3.bf16.msra.mxu1 %v11794_v30  ;;  %v11832_v30 = vld [vmem:[%s12356_s8 + $0x1310] sm:$0xff]  }
 0x2bb   : > { %10884 = vmatprep.subr.bf16.mxu1 %v11797_v35  ;;  %8674 = vmatprep.mubr.bf16.mxu0 %v904_v20  ;;  %v906_v25 = vpack.c.bf16 %v639_v21, %v639_v21  ;;  %v11834_v32 = vld [vmem:[%s12356_s8 + $0x1390] sm:$0xff]   ;;  %v11837_v35 = vld [vmem:[%s12356_s8 + $0x13d8] sm:$0xff]   ;;  %v11862_v20 = vld [vmem:[%s12356_s8 + $0x1488] sm:$0xff]  }
 0x2bc   : > { %v11863_v21 = vld [vmem:[%s12356_s8 + $0x1450] sm:$0xff]  }
 0x2bd   : > { %10863 = vmatpush3.bf16.msra.mxu0 %v11796_v34  ;;  %8714 = vmatprep.mubr.bf16.mxu1 %v906_v25  ;;  %v11836_v34 = vld [vmem:[%s12356_s8 + $0x1318] sm:$0xff]  }
 0x2be   : > { %10864 = vmatprep.subr.bf16.mxu0 %v11799_v37  ;;  %10885 = vmatpush3.bf16.msra.mxu1 %v11798_v36  ;;  %v11838_v36 = vld [vmem:[%s12356_s8 + $0x1398] sm:$0xff]   ;;  %v11839_v37 = vld [vmem:[%s12356_s8 + $0x1360] sm:$0xff]  }
 0x2bf   : > { %10886 = vmatprep.subr.bf16.mxu1 %v11801_v39  ;;  %v11841_v39 = vld [vmem:[%s12356_s8 + $0x13e0] sm:$0xff]   ;;  %v11867_v25 = vld [vmem:[%s12356_s8 + $0x1458] sm:$0xff]  }
 0x2c1   : > { %10865 = vmatpush3.bf16.msra.mxu0 %v11800_v38  ;;  %v11840_v38 = vld [vmem:[%s12356_s8 + $0x1320] sm:$0xff]  }
 0x2c2   : > { %10866 = vmatprep.subr.bf16.mxu0 %v11803_v41  ;;  %10887 = vmatpush3.bf16.msra.mxu1 %v11802_v40  ;;  %v11842_v40 = vld [vmem:[%s12356_s8 + $0x13a0] sm:$0xff]   ;;  %v11843_v41 = vld [vmem:[%s12356_s8 + $0x1368] sm:$0xff]  }
 0x2c3   : > { %10888 = vmatprep.subr.bf16.mxu1 %v11805_v44  ;;  %v11844_v44 = vld [vmem:[%s12356_s8 + $0x1328] sm:$0xff]  }
 0x2c5   : > { %10867 = vmatpush3.bf16.msra.mxu0 %v11804_v42 }
 0x2c6   : > { %10868 = vmatprep.subr.bf16.mxu0 %v11807_v46  ;;  %10889 = vmatpush3.bf16.msra.mxu1 %v11806_v45  ;;  %v11845_v46 = vld [vmem:[%s12356_s8 + $0x13e8] sm:$0xff]  }
 0x2c7   : > { %10890 = vmatprep.subr.bf16.mxu1 %v11809_v48 }
 0x2c9   : > { %10869 = vmatpush3.bf16.msra.mxu0 %v11808_v47 }
 0x2ca   : > { %10870 = vmatprep.subr.bf16.mxu0 %v11811_v50  ;;  %10891 = vmatpush3.bf16.msra.mxu1 %v11810_v49  ;;  %v11846_v50 = vld [vmem:[%s12356_s8 + $0x13a8] sm:$0xff]  }
 0x2cb   : > { %v10568_v51 = vpop.f32.mrb[44].mxu0  ;;  %10892 = vmatprep.subr.bf16.mxu1 %v11813_v54 }
 0x2cc   : > { %v10569_v53 = vpop.f32.mrb[45].mxu0  ;;  %v10590_v57 = vpop.f32.mrb[44].mxu1 }
 0x2cd   : > { %v10570_v55 = vadd.f32 %v10569_v53, %v10568_v51  ;;  %v10571_v56 = vpop.f32.mrb[46].mxu0  ;;  %v10591_v59 = vpop.f32.mrb[45].mxu1  ;;  %10871 = vmatpush3.bf16.msra.mxu0 %v11812_v52  ;;  %v11847_v51 = vld [vmem:[%s12356_s8 + $0x1370] sm:$0xff]  }
 0x2ce   : > { %v10572_v58 = vpop.f32.mrb[47].mxu0  ;;  %v10592_v63 = vadd.f32 %v10591_v59, %v10590_v57  ;;  %v10593_v1 = vpop.f32.mrb[46].mxu1  ;;  %10872 = vmatprep.subr.bf16.mxu0 %v11815_v61  ;;  %10893 = vmatpush3.bf16.msra.mxu1 %v11814_v60  ;;  %v11848_v56 = vld [vmem:[%s12356_s8 + $0x1330] sm:$0xff]  }
 0x2cf   : > { %v8117_v62 = vadd.f32 %v10570_v55, %v13022_v12  ;;  %v10594_v4 = vpop.f32.mrb[47].mxu1  ;;  %10894 = vmatprep.subr.bf16.mxu1 %v11817_v0  ;;  %v11823_v12 = vld [vmem:[%s12356_s8 + $0x1340] sm:$0xff]   ;;  %v11849_v58 = vld [vmem:[%s12356_s8 + $0x13f0] sm:$0xff]   ;;  %v11853_v0 = vld [vmem:[%s12356_s8 + $0x13f8] sm:$0xff]  }
 0x2d0   : > { %v11850_v61 = vld [vmem:[%s12356_s8 + $0x13b0] sm:$0xff]   ;;  %v11855_v4 = vld [vmem:[%s12356_s8 + $0x1440] sm:$0xff]  }
 0x2d1   : > { %v13059_v2 = vadd.f32 %v10592_v63, %v8117_v62  ;;  %10873 = vmatpush3.bf16.msra.mxu0 %v11816_v3  ;;  %v11851_v62 = vld [vmem:[%s12356_s8 + $0x1378] sm:$0xff]  }
 0x2d2   : > { %10874 = vmatprep.subr.bf16.mxu0 %v11819_v5  ;;  %10895 = vmatpush3.bf16.msra.mxu1 %v11818_v6  ;;  %v261_v63 = vld [vmem:[%s12349_s29 + $0x98] sm:$0xff] }
 0x2d3   : > { %10896 = vmatprep.subr.bf16.mxu1 %v11821_v8  ;;  %v286_v1 = vmax.f32 %v261_v63, 0.0  ;;  %v11854_v6 = vld [vmem:[%s12356_s8 + $0x13b8] sm:$0xff]  }
 0x2d5   : > { %10875 = vmatpush3.bf16.msra.mxu0 %v11820_v10  ;;  %v647_v3 = vrot.slane %v286_v1, %v12403_v43  ;;  %v640_v5 = vcombine.high %v286_v1, %v286_v1  ;;  %v11888_v1 = vld [vmem:[%s12356_s8 + $0x1500] sm:$0xff]  }
 0x2d6   : > { %10904 = vmatprep.subr.bf16.mxu0 %v11823_v12  ;;  %10897 = vmatpush3.bf16.msra.mxu1 %v11822_v14  ;;  %v11858_v14 = vld [vmem:[%s12356_s8 + $0x1480] sm:$0xff]  }
 0x2d7   : > { %10926 = vmatprep.subr.bf16.mxu1 %v11825_v17  ;;  %v655_v7 = vcombine.high %v647_v3, %v647_v3  ;;  %v654_v8 = vrot.slane %v640_v5, %v12403_v43  ;;  %v907_v10 = vpack.c.bf16 %v647_v3, %v647_v3  ;;  %v11889_v3 = vld [vmem:[%s12356_s8 + $0x15c0] sm:$0xff]  }
 0x2d8   : > { %8675 = vmatmul.mubr.bf16.vlgmr.msra.gmra.mrb[72].mxu0 %v903_v18  ;;  %v11860_v18 = vld [vmem:[%s12356_s8 + $0x1408] sm:$0xff]  }
 0x2d9   : > { %10905 = vmatpush3.bf16.msra.mxu0 %v11824_v19  ;;  %8715 = vmatmul.mubr.bf16.vlgmr.msra.gmra.mrb[72].mxu1 %v905_v23  ;;  %v908_v12 = vpack.c.bf16 %v655_v7, %v655_v7  ;;  %v656_v13 = vcombine.high %v654_v8, %v654_v8  ;;  %v909_v15 = vpack.c.bf16 %v654_v8, %v654_v8  ;;  %v11861_v19 = vld [vmem:[%s12356_s8 + $0x14c8] sm:$0xff]   ;;  %v11865_v23 = vld [vmem:[%s12356_s8 + $0x14d0] sm:$0xff]  }
 0x2da   : > { %10906 = vmatprep.subr.bf16.mxu0 %v11827_v24  ;;  %10927 = vmatpush3.bf16.msra.mxu1 %v11826_v22  ;;  %v11864_v22 = vld [vmem:[%s12356_s8 + $0x1410] sm:$0xff]   ;;  %v11891_v8 = vld [vmem:[%s12356_s8 + $0x1548] sm:$0xff]  }
 0x2db   : > { %10928 = vmatprep.subr.bf16.mxu1 %v11829_v27  ;;  %8754 = vmatprep.mubr.bf16.mxu0 %v908_v12  ;;  %v910_v17 = vpack.c.bf16 %v656_v13, %v656_v13  ;;  %v11866_v24 = vld [vmem:[%s12356_s8 + $0x1490] sm:$0xff]   ;;  %v11869_v27 = vld [vmem:[%s12356_s8 + $0x14d8] sm:$0xff]   ;;  %v11894_v12 = vld [vmem:[%s12356_s8 + $0x1588] sm:$0xff]  }
 0x2dc   : > { %v11895_v13 = vld [vmem:[%s12356_s8 + $0x1550] sm:$0xff]  }
 0x2dd   : > { %10907 = vmatpush3.bf16.msra.mxu0 %v11828_v26  ;;  %8794 = vmatprep.mubr.bf16.mxu1 %v910_v17  ;;  %v11868_v26 = vld [vmem:[%s12356_s8 + $0x1418] sm:$0xff]  }
 0x2de   : > { %10908 = vmatprep.subr.bf16.mxu0 %v11831_v29  ;;  %10929 = vmatpush3.bf16.msra.mxu1 %v11830_v28  ;;  %v11870_v28 = vld [vmem:[%s12356_s8 + $0x1498] sm:$0xff]   ;;  %v11871_v29 = vld [vmem:[%s12356_s8 + $0x1460] sm:$0xff]  }
 0x2df   : > { %10930 = vmatprep.subr.bf16.mxu1 %v11833_v31  ;;  %v11873_v31 = vld [vmem:[%s12356_s8 + $0x14e0] sm:$0xff]   ;;  %v11899_v17 = vld [vmem:[%s12356_s8 + $0x1558] sm:$0xff]  }
 0x2e1   : > { %10909 = vmatpush3.bf16.msra.mxu0 %v11832_v30  ;;  %v11872_v30 = vld [vmem:[%s12356_s8 + $0x1420] sm:$0xff]  }
 0x2e2   : > { %10910 = vmatprep.subr.bf16.mxu0 %v11835_v33  ;;  %10931 = vmatpush3.bf16.msra.mxu1 %v11834_v32  ;;  %v11874_v32 = vld [vmem:[%s12356_s8 + $0x14a0] sm:$0xff]   ;;  %v11875_v33 = vld [vmem:[%s12356_s8 + $0x1468] sm:$0xff]  }
 0x2e3   : > { %10932 = vmatprep.subr.bf16.mxu1 %v11837_v35  ;;  %v11876_v35 = vld [vmem:[%s12356_s8 + $0x1428] sm:$0xff]  }
 0x2e5   : > { %10911 = vmatpush3.bf16.msra.mxu0 %v11836_v34 }
 0x2e6   : > { %10912 = vmatprep.subr.bf16.mxu0 %v11839_v37  ;;  %10933 = vmatpush3.bf16.msra.mxu1 %v11838_v36  ;;  %v11877_v37 = vld [vmem:[%s12356_s8 + $0x14e8] sm:$0xff]  }
 0x2e7   : > { %10934 = vmatprep.subr.bf16.mxu1 %v11841_v39 }
 0x2e9   : > { %10913 = vmatpush3.bf16.msra.mxu0 %v11840_v38 }
 0x2ea   : > { %10914 = vmatprep.subr.bf16.mxu0 %v11843_v41  ;;  %10935 = vmatpush3.bf16.msra.mxu1 %v11842_v40  ;;  %v11878_v41 = vld [vmem:[%s12356_s8 + $0x14a8] sm:$0xff]  }
 0x2eb   : > { %v10612_v42 = vpop.f32.mrb[48].mxu0  ;;  %10936 = vmatprep.subr.bf16.mxu1 %v11845_v46 }
 0x2ec   : > { %v10613_v45 = vpop.f32.mrb[49].mxu0  ;;  %v10634_v49 = vpop.f32.mrb[48].mxu1 }
 0x2ed   : > { %v10614_v47 = vadd.f32 %v10613_v45, %v10612_v42  ;;  %v10615_v48 = vpop.f32.mrb[50].mxu0  ;;  %v10635_v53 = vpop.f32.mrb[49].mxu1  ;;  %10915 = vmatpush3.bf16.msra.mxu0 %v11844_v44  ;;  %v11879_v42 = vld [vmem:[%s12356_s8 + $0x1470] sm:$0xff]  }
 0x2ee   : > { %v10616_v52 = vpop.f32.mrb[51].mxu0  ;;  %v10636_v55 = vadd.f32 %v10635_v53, %v10634_v49  ;;  %v10637_v57 = vpop.f32.mrb[50].mxu1  ;;  %10916 = vmatprep.subr.bf16.mxu0 %v11847_v51  ;;  %10937 = vmatpush3.bf16.msra.mxu1 %v11846_v50  ;;  %v11880_v48 = vld [vmem:[%s12356_s8 + $0x1430] sm:$0xff]  }
 0x2ef   : > { %v8197_v54 = vadd.f32 %v10614_v47, %v13059_v2  ;;  %v10638_v59 = vpop.f32.mrb[51].mxu1  ;;  %10938 = vmatprep.subr.bf16.mxu1 %v11849_v58  ;;  %v11852_v2 = vld [vmem:[%s12356_s8 + $0x1338] sm:$0xff]   ;;  %v11881_v50 = vld [vmem:[%s12356_s8 + $0x14f0] sm:$0xff]  }
 0x2f0   : > { %v11882_v53 = vld [vmem:[%s12356_s8 + $0x14b0] sm:$0xff]   ;;  %v11885_v58 = vld [vmem:[%s12356_s8 + $0x14f8] sm:$0xff]  }
 0x2f1   : > { %v13098_v60 = vadd.f32 %v10636_v55, %v8197_v54  ;;  %10917 = vmatpush3.bf16.msra.mxu0 %v11848_v56  ;;  %v11883_v54 = vld [vmem:[%s12356_s8 + $0x1478] sm:$0xff]  }
 0x2f2   : > { %10918 = vmatprep.subr.bf16.mxu0 %v11851_v62  ;;  %10939 = vmatpush3.bf16.msra.mxu1 %v11850_v61  ;;  %v262_v55 = vld [vmem:[%s12349_s29 + $0xa0] sm:$0xff] }
 0x2f3   : > { %10940 = vmatprep.subr.bf16.mxu1 %v11853_v0  ;;  %v11884_v56 = vld [vmem:[%s12356_s8 + $0x1438] sm:$0xff]   ;;  %v287_v57 = vmax.f32 %v262_v55, 0.0  ;;  %v11887_v62 = vld [vmem:[%s12356_s8 + $0x1540] sm:$0xff]  }
 0x2f5   : > { %10919 = vmatpush3.bf16.msra.mxu0 %v11852_v2  ;;  %v664_v59 = vrot.slane %v287_v57, %v12403_v43  ;;  %v657_v61 = vcombine.high %v287_v57, %v287_v57  ;;  %v11921_v57 = vld [vmem:[%s12356_s8 + $0x16c0] sm:$0xff]  }
 0x2f6   : > { %10948 = vmatprep.subr.bf16.mxu0 %v11855_v4  ;;  %10941 = vmatpush3.bf16.msra.mxu1 %v11854_v6  ;;  %v11890_v6 = vld [vmem:[%s12356_s8 + $0x1580] sm:$0xff]  }
 0x2f7   : > { %10970 = vmatprep.subr.bf16.mxu1 %v11857_v9  ;;  %v672_v63 = vcombine.high %v664_v59, %v664_v59  ;;  %v671_v0 = vrot.slane %v657_v61, %v12403_v43  ;;  %v911_v2 = vpack.c.bf16 %v664_v59, %v664_v59  ;;  %v11920_v59 = vld [vmem:[%s12356_s8 + $0x1600] sm:$0xff]  }
 0x2f8   : > { %8755 = vmatmul.mubr.bf16.vlgmr.msra.gmra.mrb[76].mxu0 %v907_v10  ;;  %v11892_v10 = vld [vmem:[%s12356_s8 + $0x1508] sm:$0xff]  }
 0x2f9   : > { %10949 = vmatpush3.bf16.msra.mxu0 %v11856_v11  ;;  %8795 = vmatmul.mubr.bf16.vlgmr.msra.gmra.mrb[76].mxu1 %v909_v15  ;;  %v912_v4 = vpack.c.bf16 %v672_v63, %v672_v63  ;;  %v673_v5 = vcombine.high %v671_v0, %v671_v0  ;;  %v913_v7 = vpack.c.bf16 %v671_v0, %v671_v0  ;;  %v11893_v11 = vld [vmem:[%s12356_s8 + $0x15c8] sm:$0xff]   ;;  %v11897_v15 = vld [vmem:[%s12356_s8 + $0x15d0] sm:$0xff]  }
 0x2fa   : > { %10950 = vmatprep.subr.bf16.mxu0 %v11859_v16  ;;  %10971 = vmatpush3.bf16.msra.mxu1 %v11858_v14  ;;  %v11896_v14 = vld [vmem:[%s12356_s8 + $0x1510] sm:$0xff]   ;;  %v11923_v0 = vld [vmem:[%s12356_s8 + $0x1648] sm:$0xff]  }
 0x2fb   : > { %10972 = vmatprep.subr.bf16.mxu1 %v11861_v19  ;;  %8834 = vmatprep.mubr.bf16.mxu0 %v912_v4  ;;  %v914_v9 = vpack.c.bf16 %v673_v5, %v673_v5  ;;  %v11898_v16 = vld [vmem:[%s12356_s8 + $0x1590] sm:$0xff]   ;;  %v11901_v19 = vld [vmem:[%s12356_s8 + $0x15d8] sm:$0xff]   ;;  %v11926_v4 = vld [vmem:[%s12356_s8 + $0x1688] sm:$0xff]  }
 0x2fc   : > { %v11927_v5 = vld [vmem:[%s12356_s8 + $0x1650] sm:$0xff]  }
 0x2fd   : > { %10951 = vmatpush3.bf16.msra.mxu0 %v11860_v18  ;;  %8874 = vmatprep.mubr.bf16.mxu1 %v914_v9  ;;  %v11900_v18 = vld [vmem:[%s12356_s8 + $0x1518] sm:$0xff]  }
 0x2fe   : > { %10952 = vmatprep.subr.bf16.mxu0 %v11863_v21  ;;  %10973 = vmatpush3.bf16.msra.mxu1 %v11862_v20  ;;  %v11902_v20 = vld [vmem:[%s12356_s8 + $0x1598] sm:$0xff]   ;;  %v11903_v21 = vld [vmem:[%s12356_s8 + $0x1560] sm:$0xff]  }
 0x2ff   : > { %10974 = vmatprep.subr.bf16.mxu1 %v11865_v23  ;;  %v11905_v23 = vld [vmem:[%s12356_s8 + $0x15e0] sm:$0xff]   ;;  %v11931_v9 = vld [vmem:[%s12356_s8 + $0x1658] sm:$0xff]  }
 0x301   : > { %10953 = vmatpush3.bf16.msra.mxu0 %v11864_v22  ;;  %v11904_v22 = vld [vmem:[%s12356_s8 + $0x1520] sm:$0xff]  }
 0x302   : > { %10954 = vmatprep.subr.bf16.mxu0 %v11867_v25  ;;  %10975 = vmatpush3.bf16.msra.mxu1 %v11866_v24  ;;  %v11906_v24 = vld [vmem:[%s12356_s8 + $0x15a0] sm:$0xff]   ;;  %v11907_v25 = vld [vmem:[%s12356_s8 + $0x1568] sm:$0xff]  }
 0x303   : > { %10976 = vmatprep.subr.bf16.mxu1 %v11869_v27  ;;  %v11908_v27 = vld [vmem:[%s12356_s8 + $0x1528] sm:$0xff]  }
 0x305   : > { %10955 = vmatpush3.bf16.msra.mxu0 %v11868_v26 }
 0x306   : > { %10956 = vmatprep.subr.bf16.mxu0 %v11871_v29  ;;  %10977 = vmatpush3.bf16.msra.mxu1 %v11870_v28  ;;  %v11909_v29 = vld [vmem:[%s12356_s8 + $0x15e8] sm:$0xff]  }
 0x307   : > { %10978 = vmatprep.subr.bf16.mxu1 %v11873_v31 }
 0x309   : > { %10957 = vmatpush3.bf16.msra.mxu0 %v11872_v30 }
 0x30a   : > { %10958 = vmatprep.subr.bf16.mxu0 %v11875_v33  ;;  %10979 = vmatpush3.bf16.msra.mxu1 %v11874_v32 }
 0x30b   : > { %v10656_v34 = vpop.f32.mrb[52].mxu0  ;;  %10980 = vmatprep.subr.bf16.mxu1 %v11877_v37 }
 0x30c   : > { %v10657_v36 = vpop.f32.mrb[53].mxu0  ;;  %v10678_v40 = vpop.f32.mrb[52].mxu1 }
 0x30d   : > { %v10658_v38 = vadd.f32 %v10657_v36, %v10656_v34  ;;  %v10659_v39 = vpop.f32.mrb[54].mxu0  ;;  %v10679_v45 = vpop.f32.mrb[53].mxu1  ;;  %10959 = vmatpush3.bf16.msra.mxu0 %v11876_v35  ;;  %v11910_v35 = vld [vmem:[%s12356_s8 + $0x15a8] sm:$0xff]   ;;  %v11911_v36 = vld [vmem:[%s12356_s8 + $0x1570] sm:$0xff]  }
 0x30e   : > { %v10660_v44 = vpop.f32.mrb[55].mxu0  ;;  %v10680_v47 = vadd.f32 %v10679_v45, %v10678_v40  ;;  %v10681_v49 = vpop.f32.mrb[54].mxu1  ;;  %10960 = vmatprep.subr.bf16.mxu0 %v11879_v42  ;;  %10981 = vmatpush3.bf16.msra.mxu1 %v11878_v41  ;;  %v11913_v39 = vld [vmem:[%s12356_s8 + $0x15f0] sm:$0xff]   ;;  %v11915_v45 = vld [vmem:[%s12356_s8 + $0x1578] sm:$0xff]  }
 0x30f   : > { %v8277_v46 = vadd.f32 %v10658_v38, %v13098_v60  ;;  %v10682_v51 = vpop.f32.mrb[55].mxu1  ;;  %10982 = vmatprep.subr.bf16.mxu1 %v11881_v50  ;;  %v11886_v60 = vld [vmem:[%s12356_s8 + $0x14b8] sm:$0xff]   ;;  %v11912_v42 = vld [vmem:[%s12356_s8 + $0x1530] sm:$0xff]  }
 0x310   : > { %v11916_v50 = vld [vmem:[%s12356_s8 + $0x1538] sm:$0xff]  }
 0x311   : > { %v13136_v52 = vadd.f32 %v10680_v47, %v8277_v46  ;;  %10961 = vmatpush3.bf16.msra.mxu0 %v11880_v48  ;;  %v11914_v46 = vld [vmem:[%s12356_s8 + $0x15b0] sm:$0xff]   ;;  %v263_v47 = vld [vmem:[%s12349_s29 + $0xa8] sm:$0xff]  ;;  %v11917_v48 = vld [vmem:[%s12356_s8 + $0x15f8] sm:$0xff]  }
 0x312   : > { %10962 = vmatprep.subr.bf16.mxu0 %v11883_v54  ;;  %10983 = vmatpush3.bf16.msra.mxu1 %v11882_v53  ;;  %v288_v49 = vmax.f32 %v263_v47, 0.0  ;;  %v11918_v54 = vld [vmem:[%s12356_s8 + $0x15b8] sm:$0xff]  }
 0x313   : > { %10984 = vmatprep.subr.bf16.mxu1 %v11885_v58 }
 0x314   : > { %v681_v51 = vrot.slane %v288_v49, %v12403_v43  ;;  %v674_v53 = vcombine.high %v288_v49, %v288_v49  ;;  %v11953_v49 = vld [vmem:[%s12356_s8 + $0x17c0] sm:$0xff]  }
 0x315   : > { %10963 = vmatpush3.bf16.msra.mxu0 %v11884_v56 }
 0x316   : > { %10992 = vmatprep.subr.bf16.mxu0 %v11887_v62  ;;  %10985 = vmatpush3.bf16.msra.mxu1 %v11886_v60  ;;  %v689_v55 = vcombine.high %v681_v51, %v681_v51  ;;  %v688_v56 = vrot.slane %v674_v53, %v12403_v43  ;;  %v915_v58 = vpack.c.bf16 %v681_v51, %v681_v51  ;;  %v11922_v62 = vld [vmem:[%s12356_s8 + $0x1680] sm:$0xff]  }
 0x317   : > { %11014 = vmatprep.subr.bf16.mxu1 %v11889_v3  ;;  %v11925_v3 = vld [vmem:[%s12356_s8 + $0x16c8] sm:$0xff]   ;;  %v11952_v53 = vld [vmem:[%s12356_s8 + $0x1700] sm:$0xff]  }
 0x318   : > { %8835 = vmatmul.mubr.bf16.vlgmr.msra.gmra.mrb[80].mxu0 %v911_v2  ;;  %v916_v60 = vpack.c.bf16 %v689_v55, %v689_v55  ;;  %v690_v61 = vcombine.high %v688_v56, %v688_v56  ;;  %v917_v63 = vpack.c.bf16 %v688_v56, %v688_v56  ;;  %v11924_v2 = vld [vmem:[%s12356_s8 + $0x1608] sm:$0xff]  }
 0x319   : > { %10993 = vmatpush3.bf16.msra.mxu0 %v11888_v1  ;;  %8875 = vmatmul.mubr.bf16.vlgmr.msra.gmra.mrb[80].mxu1 %v913_v7  ;;  %v11929_v7 = vld [vmem:[%s12356_s8 + $0x16d0] sm:$0xff]   ;;  %v11955_v55 = vld [vmem:[%s12356_s8 + $0x1748] sm:$0xff]  }
 0x31a   : > { %10994 = vmatprep.subr.bf16.mxu0 %v11891_v8  ;;  %11015 = vmatpush3.bf16.msra.mxu1 %v11890_v6  ;;  %v918_v1 = vpack.c.bf16 %v690_v61, %v690_v61  ;;  %v11928_v6 = vld [vmem:[%s12356_s8 + $0x1610] sm:$0xff]   ;;  %v11958_v61 = vld [vmem:[%s12356_s8 + $0x1788] sm:$0xff]  }
 0x31b   : > { %11016 = vmatprep.subr.bf16.mxu1 %v11893_v11  ;;  %8914 = vmatprep.mubr.bf16.mxu0 %v916_v60  ;;  %v11930_v8 = vld [vmem:[%s12356_s8 + $0x1690] sm:$0xff]   ;;  %v11933_v11 = vld [vmem:[%s12356_s8 + $0x16d8] sm:$0xff]  }
 0x31c   : > { %8954 = vmatprep.mubr.bf16.mxu1 %v918_v1  ;;  %v11959_v60 = vld [vmem:[%s12356_s8 + $0x1750] sm:$0xff]  }
 0x31d   : > { %10995 = vmatpush3.bf16.msra.mxu0 %v11892_v10  ;;  %v11932_v10 = vld [vmem:[%s12356_s8 + $0x1618] sm:$0xff]   ;;  %v11962_v1 = vld [vmem:[%s12356_s8 + $0x1790] sm:$0xff]  }
 0x31e   : > { %10996 = vmatprep.subr.bf16.mxu0 %v11895_v13  ;;  %11017 = vmatpush3.bf16.msra.mxu1 %v11894_v12  ;;  %v11934_v12 = vld [vmem:[%s12356_s8 + $0x1698] sm:$0xff]   ;;  %v11935_v13 = vld [vmem:[%s12356_s8 + $0x1660] sm:$0xff]  }
 0x31f   : > { %11018 = vmatprep.subr.bf16.mxu1 %v11897_v15  ;;  %v11937_v15 = vld [vmem:[%s12356_s8 + $0x16e0] sm:$0xff]  }
 0x321   : > { %10997 = vmatpush3.bf16.msra.mxu0 %v11896_v14  ;;  %v11936_v14 = vld [vmem:[%s12356_s8 + $0x1620] sm:$0xff]  }
 0x322   : > { %10998 = vmatprep.subr.bf16.mxu0 %v11899_v17  ;;  %11019 = vmatpush3.bf16.msra.mxu1 %v11898_v16  ;;  %v11938_v16 = vld [vmem:[%s12356_s8 + $0x16a0] sm:$0xff]   ;;  %v11939_v17 = vld [vmem:[%s12356_s8 + $0x1668] sm:$0xff]  }
 0x323   : > { %11020 = vmatprep.subr.bf16.mxu1 %v11901_v19  ;;  %v11940_v19 = vld [vmem:[%s12356_s8 + $0x1628] sm:$0xff]  }
 0x325   : > { %10999 = vmatpush3.bf16.msra.mxu0 %v11900_v18 }
 0x326   : > { %11000 = vmatprep.subr.bf16.mxu0 %v11903_v21  ;;  %11021 = vmatpush3.bf16.msra.mxu1 %v11902_v20  ;;  %v11941_v21 = vld [vmem:[%s12356_s8 + $0x16e8] sm:$0xff]  }
 0x327   : > { %11022 = vmatprep.subr.bf16.mxu1 %v11905_v23 }
 0x329   : > { %11001 = vmatpush3.bf16.msra.mxu0 %v11904_v22 }
 0x32a   : > { %11002 = vmatprep.subr.bf16.mxu0 %v11907_v25  ;;  %11023 = vmatpush3.bf16.msra.mxu1 %v11906_v24  ;;  %v11942_v25 = vld [vmem:[%s12356_s8 + $0x16a8] sm:$0xff]  }
 0x32b   : > { %v10700_v26 = vpop.f32.mrb[56].mxu0  ;;  %11024 = vmatprep.subr.bf16.mxu1 %v11909_v29 }
 0x32c   : > { %v10701_v28 = vpop.f32.mrb[57].mxu0  ;;  %v10722_v32 = vpop.f32.mrb[56].mxu1 }
 0x32d   : > { %v10702_v30 = vadd.f32 %v10701_v28, %v10700_v26  ;;  %v10703_v31 = vpop.f32.mrb[58].mxu0  ;;  %v10723_v34 = vpop.f32.mrb[57].mxu1  ;;  %11003 = vmatpush3.bf16.msra.mxu0 %v11908_v27  ;;  %v11943_v26 = vld [vmem:[%s12356_s8 + $0x1670] sm:$0xff]  }
 0x32e   : > { %v10704_v33 = vpop.f32.mrb[59].mxu0  ;;  %v10724_v38 = vadd.f32 %v10723_v34, %v10722_v32  ;;  %v10725_v40 = vpop.f32.mrb[58].mxu1  ;;  %11004 = vmatprep.subr.bf16.mxu0 %v11911_v36  ;;  %11025 = vmatpush3.bf16.msra.mxu1 %v11910_v35  ;;  %v11944_v31 = vld [vmem:[%s12356_s8 + $0x1630] sm:$0xff]  }
 0x32f   : > { %v8357_v37 = vadd.f32 %v10702_v30, %v13136_v52  ;;  %v10726_v44 = vpop.f32.mrb[59].mxu1  ;;  %11026 = vmatprep.subr.bf16.mxu1 %v11913_v39  ;;  %v11919_v52 = vld [vmem:[%s12356_s8 + $0x1640] sm:$0xff]   ;;  %v11945_v33 = vld [vmem:[%s12356_s8 + $0x16f0] sm:$0xff]   ;;  %v11949_v39 = vld [vmem:[%s12356_s8 + $0x16f8] sm:$0xff]  }
 0x330   : > { %v11946_v36 = vld [vmem:[%s12356_s8 + $0x16b0] sm:$0xff]   ;;  %v11951_v44 = vld [vmem:[%s12356_s8 + $0x1740] sm:$0xff]  }
 0x331   : > { %v13173_v41 = vadd.f32 %v10724_v38, %v8357_v37  ;;  %11005 = vmatpush3.bf16.msra.mxu0 %v11912_v42  ;;  %v11947_v37 = vld [vmem:[%s12356_s8 + $0x1678] sm:$0xff]   ;;  %v264_v38 = vld [vmem:[%s12349_s29 + $0xb0] sm:$0xff] }
 0x332   : > { %11006 = vmatprep.subr.bf16.mxu0 %v11915_v45  ;;  %11027 = vmatpush3.bf16.msra.mxu1 %v11914_v46  ;;  %v289_v40 = vmax.f32 %v264_v38, 0.0  ;;  %v11950_v46 = vld [vmem:[%s12356_s8 + $0x16b8] sm:$0xff]  }
 0x333   : > { %11028 = vmatprep.subr.bf16.mxu1 %v11917_v48  ;;  %v11982_v38 = vld [vmem:[%s12356_s8 + $0x17b8] sm:$0xff]  }
 0x334   : > { %v698_v42 = vrot.slane %v289_v40, %v12403_v43  ;;  %v691_v45 = vcombine.high %v289_v40, %v289_v40 }
 0x335   : > { %11007 = vmatpush3.bf16.msra.mxu0 %v11916_v50 }
 0x336   : > { %11036 = vmatprep.subr.bf16.mxu0 %v11919_v52  ;;  %11029 = vmatpush3.bf16.msra.mxu1 %v11918_v54  ;;  %v706_v47 = vcombine.high %v698_v42, %v698_v42  ;;  %v705_v48 = vrot.slane %v691_v45, %v12403_v43  ;;  %v919_v50 = vpack.c.bf16 %v698_v42, %v698_v42 }
 0x337   : > { %11058 = vmatprep.subr.bf16.mxu1 %v11921_v57  ;;  %v11954_v57 = vld [vmem:[%s12356_s8 + $0x1780] sm:$0xff]  }
 0x338   : > { %8915 = vmatmul.mubr.bf16.vlgmr.msra.gmra.mrb[84].mxu0 %v915_v58  ;;  %v920_v51 = vpack.c.bf16 %v706_v47, %v706_v47  ;;  %v707_v52 = vcombine.high %v705_v48, %v705_v48  ;;  %v921_v54 = vpack.c.bf16 %v705_v48, %v705_v48  ;;  %v11957_v58 = vld [vmem:[%s12356_s8 + $0x17c8] sm:$0xff]  }
 0x339   : > { %11037 = vmatpush3.bf16.msra.mxu0 %v11920_v59  ;;  %8955 = vmatmul.mubr.bf16.vlgmr.msra.gmra.mrb[84].mxu1 %v917_v63  ;;  %v11956_v59 = vld [vmem:[%s12356_s8 + $0x1708] sm:$0xff]   ;;  %v11960_v63 = vld [vmem:[%s12356_s8 + $0x1710] sm:$0xff]  }
 0x33a   : > { %11038 = vmatprep.subr.bf16.mxu0 %v11923_v0  ;;  %11059 = vmatpush3.bf16.msra.mxu1 %v11922_v62  ;;  %v922_v56 = vpack.c.bf16 %v707_v52, %v707_v52  ;;  %v11961_v62 = vld [vmem:[%s12356_s8 + $0x17d0] sm:$0xff]   ;;  %v11963_v0 = vld [vmem:[%s12356_s8 + $0x1758] sm:$0xff]   ;;  %v11986_v48 = vld [vmem:[%s12356_s8 + $0x1808] sm:$0xff]  }
 0x33b   : > { %11060 = vmatprep.subr.bf16.mxu1 %v11925_v3  ;;  %8994 = vmatprep.mubr.bf16.mxu0 %v920_v51  ;;  %v11964_v3 = vld [vmem:[%s12356_s8 + $0x1718] sm:$0xff]  }
 0x33c   : > { %9034 = vmatprep.mubr.bf16.mxu1 %v922_v56  ;;  %v11989_v51 = vld [vmem:[%s12356_s8 + $0x1858] sm:$0xff]  }
 0x33d   : > { %11039 = vmatpush3.bf16.msra.mxu0 %v11924_v2  ;;  %v11965_v2 = vld [vmem:[%s12356_s8 + $0x17d8] sm:$0xff]  }
 0x33e   : > { %11040 = vmatprep.subr.bf16.mxu0 %v11927_v5  ;;  %11061 = vmatpush3.bf16.msra.mxu1 %v11926_v4  ;;  %v11967_v4 = vld [vmem:[%s12356_s8 + $0x1760] sm:$0xff]   ;;  %v11966_v5 = vld [vmem:[%s12356_s8 + $0x1798] sm:$0xff]  }
 0x33f   : > { %11062 = vmatprep.subr.bf16.mxu1 %v11929_v7  ;;  %v11968_v7 = vld [vmem:[%s12356_s8 + $0x1720] sm:$0xff]   ;;  %v266_v52 = vld [vmem:[%s12349_s29 + $0xc0] sm:$0xf] }
 0x341   : > { %11041 = vmatpush3.bf16.msra.mxu0 %v11928_v6  ;;  %v11969_v6 = vld [vmem:[%s12356_s8 + $0x17e0] sm:$0xff]  }
 0x342   : > { %11042 = vmatprep.subr.bf16.mxu0 %v11931_v9  ;;  %11063 = vmatpush3.bf16.msra.mxu1 %v11930_v8  ;;  %v11971_v8 = vld [vmem:[%s12356_s8 + $0x1768] sm:$0xff]  }
 0x343   : > { %11064 = vmatprep.subr.bf16.mxu1 %v11933_v11 }
 0x345   : > { %11043 = vmatpush3.bf16.msra.mxu0 %v11932_v10  ;;  %v11970_v10 = vld [vmem:[%s12356_s8 + $0x17a0] sm:$0xff]  }
 0x346   : > { %11044 = vmatprep.subr.bf16.mxu0 %v11935_v13  ;;  %11065 = vmatpush3.bf16.msra.mxu1 %v11934_v12  ;;  %v11973_v12 = vld [vmem:[%s12356_s8 + $0x17e8] sm:$0xff]  }
 0x347   : > { %11066 = vmatprep.subr.bf16.mxu1 %v11937_v15 }
 0x349   : > { %11045 = vmatpush3.bf16.msra.mxu0 %v11936_v14 }
 0x34a   : > { %11046 = vmatprep.subr.bf16.mxu0 %v11939_v17  ;;  %11067 = vmatpush3.bf16.msra.mxu1 %v11938_v16  ;;  %v11972_v16 = vld [vmem:[%s12356_s8 + $0x1728] sm:$0xff]   ;;  %v11975_v17 = vld [vmem:[%s12356_s8 + $0x1770] sm:$0xff]  }
 0x34b   : > { %v10744_v18 = vpop.f32.mrb[60].mxu0  ;;  %11068 = vmatprep.subr.bf16.mxu1 %v11941_v21 }
 0x34c   : > { %v10745_v20 = vpop.f32.mrb[61].mxu0  ;;  %v10766_v24 = vpop.f32.mrb[60].mxu1 }
 0x34d   : > { %v10746_v22 = vadd.f32 %v10745_v20, %v10744_v18  ;;  %v10747_v23 = vpop.f32.mrb[62].mxu0  ;;  %v10767_v28 = vpop.f32.mrb[61].mxu1  ;;  %11047 = vmatpush3.bf16.msra.mxu0 %v11940_v19 }
 0x34e   : > { %v10748_v27 = vpop.f32.mrb[63].mxu0  ;;  %v10768_v30 = vadd.f32 %v10767_v28, %v10766_v24  ;;  %v10769_v32 = vpop.f32.mrb[62].mxu1  ;;  %11048 = vmatprep.subr.bf16.mxu0 %v11943_v26  ;;  %11069 = vmatpush3.bf16.msra.mxu1 %v11942_v25  ;;  %v11977_v24 = vld [vmem:[%s12356_s8 + $0x17f0] sm:$0xff]   ;;  %v11979_v28 = vld [vmem:[%s12356_s8 + $0x1778] sm:$0xff]  }
 0x34f   : > { %v8437_v29 = vadd.f32 %v10746_v22, %v13173_v41  ;;  %v10770_v34 = vpop.f32.mrb[63].mxu1  ;;  %11070 = vmatprep.subr.bf16.mxu1 %v11945_v33  ;;  %v11948_v41 = vld [vmem:[%s12356_s8 + $0x1638] sm:$0xff]   ;;  %v11974_v22 = vld [vmem:[%s12356_s8 + $0x17a8] sm:$0xff]   ;;  %v11976_v27 = vld [vmem:[%s12356_s8 + $0x1730] sm:$0xff]  }
 0x350   : > { %v11981_v32 = vld [vmem:[%s12356_s8 + $0x17f8] sm:$0xff]  }
 0x351   : > { %v13212_v35 = vadd.f32 %v10768_v30, %v8437_v29  ;;  %11049 = vmatpush3.bf16.msra.mxu0 %v11944_v31  ;;  %v265_v29 = vld [vmem:[%s12349_s29 + $0xb8] sm:$0xff] }
 0x352   : > { %11050 = vmatprep.subr.bf16.mxu0 %v11947_v37  ;;  %11071 = vmatpush3.bf16.msra.mxu1 %v11946_v36  ;;  %v11978_v30 = vld [vmem:[%s12356_s8 + $0x17b0] sm:$0xff]   ;;  %v290_v31 = vmax.f32 %v265_v29, 0.0  ;;  %v11980_v33 = vld [vmem:[%s12356_s8 + $0x1738] sm:$0xff]   ;;  %v11983_v36 = vld [vmem:[%s12356_s8 + $0x1840] sm:$0xff]  }
 0x353   : > { %11072 = vmatprep.subr.bf16.mxu1 %v11949_v39 }
 0x354   : > { %v715_v34 = vrot.slane %v290_v31, %v12403_v43 }
 0x355   : > { %11051 = vmatpush3.bf16.msra.mxu0 %v11948_v41 }
 0x356   : > { %11080 = vmatprep.subr.bf16.mxu0 %v11951_v44  ;;  %11073 = vmatpush3.bf16.msra.mxu1 %v11950_v46  ;;  %v723_v37 = vcombine.high %v715_v34, %v715_v34  ;;  %v923_v40 = vpack.c.bf16 %v715_v34, %v715_v34  ;;  %v11984_v44 = vld [vmem:[%s12356_s8 + $0x1800] sm:$0xff]   ;;  %v11985_v46 = vld [vmem:[%s12356_s8 + $0x1848] sm:$0xff]  }
 0x357   : > { %11102 = vmatprep.subr.bf16.mxu1 %v11953_v49  ;;  %v11987_v49 = vld [vmem:[%s12356_s8 + $0x1850] sm:$0xff]  }
 0x358   : > { %8995 = vmatmul.mubr.bf16.vlgmr.msra.gmra.mrb[88].mxu0 %v919_v50  ;;  %v924_v41 = vpack.c.bf16 %v723_v37, %v723_v37  ;;  %v11988_v50 = vld [vmem:[%s12356_s8 + $0x1810] sm:$0xff]  }
 0x359   : > { %11081 = vmatpush3.bf16.msra.mxu0 %v11952_v53  ;;  %9035 = vmatmul.mubr.bf16.vlgmr.msra.gmra.mrb[88].mxu1 %v921_v54  ;;  %v11990_v53 = vld [vmem:[%s12356_s8 + $0x1818] sm:$0xff]   ;;  %v291_v54 = vmax.f32 %v266_v52, 0.0 }
 0x35a   : > { %11082 = vmatprep.subr.bf16.mxu0 %v11955_v55  ;;  %11103 = vmatpush3.bf16.msra.mxu1 %v11954_v57  ;;  %v11991_v55 = vld [vmem:[%s12356_s8 + $0x1860] sm:$0xff]  }
 0x35b   : > { %11104 = vmatprep.subr.bf16.mxu1 %v11957_v58  ;;  %9074 = vmatprep.mubr.bf16.mxu0 %v924_v41  ;;  %v731_v56 = vrot.slane %v291_v54, %v12403_v43  ;;  %v11992_v57 = vld [vmem:[%s12356_s8 + $0x1820] sm:$0xff]  }
 0x35d   : > { %11083 = vmatpush3.bf16.msra.mxu0 %v11956_v59  ;;  %v732_v58 = vcombine.high %v731_v56, %v731_v56  ;;  %v11993_v59 = vld [vmem:[%s12356_s8 + $0x1868] sm:$0xff]  }
 0x35e   : > { %11084 = vmatprep.subr.bf16.mxu0 %v11959_v60  ;;  %11105 = vmatpush3.bf16.msra.mxu1 %v11958_v61 }
 0x35f   : > { %11106 = vmatprep.subr.bf16.mxu1 %v11961_v62  ;;  %v928_v61 = vpack.c.bf16 %v732_v58, %v732_v58 }
 0x361   : > { %11085 = vmatpush3.bf16.msra.mxu0 %v11960_v63 }
 0x362   : > { %11086 = vmatprep.subr.bf16.mxu0 %v11963_v0  ;;  %11107 = vmatpush3.bf16.msra.mxu1 %v11962_v1 }
 0x363   : > { %11108 = vmatprep.subr.bf16.mxu1 %v11965_v2  ;;  %v11994_v2 = vld [vmem:[%s12356_s8 + $0x1828] sm:$0xff]  }
 0x365   : > { %11087 = vmatpush3.bf16.msra.mxu0 %v11964_v3 }
 0x366   : > { %11088 = vmatprep.subr.bf16.mxu0 %v11967_v4  ;;  %11109 = vmatpush3.bf16.msra.mxu1 %v11966_v5  ;;  %v11995_v4 = vld [vmem:[%s12356_s8 + $0x1870] sm:$0xff]  }
 0x367   : > { %11110 = vmatprep.subr.bf16.mxu1 %v11969_v6 }
 0x369   : > { %11089 = vmatpush3.bf16.msra.mxu0 %v11968_v7 }
 0x36a   : > { %11090 = vmatprep.subr.bf16.mxu0 %v11971_v8  ;;  %11111 = vmatpush3.bf16.msra.mxu1 %v11970_v10  ;;  %v11996_v10 = vld [vmem:[%s12356_s8 + $0x1830] sm:$0xff]  }
 0x36b   : > { %v10788_v9 = vpop.f32.mrb[64].mxu0  ;;  %11112 = vmatprep.subr.bf16.mxu1 %v11973_v12  ;;  %v11998_v12 = vld [vmem:[%s12356_s8 + $0x1838] sm:$0xff]  }
 0x36c   : > { %v10789_v11 = vpop.f32.mrb[65].mxu0  ;;  %v10810_v15 = vpop.f32.mrb[64].mxu1 }
 0x36d   : > { %v10790_v13 = vadd.f32 %v10789_v11, %v10788_v9  ;;  %v10791_v14 = vpop.f32.mrb[66].mxu0  ;;  %v10811_v19 = vpop.f32.mrb[65].mxu1  ;;  %11091 = vmatpush3.bf16.msra.mxu0 %v11972_v16  ;;  %v11997_v11 = vld [vmem:[%s12356_s8 + $0x1878] sm:$0xff]  }
 0x36e   : > { %v10792_v18 = vpop.f32.mrb[67].mxu0  ;;  %v10812_v21 = vadd.f32 %v10811_v19, %v10810_v15  ;;  %v10813_v23 = vpop.f32.mrb[66].mxu1  ;;  %11092 = vmatprep.subr.bf16.mxu0 %v11975_v17  ;;  %11113 = vmatpush3.bf16.msra.mxu1 %v11974_v22 }
 0x36f   : > { %v8517_v20 = vadd.f32 %v10790_v13, %v13212_v35  ;;  %v10814_v25 = vpop.f32.mrb[67].mxu1  ;;  %11114 = vmatprep.subr.bf16.mxu1 %v11977_v24  ;;  %v708_v35 = vcombine.high %v290_v31, %v290_v31  ;;  %v927_v13 = vpack.c.bf16 %v731_v56, %v731_v56 }
 0x371   : > { %v13249_v26 = vadd.f32 %v10812_v21, %v8517_v20  ;;  %11093 = vmatpush3.bf16.msra.mxu0 %v11976_v27  ;;  %v722_v39 = vrot.slane %v708_v35, %v12403_v43 }
 0x372   : > { %11094 = vmatprep.subr.bf16.mxu0 %v11979_v28  ;;  %11115 = vmatpush3.bf16.msra.mxu1 %v11978_v30 }
 0x373   : > { %11116 = vmatprep.subr.bf16.mxu1 %v11981_v32  ;;  %v724_v42 = vcombine.high %v722_v39, %v722_v39  ;;  %v925_v45 = vpack.c.bf16 %v722_v39, %v722_v39 }
 0x375   : > { %11095 = vmatpush3.bf16.msra.mxu0 %v11980_v33  ;;  %v926_v47 = vpack.c.bf16 %v724_v42, %v724_v42 }
 0x376   : > { %11124 = vmatprep.subr.bf16.mxu0 %v11983_v36  ;;  %11117 = vmatpush3.bf16.msra.mxu1 %v11982_v38 }
 0x377   : > { %9114 = vmatprep.mubr.bf16.mxu1 %v926_v47 }
 0x378   : > { %9075 = vmatmul.mubr.bf16.vlgmr.msra.gmra.mrb[92].mxu0 %v923_v40 }
 0x379   : > { %11125 = vmatpush3.bf16.msra.mxu0 %v11984_v44  ;;  %9115 = vmatmul.mubr.bf16.vlgmr.msra.gmra.mrb[92].mxu1 %v925_v45 }
 0x37a   : > { %11126 = vmatprep.subr.bf16.mxu0 %v11985_v46  ;;  %9154 = vmatprep.mubr.bf16.mxu0 %v928_v61 }
 0x37d   : > { %11127 = vmatpush3.bf16.msra.mxu0 %v11986_v48 }
 0x37e   : > { %11128 = vmatprep.subr.bf16.mxu0 %v11987_v49 }
 0x381   : > { %11129 = vmatpush3.bf16.msra.mxu0 %v11988_v50 }
 0x382   : > { %11130 = vmatprep.subr.bf16.mxu0 %v11989_v51 }
 0x385   : > { %11131 = vmatpush3.bf16.msra.mxu0 %v11990_v53 }
 0x386   : > { %11132 = vmatprep.subr.bf16.mxu0 %v11991_v55 }
 0x389   : > { %11133 = vmatpush3.bf16.msra.mxu0 %v11992_v57 }
 0x38a   : > { %11134 = vmatprep.subr.bf16.mxu0 %v11993_v59 }
 0x38b   : > { %v10832_v60 = vpop.f32.mrb[68].mxu0 }
 0x38c   : > { %v10833_v62 = vpop.f32.mrb[69].mxu0  ;;  %v10854_v1 = vpop.f32.mrb[68].mxu1 }
 0x38d   : > { %v10834_v63 = vadd.f32 %v10833_v62, %v10832_v60  ;;  %v10835_v0 = vpop.f32.mrb[70].mxu0  ;;  %v10855_v3 = vpop.f32.mrb[69].mxu1  ;;  %11135 = vmatpush3.bf16.msra.mxu0 %v11994_v2 }
 0x38e   : > { %v10836_v43 = vpop.f32.mrb[71].mxu0  ;;  %v10856_v6 = vadd.f32 %v10855_v3, %v10854_v1  ;;  %v10857_v7 = vpop.f32.mrb[70].mxu1  ;;  %11136 = vmatprep.subr.bf16.mxu0 %v11995_v4 }
 0x38f   : > { %v8597_v5 = vadd.f32 %v10834_v63, %v13249_v26  ;;  %v10858_v8 = vpop.f32.mrb[71].mxu1 }
 0x391   : > { %v8637_v9 = vadd.f32 %v10856_v6, %v8597_v5  ;;  %11137 = vmatpush3.bf16.msra.mxu0 %v11996_v10 }
 0x392   : > { %11138 = vmatprep.subr.bf16.mxu0 %v11997_v11 }
 0x395   : > { %11139 = vmatpush3.bf16.msra.mxu0 %v11998_v12 }
 0x398   : > { %9155 = vmatmul.mubr.bf16.vlgmr.msra.gmra.mrb[96].mxu0 %v927_v13 }
 0x3ab   : > { %v10876_v14 = vpop.f32.mrb[72].mxu0 }
 0x3ac   : > { %v10877_v15 = vpop.f32.mrb[73].mxu0  ;;  %v10898_v18 = vpop.f32.mrb[72].mxu1 }
 0x3ad   : > { %v10878_v16 = vadd.f32 %v10877_v15, %v10876_v14  ;;  %v10879_v17 = vpop.f32.mrb[74].mxu0  ;;  %v10899_v20 = vpop.f32.mrb[73].mxu1 }
 0x3ae   : > { %v10880_v19 = vpop.f32.mrb[75].mxu0  ;;  %v10900_v22 = vadd.f32 %v10899_v20, %v10898_v18  ;;  %v10901_v23 = vpop.f32.mrb[74].mxu1 }
 0x3af   : > { %v8677_v21 = vadd.f32 %v10878_v16, %v8637_v9  ;;  %v10902_v24 = vpop.f32.mrb[75].mxu1 }
 0x3b1   : > { %v8717_v25 = vadd.f32 %v10900_v22, %v8677_v21 }
 0x3cb   : > { %v10920_v26 = vpop.f32.mrb[76].mxu0 }
 0x3cc   : > { %v10921_v27 = vpop.f32.mrb[77].mxu0  ;;  %v10942_v30 = vpop.f32.mrb[76].mxu1 }
 0x3cd   : > { %v10922_v28 = vadd.f32 %v10921_v27, %v10920_v26  ;;  %v10923_v29 = vpop.f32.mrb[78].mxu0  ;;  %v10943_v32 = vpop.f32.mrb[77].mxu1  ;;  %v929_v26 = vld [vmem:[#allocation8] sm:$0x3] }
 0x3ce   : > { %v10924_v31 = vpop.f32.mrb[79].mxu0  ;;  %v10944_v34 = vadd.f32 %v10943_v32, %v10942_v30  ;;  %v10945_v35 = vpop.f32.mrb[78].mxu1 }
 0x3cf   : > { %v8757_v33 = vadd.f32 %v10922_v28, %v8717_v25  ;;  %v10946_v36 = vpop.f32.mrb[79].mxu1 }
 0x3d1   : > { %v8797_v37 = vadd.f32 %v10944_v34, %v8757_v33 }
 0x3eb   : > { %v10964_v38 = vpop.f32.mrb[80].mxu0 }
 0x3ec   : > { %v10965_v39 = vpop.f32.mrb[81].mxu0  ;;  %v10986_v42 = vpop.f32.mrb[80].mxu1 }
 0x3ed   : > { %v10966_v40 = vadd.f32 %v10965_v39, %v10964_v38  ;;  %v10967_v41 = vpop.f32.mrb[82].mxu0  ;;  %v10987_v45 = vpop.f32.mrb[81].mxu1 }
 0x3ee   : > { %v10968_v44 = vpop.f32.mrb[83].mxu0  ;;  %v10988_v47 = vadd.f32 %v10987_v45, %v10986_v42  ;;  %v10989_v48 = vpop.f32.mrb[82].mxu1 }
 0x3ef   : > { %v8837_v46 = vadd.f32 %v10966_v40, %v8797_v37  ;;  %v10990_v49 = vpop.f32.mrb[83].mxu1 }
 0x3f1   : > { %v8877_v50 = vadd.f32 %v10988_v47, %v8837_v46 }
 0x40b   : > { %v11008_v51 = vpop.f32.mrb[84].mxu0 }
 0x40c   : > { %v11009_v52 = vpop.f32.mrb[85].mxu0  ;;  %v11030_v55 = vpop.f32.mrb[84].mxu1 }
 0x40d   : > { %v11010_v53 = vadd.f32 %v11009_v52, %v11008_v51  ;;  %v11011_v54 = vpop.f32.mrb[86].mxu0  ;;  %v11031_v57 = vpop.f32.mrb[85].mxu1 }
 0x40e   : > { %v11012_v56 = vpop.f32.mrb[87].mxu0  ;;  %v11032_v59 = vadd.f32 %v11031_v57, %v11030_v55  ;;  %v11033_v60 = vpop.f32.mrb[86].mxu1 }
 0x40f   : > { %v8917_v58 = vadd.f32 %v11010_v53, %v8877_v50  ;;  %v11034_v61 = vpop.f32.mrb[87].mxu1 }
 0x411   : > { %v8957_v62 = vadd.f32 %v11032_v59, %v8917_v58 }
 0x42b   : > { %v11052_v63 = vpop.f32.mrb[88].mxu0 }
 0x42c   : > { %v11053_v0 = vpop.f32.mrb[89].mxu0  ;;  %v11074_v43 = vpop.f32.mrb[88].mxu1 }
 0x42d   : > { %v11054_v1 = vadd.f32 %v11053_v0, %v11052_v63  ;;  %v11055_v2 = vpop.f32.mrb[90].mxu0  ;;  %v11075_v4 = vpop.f32.mrb[89].mxu1 }
 0x42e   : > { %v11056_v3 = vpop.f32.mrb[91].mxu0  ;;  %v11076_v6 = vadd.f32 %v11075_v4, %v11074_v43  ;;  %v11077_v7 = vpop.f32.mrb[90].mxu1 }
 0x42f   : > { %v8997_v5 = vadd.f32 %v11054_v1, %v8957_v62  ;;  %v11078_v8 = vpop.f32.mrb[91].mxu1 }
 0x431   : > { %v9037_v9 = vadd.f32 %v11076_v6, %v8997_v5 }
 0x44b   : > { %v11096_v10 = vpop.f32.mrb[92].mxu0 }
 0x44c   : > { %v11097_v11 = vpop.f32.mrb[93].mxu0  ;;  %v11118_v14 = vpop.f32.mrb[92].mxu1 }
 0x44d   : > { %v11098_v12 = vadd.f32 %v11097_v11, %v11096_v10  ;;  %v11099_v13 = vpop.f32.mrb[94].mxu0  ;;  %v11119_v16 = vpop.f32.mrb[93].mxu1 }
 0x44e   : > { %v11100_v15 = vpop.f32.mrb[95].mxu0  ;;  %v11120_v18 = vadd.f32 %v11119_v16, %v11118_v14  ;;  %v11121_v19 = vpop.f32.mrb[94].mxu1 }
 0x44f   : > { %v9077_v17 = vadd.f32 %v11098_v12, %v9037_v9  ;;  %v11122_v20 = vpop.f32.mrb[95].mxu1 }
 0x451   : > { %v9117_v21 = vadd.f32 %v11120_v18, %v9077_v17 }
 0x46b   : > { %v11140_v22 = vpop.f32.mrb[96].mxu0 }
 0x46c   : > { %v11141_v23 = vpop.f32.mrb[97].mxu0 }
 0x46d   : > { %v11142_v24 = vadd.f32 %v11141_v23, %v11140_v22  ;;  %v11143_v25 = vpop.f32.mrb[98].mxu0  ;;  %9167 = sbr.rel (%p10061_p12) target bundleno = 1308 (0x51c), region = 52 }
 0x46e   : > { %v11144_v27 = vpop.f32.mrb[99].mxu0 }
 0x46f   : > { %v9157_v28 = vadd.f32 %v11142_v24, %v9117_v21 }
 0x471   : > { %v9162_v29 = vadd.f32 %v9157_v28, %v929_v26 }
 0x473   : > { %9163 = vst [vmem:[#allocation8] sm:$0x3] %v9162_v29 }
 0x47a   : > { %v9168_v30 = vld [vmem:[#allocation8] sm:$0x3] }
 0x47b   : > { %v9169_v31 = vmul.f32 %v9168_v30, %v9168_v30 }
 0x47d   : > { %v9171_v32 = vsel %vm9170_vm0, %v9169_v31, 0.0 }
 0x47e   : > { %9172 = vadd.xlane.f32.xlu0 %v9171_v32 }
 0x50b   : > { %v9173_v33 = vpop.xlane.xlu0 %9172 }
 0x50c   : > { %v9174_v34 = vmax.f32 %v9173_v33, 1e-24 }
 0x50e   : > { %11999 = vrsqrt.f32 %v9174_v34 }
 0x518   : > { %v12000_v35 = vpop.eup %11999 }
 0x519   : > { %v9176_v36 = vmul.f32 %v12000_v35, %v9168_v30 }
 0x51b   : > { %9177 = vst [vmem:[#allocation8] sm:$0x3] %v9176_v36 }
 0x51c PF: > { %p11176_p3 = scmp.eq.s32.totalorder %s12209_s16, 1  ;;  %s12169_s21 = smov [#allocation8]  }
 0x51d   : > { %s9185_s22 = sshll.u32 %s12169_s21, 4  ;;  %s9186_s22 = int_to_ptr.vmem [resolvable:$true] %s9185_s22 }
 0x51e   : > { %s12089_s9 = scalar_lea.vmem %s9186_s22, 32  ;;  %p12096_p13 = scmp.lt.s32.totalorder %s9186_s22, %s9186_s22 }
 0x51f   : > { %p12090_p8 = scmp.ne.s32.totalorder %s9186_s22, %s12089_s9  ;;  %p12097_p2 = scmp.lt.s32.totalorder %s12089_s9, %s12089_s9 }
 0x521   : > { %p12091_p0 = pnand %p12090_p8, %p11176_p3  ;;  %p12098_p6 = por %p12097_p2, %p12096_p13 }
 0x523   : > { %p12092_p1 = pneg %p12091_p0 }
 0x525   : > { %p12099_p9 = pnand %p12098_p6, %p12092_p1 }
 0x527   : > { %12102 = shalt.err (!%p12099_p9)
}
 0x528   : > { %s12103_s15 = scalar_lea.hbm %s13319_s3, 32 }
 0x529   : > { %p12104_p7 = scmp.ne.s32.totalorder %s13319_s3, %s12103_s15  ;;  %p12109_p10 = scmp.lt.u32.totalorder %s12103_s15, %s13319_s3 }
 0x52b   : > { %p12105_p5 = pnand %p12104_p7, %p11176_p3 }
 0x52d   : > { %p12106_p4 = pneg %p12105_p5 }
 0x52f   : > { %p12111_p11 = pnand %p12109_p10, %p12106_p4 }
 0x531   : > { %12114 = shalt.err (!%p12111_p11)
}
 0x532   : > { %11159 = dma.vmem_to_hbm [thread:$0]  (%p11176_p3), %s9186_s22, 32, %s13319_s3, [#allocation4]  }
 0x533   : > { %12144 = dma.done.wait (%p11176_p3), [#allocation4], 32  }
 0x534   : > { %12146 = vsyncadd (%p11176_p3), [#allocation4], 4294967264 }
 0x535 PF: > { %p17_p12 = scmp.ge.s32.totalorder %s12212_s17, 4   ;;  %s13334_s12 = smov %s12153_s13 }
 0x536   : > { %s13335_s13 = smov %s12157_s14  ;;  %s13336_s14 = smov %s12222_s20 }
 0x537   : > { %s13337_s15 = smov %s12212_s17  ;;  %19 = sbr.rel (!%p17_p12) target bundleno = 6 (0x6), region = 94 }
 0x53e   :  { %9198 = vsyncpa [#allocation3], 1 }
 0x53f   :  { %9200 = vsyncpa [#allocation3 + $0x1], 1 }
 0x540   :  { %9201 = vsyncpa [#allocation6], 1 }
 0x541   :  { %9203 = vsyncpa [#allocation6 + $0x1], 1 }
 0x542   :  { %9204 = vsyncpa [#allocation4], 1 }
 0x543   :  { %9206 = vsyncpa [#allocation4 + $0x1], 1 }

</bundles_post_ra>
